<compile_context>
chip_gen: v5e
topology: v5e:2x2
jax: 0.10.0
libtpu: 0.0.40
codegen_flags: <defaults>
</compile_context>

<pallas_src>
import functools
from typing import NamedTuple, Optional

import jax
import jax.numpy as jnp
from jax.experimental import pallas as pl
from jax.experimental.pallas import tpu as pltpu


# --------------------------------------------------------------------------
# Config (small synthetic whisper)
# --------------------------------------------------------------------------
class WhisperConfig(NamedTuple):
    vocab_size: int = 128
    num_mel_bins: int = 8
    d_model: int = 32
    encoder_layers: int = 2
    decoder_layers: int = 2
    encoder_attention_heads: int = 4
    decoder_attention_heads: int = 4
    encoder_ffn_dim: int = 64
    decoder_ffn_dim: int = 64
    max_source_positions: int = 8      # audio frames after conv2 (stride 2)
    max_target_positions: int = 16
    pad_token_id: int = 0
    decoder_start_token_id: int = 1
    layer_norm_eps: float = 1e-5


class TtWhisperLMOutput(NamedTuple):
    loss: Optional[jnp.ndarray]
    logits: jnp.ndarray
    encoder_last_hidden_state: jnp.ndarray
    decoder_last_hidden_state: jnp.ndarray


# --------------------------------------------------------------------------
# Tile budgets (sized for v7x 64 MiB VMEM; also fine on v5e/v6e)
# --------------------------------------------------------------------------
MM_TM = 256          # matmul row tile
MM_TN = 256          # matmul column tile (lane-dense, multiple of 128)
MM_TK = 512          # matmul contraction tile
ATTN_TQ = 128        # attention query tile
ATTN_TK = 128        # attention key/value tile
VMEM_LIMIT = 32 * 1024 * 1024   # worst-case per-call buffers ~4 MiB << limit


def _round_up(x, m):
    return ((x + m - 1) // m) * m


def _pick_contraction_tile(K):
    if K <= MM_TK:
        return K
    for t in (512, 256, 128):
        if K % t == 0:
            return t
    return MM_TK          # fall back to zero-padding K up to a multiple


# --------------------------------------------------------------------------
# Fused [LayerNorm] -> matmul -> [bias] -> [GELU] -> [+residual] kernel
# --------------------------------------------------------------------------
def _fused_mm_kernel(*refs, ln, has_bias, has_residual, activation, eps, n_k):
    it = iter(refs)
    x_ref = next(it)
    g_ref = next(it) if ln else None
    b_ref = next(it) if ln else None
    w_ref = next(it)
    bias_ref = next(it) if has_bias else None
    res_ref = next(it) if has_residual else None
    o_ref = next(it)
    acc_ref = next(it)                       # (tm, tn) f32 scratch
    xln_ref = next(it) if ln else None       # (tm, K) bf16 scratch (LN cache)

    j = pl.program_id(1)
    k = pl.program_id(2)

    if ln:
        # LayerNorm computed once per row tile and cached in VMEM; reused for
        # every output column tile (j > 0).  LN-fused calls keep full-K blocks
        # (K = d_model), so k is always 0 here.
        @pl.when(jnp.logical_and(j == 0, k == 0))
        def _():
            x = x_ref[...].astype(jnp.float32)
            mean = jnp.mean(x, axis=-1, keepdims=True)
            c = x - mean
            var = jnp.mean(c * c, axis=-1, keepdims=True)
            xln_ref[...] = ((c * jax.lax.rsqrt(var + eps)) * g_ref[...]
                            + b_ref[...]).astype(jnp.bfloat16)
        x_in = xln_ref[...]
    else:
        x_in = x_ref[...]                    # already bf16

    @pl.when(k == 0)
    def _():
        acc_ref[...] = jnp.zeros(acc_ref.shape, acc_ref.dtype)

    acc_ref[...] += jnp.dot(x_in, w_ref[...],
                            preferred_element_type=jnp.float32)

    @pl.when(k == n_k - 1)
    def _():
        acc = acc_ref[...]
        if has_bias:
            acc = acc + bias_ref[...]
        if activation == "gelu":
            # TODO(synk): tanh-approx GELU (torch default is exact erf);
            # exact-erf lowering in Mosaic is not guaranteed, deviation ~1e-3.
            acc = 0.5 * acc * (1.0 + jnp.tanh(
                0.7978845608028654 * (acc + 0.044715 * acc * acc * acc)))
        if has_residual:
            acc = acc + res_ref[...].astype(jnp.float32)
        o_ref[...] = acc.astype(o_ref.dtype)


def fused_linear(x2d, w, bias=None, *, ln=None, residual=None,
                 activation=None, eps=1e-5, out_dtype=jnp.bfloat16):
    """x2d: (M, K), w: (K, N) bf16, bias: (N,)|None, ln: (gamma, beta)|None
    applied to x inside the kernel, residual: (M, N)|None added in the
    epilogue.  Tail-safe M/N/K tiling with padding.  Returns (M, N)."""
    M, K = x2d.shape
    N = w.shape[1]

    x = x2d.astype(jnp.bfloat16)      # no-op when upstream already emits bf16
    w = w.astype(jnp.bfloat16)

    tm = MM_TM if M >= MM_TM else _round_up(M, 8)
    tn = MM_TN if N >= MM_TN else N
    tk = K if ln is not None else _pick_contraction_tile(K)

    Mp = _round_up(M, tm)
    Np = _round_up(N, tn)
    Kp = _round_up(K, tk)
    gm, gn, gk = Mp // tm, Np // tn, Kp // tk

    if Mp != M or Kp != K:
        x = jnp.pad(x, ((0, Mp - M), (0, Kp - K)))
    if Kp != K or Np != N:
        w = jnp.pad(w, ((0, Kp - K), (0, Np - N)))

    args = [x]
    in_specs = [pl.BlockSpec((tm, tk), lambda i, j, k: (i, k))]
    if ln is not None:
        g, b = ln
        args += [g.reshape(1, K).astype(jnp.float32),
                 b.reshape(1, K).astype(jnp.float32)]
        in_specs += [pl.BlockSpec((1, K), lambda i, j, k: (0, 0)),
                     pl.BlockSpec((1, K), lambda i, j, k: (0, 0))]
    args.append(w)
    in_specs.append(pl.BlockSpec((tk, tn), lambda i, j, k: (k, j)))
    if bias is not None:
        bvec = bias.astype(jnp.float32)
        if Np != N:
            bvec = jnp.pad(bvec, (0, Np - N))
        args.append(bvec.reshape(1, Np))
        in_specs.append(pl.BlockSpec((1, tn), lambda i, j, k: (0, j)))
    if residual is not None:
        r = residual.astype(jnp.bfloat16)
        if Mp != M or Np != N:
            r = jnp.pad(r, ((0, Mp - M), (0, Np - N)))
        args.append(r)
        in_specs.append(pl.BlockSpec((tm, tn), lambda i, j, k: (i, j)))

    scratch = [pltpu.VMEM((tm, tn), jnp.float32)]
    if ln is not None:
        scratch.append(pltpu.VMEM((tm, Kp), jnp.bfloat16))

    out = pl.pallas_call(
        functools.partial(_fused_mm_kernel, ln=ln is not None,
                          has_bias=bias is not None,
                          has_residual=residual is not None,
                          activation=activation, eps=eps, n_k=gk),
        out_shape=jax.ShapeDtypeStruct((Mp, Np), out_dtype),
        grid=(gm, gn, gk),
        in_specs=in_specs,
        out_specs=pl.BlockSpec((tm, tn), lambda i, j, k: (i, j)),
        scratch_shapes=scratch,
        compiler_params=pltpu.CompilerParams(
            dimension_semantics=("parallel",
                                 "arbitrary" if ln is not None else "parallel",
                                 "arbitrary"),
            vmem_limit_bytes=VMEM_LIMIT),
    )(*args)

    if Mp != M or Np != N:
        out = out[:M, :N]
    return out


# --------------------------------------------------------------------------
# Standalone row-tiled LayerNorm (final encoder / decoder LN only)
# --------------------------------------------------------------------------
def _ln_kernel(x_ref, g_ref, b_ref, o_ref, *, eps):
    x = x_ref[...].astype(jnp.float32)
    mean = jnp.mean(x, axis=-1, keepdims=True)
    c = x - mean
    var = jnp.mean(c * c, axis=-1, keepdims=True)
    o_ref[...] = ((c * jax.lax.rsqrt(var + eps)) * g_ref[...]
                  + b_ref[...]).astype(o_ref.dtype)


def pallas_layer_norm(x, gamma, beta, eps=1e-5):
    B, T, D = x.shape
    M = B * T
    x2 = x.reshape(M, D).astype(jnp.bfloat16)
    tm = MM_TM if M >= MM_TM else _round_up(M, 8)
    Mp = _round_up(M, tm)
    if Mp != M:
        x2 = jnp.pad(x2, ((0, Mp - M), (0, 0)))
    out = pl.pallas_call(
        functools.partial(_ln_kernel, eps=eps),
        out_shape=jax.ShapeDtypeStruct((Mp, D), jnp.bfloat16),
        grid=(Mp // tm,),
        in_specs=[pl.BlockSpec((tm, D), lambda i: (i, 0)),
                  pl.BlockSpec((1, D), lambda i: (0, 0)),
                  pl.BlockSpec((1, D), lambda i: (0, 0))],
        out_specs=pl.BlockSpec((tm, D), lambda i: (i, 0)),
        compiler_params=pltpu.CompilerParams(
            dimension_semantics=("parallel",),
            vmem_limit_bytes=VMEM_LIMIT),
    )(x2, gamma.reshape(1, D).astype(jnp.float32),
      beta.reshape(1, D).astype(jnp.float32))
    if Mp != M:
        out = out[:M]
    return out.reshape(B, T, D)


# --------------------------------------------------------------------------
# Flash-style attention: online softmax, heads folded into the batch dim
# --------------------------------------------------------------------------
def _flash_attn_kernel(q_ref, k_ref, v_ref, o_ref, m_sc, l_sc, acc_sc,
                       *, causal, kv_len, tq, tk):
    qi = pl.program_id(0)
    ki = pl.program_id(1)

    @pl.when(ki == 0)
    def _():
        m_sc[...] = jnp.full(m_sc.shape, -jnp.inf, dtype=m_sc.dtype)
        l_sc[...] = jnp.zeros(l_sc.shape, l_sc.dtype)
        acc_sc[...] = jnp.zeros(acc_sc.shape, acc_sc.dtype)

    # q is pre-scaled (1/sqrt(Dh) folded into the projection at init)
    s = jnp.einsum("bqd,bkd->bqk", q_ref[...], k_ref[...],
                   preferred_element_type=jnp.float32)     # (BH, tq, tk) f32

    col = ki * tk + jax.lax.broadcasted_iota(jnp.int32, (tq, tk), 1)
    keep = col < kv_len                                    # key-padding mask
    if causal:
        row = qi * tq + jax.lax.broadcasted_iota(jnp.int32, (tq, tk), 0)
        keep = jnp.logical_and(keep, row >= col)
    s = jnp.where(keep[None, :, :], s, -1e30)

    m_prev = m_sc[...]
    m_new = jnp.maximum(m_prev, jnp.max(s, axis=-1, keepdims=True))
    alpha = jnp.exp(m_prev - m_new)
    p = jnp.exp(s - m_new)
    l_sc[...] = alpha * l_sc[...] + jnp.sum(p, axis=-1, keepdims=True)
    acc_sc[...] = alpha * acc_sc[...] + jnp.einsum(
        "bqk,bkd->bqd", p.astype(jnp.bfloat16), v_ref[...],
        preferred_element_type=jnp.float32)
    m_sc[...] = m_new

    @pl.when(ki == pl.num_programs(1) - 1)
    def _():
        o_ref[...] = (acc_sc[...] *
                      pl.reciprocal(l_sc[...], approx=True)).astype(o_ref.dtype)


def flash_attention(q, k, v, *, causal):
    """q: (B*H, Tq, Dh), k/v: (B*H, Tk, Dh) bf16 -> (B*H, Tq, Dh) bf16."""
    BH, Tq, Dh = q.shape
    Tk = k.shape[1]
    tq = Tq if Tq <= ATTN_TQ else ATTN_TQ
    tkv = Tk if Tk <= ATTN_TK else ATTN_TK
    Tqp = _round_up(Tq, tq)
    Tkp = _round_up(Tk, tkv)
    if Tqp != Tq:
        q = jnp.pad(q, ((0, 0), (0, Tqp - Tq), (0, 0)))
    if Tkp != Tk:
        k = jnp.pad(k, ((0, 0), (0, Tkp - Tk), (0, 0)))
        v = jnp.pad(v, ((0, 0), (0, Tkp - Tk), (0, 0)))

    out = pl.pallas_call(
        functools.partial(_flash_attn_kernel, causal=causal,
                          kv_len=Tk, tq=tq, tk=tkv),
        out_shape=jax.ShapeDtypeStruct((BH, Tqp, Dh), jnp.bfloat16),
        grid=(Tqp // tq, Tkp // tkv),
        in_specs=[pl.BlockSpec((BH, tq, Dh), lambda qi, ki: (0, qi, 0)),
                  pl.BlockSpec((BH, tkv, Dh), lambda qi, ki: (0, ki, 0)),
                  pl.BlockSpec((BH, tkv, Dh), lambda qi, ki: (0, ki, 0))],
        out_specs=pl.BlockSpec((BH, tq, Dh), lambda qi, ki: (0, qi, 0)),
        scratch_shapes=[pltpu.VMEM((BH, tq, 1), jnp.float32),
                        pltpu.VMEM((BH, tq, 1), jnp.float32),
                        pltpu.VMEM((BH, tq, Dh), jnp.float32)],
        compiler_params=pltpu.CompilerParams(
            dimension_semantics=("parallel", "arbitrary"),
            vmem_limit_bytes=VMEM_LIMIT),
    )(q.astype(jnp.bfloat16), k.astype(jnp.bfloat16), v.astype(jnp.bfloat16))

    if Tqp != Tq:
        out = out[:, :Tq, :]
    return out


def _split_heads(x2d, B, T, H, Dh):
    # (B*T, H*Dh) -> (B*H, T, Dh).  XLA layout glue (cheap relative to kernels).
    return x2d.reshape(B, T, H, Dh).transpose(0, 2, 1, 3).reshape(B * H, T, Dh)


def _merge_heads(x, B, H, T, Dh):
    return x.reshape(B, H, T, Dh).transpose(0, 2, 1, 3).reshape(B * T, H * Dh)


# --------------------------------------------------------------------------
# Model building blocks (glue around Pallas kernels)
# --------------------------------------------------------------------------
def conv1d_gelu(x_ncw, w_mat, b, *, kernel_size, stride, padding):
    """x_ncw: (B, Cin, T), w_mat: (Cin*K, Cout) -> (B, Tout, Cout) with GELU.
    TODO(synk): move the im2col gather into the Pallas kernel (K shifted
    matmuls accumulated in VMEM) to avoid the HBM im2col blow-up at real sizes."""
    B, Cin, T = x_ncw.shape
    K = kernel_size
    Cout = w_mat.shape[1]
    xp = jnp.pad(x_ncw, ((0, 0), (0, 0), (padding, padding)))
    Tout = (T + 2 * padding - K) // stride + 1
    idx = jnp.arange(Tout)[:, None] * stride + jnp.arange(K)[None, :]
    patches = xp[:, :, idx]                              # (B, Cin, Tout, K)
    patches = patches.transpose(0, 2, 1, 3).reshape(B * Tout, Cin * K)
    out = fused_linear(patches.astype(jnp.bfloat16), w_mat, b, activation="gelu")
    return out.reshape(B, Tout, Cout)


def encoder_layer(lp, cfg, h):
    B, T, D = h.shape
    H = cfg.encoder_attention_heads
    Dh = D // H
    h2 = h.reshape(B * T, D)
    # pre-LN fused into the QKV projection (q already scaled at init)
    qkv = fused_linear(h2, lp["sa"]["qkv_w"], lp["sa"]["qkv_b"],
                       ln=(lp["sa_ln_g"], lp["sa_ln_b"]), eps=cfg.layer_norm_eps)
    q = _split_heads(qkv[:, :D], B, T, H, Dh)
    k = _split_heads(qkv[:, D:2 * D], B, T, H, Dh)
    v = _split_heads(qkv[:, 2 * D:], B, T, H, Dh)
    attn = _merge_heads(flash_attention(q, k, v, causal=False), B, H, T, Dh)
    h2 = fused_linear(attn, lp["sa"]["o_w"], lp["sa"]["o_b"], residual=h2)
    # pre-LN fused into fc1 (+GELU), then fc2 + residual
    ff = fused_linear(h2, lp["fc1_w"], lp["fc1_b"],
                      ln=(lp["final_ln_g"], lp["final_ln_b"]),
                      activation="gelu", eps=cfg.layer_norm_eps)
    h2 = fused_linear(ff, lp["fc2_w"], lp["fc2_b"], residual=h2)
    return h2.reshape(B, T, D)


def decoder_layer(lp, cfg, h, enc_h2, Tk):
    B, T, D = h.shape
    H = cfg.decoder_attention_heads
    Dh = D // H
    h2 = h.reshape(B * T, D)
    # causal self attention, pre-LN fused into QKV
    qkv = fused_linear(h2, lp["sa"]["qkv_w"], lp["sa"]["qkv_b"],
                       ln=(lp["sa_ln_g"], lp["sa_ln_b"]), eps=cfg.layer_norm_eps)
    q = _split_heads(qkv[:, :D], B, T, H, Dh)
    k = _split_heads(qkv[:, D:2 * D], B, T, H, Dh)
    v = _split_heads(qkv[:, 2 * D:], B, T, H, Dh)
    attn = _merge_heads(flash_attention(q, k, v, causal=True), B, H, T, Dh)
    h2 = fused_linear(attn, lp["sa"]["o_w"], lp["sa"]["o_b"], residual=h2)
    # cross attention: pre-LN fused into q; fused K/V projection over encoder
    qc = fused_linear(h2, lp["ca"]["q_w"], lp["ca"]["q_b"],
                      ln=(lp["ca_ln_g"], lp["ca_ln_b"]), eps=cfg.layer_norm_eps)
    kvc = fused_linear(enc_h2, lp["ca"]["kv_w"], lp["ca"]["kv_b"])
    q = _split_heads(qc, B, T, H, Dh)
    k = _split_heads(kvc[:, :D], B, Tk, H, Dh)
    v = _split_heads(kvc[:, D:], B, Tk, H, Dh)
    attn = _merge_heads(flash_attention(q, k, v, causal=False), B, H, T, Dh)
    h2 = fused_linear(attn, lp["ca"]["o_w"], lp["ca"]["o_b"], residual=h2)
    # feed forward
    ff = fused_linear(h2, lp["fc1_w"], lp["fc1_b"],
                      ln=(lp["final_ln_g"], lp["final_ln_b"]),
                      activation="gelu", eps=cfg.layer_norm_eps)
    h2 = fused_linear(ff, lp["fc2_w"], lp["fc2_b"], residual=h2)
    return h2.reshape(B, T, D)


def encoder_forward(p, cfg, input_features):
    h = conv1d_gelu(input_features, p["conv1_w"], p["conv1_b"],
                    kernel_size=3, stride=1, padding=1)             # (B, T, D)
    h = conv1d_gelu(h.transpose(0, 2, 1), p["conv2_w"], p["conv2_b"],
                    kernel_size=3, stride=2, padding=1)             # (B, T//2, D)
    h = (h.astype(jnp.float32) + p["enc_pos"][None, :h.shape[1], :]
         ).astype(jnp.bfloat16)
    for lp in p["enc_layers"]:
        h = encoder_layer(lp, cfg, h)
    return pallas_layer_norm(h, p["enc_ln_g"], p["enc_ln_b"], cfg.layer_norm_eps)


def decoder_forward(p, cfg, decoder_input_ids, encoder_hidden):
    B, Tq = decoder_input_ids.shape
    # TODO(synk): embedding gather stays in XLA glue (jnp.take), not a Pallas kernel.
    tok = jnp.take(p["embed_tokens"], decoder_input_ids, axis=0)    # (B, Tq, D)
    h = (tok + p["dec_pos"][:Tq][None, :, :]).astype(jnp.bfloat16)
    Benc, Tk, D = encoder_hidden.shape
    enc_h2 = encoder_hidden.reshape(Benc * Tk, D)
    for lp in p["dec_layers"]:
        h = decoder_layer(lp, cfg, h, enc_h2, Tk)
    return pallas_layer_norm(h, p["dec_ln_g"], p["dec_ln_b"], cfg.layer_norm_eps)


def shift_tokens_right(input_ids, pad_token_id, decoder_start_token_id):
    shifted = jnp.zeros_like(input_ids)
    shifted = shifted.at[:, 1:].set(input_ids[:, :-1])
    shifted = shifted.at[:, 0].set(decoder_start_token_id)
    return jnp.where(shifted == -100, pad_token_id, shifted)


def cross_entropy_loss(logits, labels, ignore_index=-100):
    # TODO(synk): scalar-reduction loss kept in plain JAX glue (not a Pallas hot path).
    V = logits.shape[-1]
    lg = logits.reshape(-1, V).astype(jnp.float32)
    lb = labels.reshape(-1)
    logp = jax.nn.log_softmax(lg, axis=-1)
    valid = lb != ignore_index
    safe = jnp.where(valid, lb, 0)
    nll = -jnp.take_along_axis(logp, safe[:, None], axis=-1)[:, 0]
    return jnp.sum(jnp.where(valid, nll, 0.0)) / jnp.maximum(jnp.sum(valid), 1)


def whisper_for_conditional_generation_forward(
    params, cfg, input_features, decoder_input_ids=None, labels=None
):
    if labels is not None and decoder_input_ids is None:
        decoder_input_ids = shift_tokens_right(
            labels, cfg.pad_token_id, cfg.decoder_start_token_id)
    enc_h = encoder_forward(params, cfg, input_features)
    dec_h = decoder_forward(params, cfg, decoder_input_ids, enc_h)

    B, Tq, D = dec_h.shape
    # proj_out: Linear(d_model, vocab, bias=False); weight pre-transposed (D, V).
    lm_logits = fused_linear(dec_h.reshape(B * Tq, D), params["proj_out_w"],
                             out_dtype=jnp.float32)
    lm_logits = lm_logits.reshape(B, Tq, cfg.vocab_size)

    loss = cross_entropy_loss(lm_logits, labels) if labels is not None else None
    return TtWhisperLMOutput(
        loss=loss,
        logits=lm_logits,
        encoder_last_hidden_state=enc_h,
        decoder_last_hidden_state=dec_h,
    )


# --------------------------------------------------------------------------
# Deterministic parameter init (fused / pre-scaled / pre-transposed layouts)
# --------------------------------------------------------------------------
def init_params(key, cfg):
    keys = iter(jax.random.split(key, 512))
    D, F, V = cfg.d_model, cfg.encoder_ffn_dim, cfg.vocab_size
    H = cfg.encoder_attention_heads
    Dh = D // H
    scaling = Dh ** -0.5

    def w(shape, scale=0.02):
        return (scale * jax.random.normal(next(keys), shape)).astype(jnp.float32)

    def attn_params():
        q_w = w((D, D)) * scaling              # 1/sqrt(Dh) folded into q
        q_b = w((D,)) * scaling
        k_w = w((D, D))                        # k_proj has no bias
        v_w, v_b = w((D, D)), w((D,))
        o_w, o_b = w((D, D)), w((D,))
        zero_b = jnp.zeros((D,), jnp.float32)
        return {
            "qkv_w": jnp.concatenate([q_w, k_w, v_w], axis=1).astype(jnp.bfloat16),
            "qkv_b": jnp.concatenate([q_b, zero_b, v_b]),
            "q_w": q_w.astype(jnp.bfloat16), "q_b": q_b,
            "kv_w": jnp.concatenate([k_w, v_w], axis=1).astype(jnp.bfloat16),
            "kv_b": jnp.concatenate([zero_b, v_b]),
            "o_w": o_w.astype(jnp.bfloat16), "o_b": o_b,
        }

    def enc_layer_params():
        return {
            "sa": attn_params(),
            "sa_ln_g": jnp.ones((D,), jnp.float32), "sa_ln_b": jnp.zeros((D,), jnp.float32),
            "final_ln_g": jnp.ones((D,), jnp.float32), "final_ln_b": jnp.zeros((D,), jnp.float32),
            "fc1_w": w((D, F)).astype(jnp.bfloat16), "fc1_b": w((F,)),
            "fc2_w": w((F, D)).astype(jnp.bfloat16), "fc2_b": w((D,)),
        }

    def dec_layer_params():
        p = enc_layer_params()
        p["ca"] = attn_params()
        p["ca_ln_g"] = jnp.ones((D,), jnp.float32)
        p["ca_ln_b"] = jnp.zeros((D,), jnp.float32)
        return p

    embed_tokens = w((V, D))
    params = {
        "conv1_w": w((cfg.num_mel_bins * 3, D)).astype(jnp.bfloat16), "conv1_b": w((D,)),
        "conv2_w": w((D * 3, D)).astype(jnp.bfloat16), "conv2_b": w((D,)),
        "enc_pos": w((cfg.max_source_positions, D)),
        "enc_layers": [enc_layer_params() for _ in range(cfg.encoder_layers)],
        "enc_ln_g": jnp.ones((D,), jnp.float32), "enc_ln_b": jnp.zeros((D,), jnp.float32),
        "embed_tokens": embed_tokens,
        "dec_pos": w((cfg.max_target_positions, D)),
        "dec_layers": [dec_layer_params() for _ in range(cfg.decoder_layers)],
        "dec_ln_g": jnp.ones((D,), jnp.float32), "dec_ln_b": jnp.zeros((D,), jnp.float32),
        # tied output embedding, pre-transposed to (D, V)
        "proj_out_w": embed_tokens.T.astype(jnp.bfloat16),
    }
    return params


# --------------------------------------------------------------------------
if __name__ == "__main__":
    cfg = WhisperConfig()
    B = 2
    T_AUDIO = 16       # conv1 (stride 1) -> 16, conv2 (stride 2) -> 8
    T_DEC = 8

    root = jax.random.PRNGKey(0)
    k_params, k_feat, k_lab = jax.random.split(root, 3)

    params = init_params(k_params, cfg)
    input_features = jax.random.normal(k_feat, (B, cfg.num_mel_bins, T_AUDIO), jnp.float32)
    labels = jax.random.randint(k_lab, (B, T_DEC), 0, cfg.vocab_size)

    fwd = jax.jit(lambda p, feats, labs: whisper_for_conditional_generation_forward(
        p, cfg, feats, decoder_input_ids=None, labels=labs))

    out = fwd(params, input_features, labels)
    jax.block_until_ready(out.logits)
    jax.block_until_ready(out.loss)

    assert out.logits.shape == (B, T_DEC, cfg.vocab_size)
    assert out.logits.dtype == jnp.float32
    assert out.encoder_last_hidden_state.shape == (B, cfg.max_source_positions, cfg.d_model)
    assert out.decoder_last_hidden_state.shape == (B, T_DEC, cfg.d_model)
    assert bool(jnp.isfinite(out.loss))
    print("KERNEL_OK")
</pallas_src>

<mosaic_0001>
module attributes {stable_mosaic.version = 11 : i64} {
  func.func @_fused_mm_kernel(%arg0: i32, %arg1: i32, %arg2: i32, %arg3: memref<16x32xbf16, #tpu.memory_space<vmem>>, %arg4: memref<1x32xf32, #tpu.memory_space<vmem>>, %arg5: memref<1x32xf32, #tpu.memory_space<vmem>>, %arg6: memref<32x96xbf16, #tpu.memory_space<vmem>>, %arg7: memref<1x96xf32, #tpu.memory_space<vmem>>, %arg8: memref<16x96xbf16, #tpu.memory_space<vmem>>, %arg9: memref<16x96xf32, #tpu.memory_space<vmem>>, %arg10: memref<16x32xbf16, #tpu.memory_space<vmem>>) attributes {dimension_semantics = [#tpu.dimension_semantics<parallel>, #tpu.dimension_semantics<arbitrary>, #tpu.dimension_semantics<arbitrary>], iteration_bounds = array<i64: 1, 1, 1>, scalar_prefetch = 0 : i64, scratch_operands = 2 : i64, tpu.core_type = #tpu.core_type<tc>, window_params = [{transform_indices = @transform_0, window_bounds = array<i64: 16, 32>}, {pipeline_mode = #tpu.pipeline_mode<synchronous>, transform_indices = @transform_1, window_bounds = array<i64: 1, 32>}, {pipeline_mode = #tpu.pipeline_mode<synchronous>, transform_indices = @transform_2, window_bounds = array<i64: 1, 32>}, {transform_indices = @transform_3, window_bounds = array<i64: 32, 96>}, {transform_indices = @transform_4, window_bounds = array<i64: 1, 96>}, {transform_indices = @transform_5, window_bounds = array<i64: 16, 96>}]} {
    %c0_i32 = arith.constant 0 : i32
    %0 = arith.cmpi eq, %arg1, %c0_i32 : i32
    %c0_i32_0 = arith.constant 0 : i32
    %1 = arith.cmpi eq, %arg2, %c0_i32_0 : i32
    %2 = arith.andi %0, %1 : i1
    %3 = arith.extui %2 : i1 to i32
    %c0_i32_1 = arith.constant 0 : i32
    %4 = arith.cmpi ne, %3, %c0_i32_1 : i32
    scf.if %4 {
      %c0_13 = arith.constant 0 : index
      %c0_14 = arith.constant 0 : index
      %17 = vector.load %arg3[%c0_13, %c0_14] : memref<16x32xbf16, #tpu.memory_space<vmem>>, vector<16x32xbf16>
      %18 = arith.extf %17 : vector<16x32xbf16> to vector<16x32xf32>
      %cst_15 = arith.constant dense<0.000000e+00> : vector<16xf32>
      %19 = vector.multi_reduction <add>, %18, %cst_15 [1] : vector<16x32xf32> to vector<16xf32>
      %20 = vector.shape_cast %19 : vector<16xf32> to vector<16x1xf32>
      %cst_16 = arith.constant 3.200000e+01 : f32
      %21 = vector.broadcast %cst_16 : f32 to vector<16x1xf32>
      %22 = arith.divf %20, %21 : vector<16x1xf32>
      %23 = vector.broadcast %22 : vector<16x1xf32> to vector<16x32xf32>
      %24 = arith.subf %18, %23 : vector<16x32xf32>
      %25 = arith.mulf %24, %24 : vector<16x32xf32>
      %cst_17 = arith.constant dense<0.000000e+00> : vector<16xf32>
      %26 = vector.multi_reduction <add>, %25, %cst_17 [1] : vector<16x32xf32> to vector<16xf32>
      %27 = vector.shape_cast %26 : vector<16xf32> to vector<16x1xf32>
      %cst_18 = arith.constant 3.200000e+01 : f32
      %28 = vector.broadcast %cst_18 : f32 to vector<16x1xf32>
      %29 = arith.divf %27, %28 : vector<16x1xf32>
      %cst_19 = arith.constant 9.99999974E-6 : f32
      %30 = vector.broadcast %cst_19 : f32 to vector<16x1xf32>
      %31 = arith.addf %29, %30 : vector<16x1xf32>
      %32 = math.rsqrt %31 : vector<16x1xf32>
      %33 = vector.broadcast %32 : vector<16x1xf32> to vector<16x32xf32>
      %34 = arith.mulf %24, %33 : vector<16x32xf32>
      %c0_20 = arith.constant 0 : index
      %c0_21 = arith.constant 0 : index
      %35 = vector.load %arg4[%c0_20, %c0_21] : memref<1x32xf32, #tpu.memory_space<vmem>>, vector<1x32xf32>
      %36 = vector.broadcast %35 : vector<1x32xf32> to vector<16x32xf32>
      %37 = arith.mulf %34, %36 : vector<16x32xf32>
      %c0_22 = arith.constant 0 : index
      %c0_23 = arith.constant 0 : index
      %38 = vector.load %arg5[%c0_22, %c0_23] : memref<1x32xf32, #tpu.memory_space<vmem>>, vector<1x32xf32>
      %39 = vector.broadcast %38 : vector<1x32xf32> to vector<16x32xf32>
      %40 = arith.addf %37, %39 : vector<16x32xf32>
      %41 = arith.truncf %40 : vector<16x32xf32> to vector<16x32xbf16>
      %c0_24 = arith.constant 0 : index
      %c0_25 = arith.constant 0 : index
      %42 = vector.load %arg10[%c0_24, %c0_25] : memref<16x32xbf16, #tpu.memory_space<vmem>>, vector<16x32xbf16>
      tpu.vector_store %arg10[%c0_24, %c0_25], %41 {strides = array<i32>} : memref<16x32xbf16, #tpu.memory_space<vmem>>, vector<16x32xbf16>,
    } else {
    }
    %c0 = arith.constant 0 : index
    %c0_2 = arith.constant 0 : index
    %5 = vector.load %arg10[%c0, %c0_2] : memref<16x32xbf16, #tpu.memory_space<vmem>>, vector<16x32xbf16>
    %c0_i32_3 = arith.constant 0 : i32
    %6 = arith.cmpi eq, %arg2, %c0_i32_3 : i32
    %7 = arith.extui %6 : i1 to i32
    %c0_i32_4 = arith.constant 0 : i32
    %8 = arith.cmpi ne, %7, %c0_i32_4 : i32
    scf.if %8 {
      %cst_13 = arith.constant 0.000000e+00 : f32
      %17 = vector.broadcast %cst_13 : f32 to vector<16x96xf32>
      %c0_14 = arith.constant 0 : index
      %c0_15 = arith.constant 0 : index
      %18 = vector.load %arg9[%c0_14, %c0_15] : memref<16x96xf32, #tpu.memory_space<vmem>>, vector<16x96xf32>
      tpu.vector_store %arg9[%c0_14, %c0_15], %17 {strides = array<i32>} : memref<16x96xf32, #tpu.memory_space<vmem>>, vector<16x96xf32>,
    } else {
    }
    %c0_5 = arith.constant 0 : index
    %c0_6 = arith.constant 0 : index
    %9 = vector.load %arg9[%c0_5, %c0_6] : memref<16x96xf32, #tpu.memory_space<vmem>>, vector<16x96xf32>
    %c0_7 = arith.constant 0 : index
    %c0_8 = arith.constant 0 : index
    %10 = vector.load %arg6[%c0_7, %c0_8] : memref<32x96xbf16, #tpu.memory_space<vmem>>, vector<32x96xbf16>
    %cst = arith.constant dense<0.000000e+00> : vector<16x96xf32>
    %11 = tpu.matmul %5, %10, %cst {dimension_numbers = #tpu.dot_dimension_numbers<[1], [0], [0], [1], [0, 0, 1, 1], [], []>} : vector<16x32xbf16>, vector<32x96xbf16>, vector<16x96xf32> -> vector<16x96xf32>
    %12 = arith.addf %9, %11 : vector<16x96xf32>
    %c0_9 = arith.constant 0 : index
    %c0_10 = arith.constant 0 : index
    %13 = vector.load %arg9[%c0_9, %c0_10] : memref<16x96xf32, #tpu.memory_space<vmem>>, vector<16x96xf32>
    tpu.vector_store %arg9[%c0_9, %c0_10], %12 {strides = array<i32>} : memref<16x96xf32, #tpu.memory_space<vmem>>, vector<16x96xf32>,
    %c0_i32_11 = arith.constant 0 : i32
    %14 = arith.cmpi eq, %arg2, %c0_i32_11 : i32
    %15 = arith.extui %14 : i1 to i32
    %c0_i32_12 = arith.constant 0 : i32
    %16 = arith.cmpi ne, %15, %c0_i32_12 : i32
    scf.if %16 {
      %c0_13 = arith.constant 0 : index
      %c0_14 = arith.constant 0 : index
      %17 = vector.load %arg9[%c0_13, %c0_14] : memref<16x96xf32, #tpu.memory_space<vmem>>, vector<16x96xf32>
      %c0_15 = arith.constant 0 : index
      %c0_16 = arith.constant 0 : index
      %18 = vector.load %arg7[%c0_15, %c0_16] : memref<1x96xf32, #tpu.memory_space<vmem>>, vector<1x96xf32>
      %19 = vector.broadcast %18 : vector<1x96xf32> to vector<16x96xf32>
      %20 = arith.addf %17, %19 : vector<16x96xf32>
      %21 = arith.truncf %20 : vector<16x96xf32> to vector<16x96xbf16>
      %c0_17 = arith.constant 0 : index
      %c0_18 = arith.constant 0 : index
      %22 = vector.load %arg8[%c0_17, %c0_18] : memref<16x96xbf16, #tpu.memory_space<vmem>>, vector<16x96xbf16>
      tpu.vector_store %arg8[%c0_17, %c0_18], %21 {strides = array<i32>} : memref<16x96xbf16, #tpu.memory_space<vmem>>, vector<16x96xbf16>,
    } else {
    }
    return
  }
  func.func @transform_0(%arg0: i32, %arg1: i32, %arg2: i32) -> (i32, i32) {
    %c0_i32 = arith.constant 0 : i32
    return %arg0, %arg2 : i32, i32
  }
  func.func @transform_1(%arg0: i32, %arg1: i32, %arg2: i32) -> (i32, i32) {
    %c0_i32 = arith.constant 0 : i32
    %c0_i32_0 = arith.constant 0 : i32
    %c0_i32_1 = arith.constant 0 : i32
    return %c0_i32, %c0_i32_0 : i32, i32
  }
  func.func @transform_2(%arg0: i32, %arg1: i32, %arg2: i32) -> (i32, i32) {
    %c0_i32 = arith.constant 0 : i32
    %c0_i32_0 = arith.constant 0 : i32
    %c0_i32_1 = arith.constant 0 : i32
    return %c0_i32, %c0_i32_0 : i32, i32
  }
  func.func @transform_3(%arg0: i32, %arg1: i32, %arg2: i32) -> (i32, i32) {
    %c0_i32 = arith.constant 0 : i32
    return %arg2, %arg1 : i32, i32
  }
  func.func @transform_4(%arg0: i32, %arg1: i32, %arg2: i32) -> (i32, i32) {
    %c0_i32 = arith.constant 0 : i32
    %c0_i32_0 = arith.constant 0 : i32
    return %c0_i32, %arg1 : i32, i32
  }
  func.func @transform_5(%arg0: i32, %arg1: i32, %arg2: i32) -> (i32, i32) {
    %c0_i32 = arith.constant 0 : i32
    return %arg0, %arg1 : i32, i32
  }
}

module attributes {stable_mosaic.version = 11 : i64} {
  func.func @_flash_attn_kernel(%arg0: i32, %arg1: i32, %arg2: memref<8x8x8xbf16, #tpu.memory_space<vmem>>, %arg3: memref<8x8x8xbf16, #tpu.memory_space<vmem>>, %arg4: memref<8x8x8xbf16, #tpu.memory_space<vmem>>, %arg5: memref<8x8x8xbf16, #tpu.memory_space<vmem>>, %arg6: memref<8x8x1xf32, #tpu.memory_space<vmem>>, %arg7: memref<8x8x1xf32, #tpu.memory_space<vmem>>, %arg8: memref<8x8x8xf32, #tpu.memory_space<vmem>>) attributes {dimension_semantics = [#tpu.dimension_semantics<parallel>, #tpu.dimension_semantics<arbitrary>], iteration_bounds = array<i64: 1, 1>, scalar_prefetch = 0 : i64, scratch_operands = 3 : i64, tpu.core_type = #tpu.core_type<tc>, window_params = [{transform_indices = @transform_0, window_bounds = array<i64: 8, 8, 8>}, {transform_indices = @transform_1, window_bounds = array<i64: 8, 8, 8>}, {transform_indices = @transform_2, window_bounds = array<i64: 8, 8, 8>}, {transform_indices = @transform_3, window_bounds = array<i64: 8, 8, 8>}]} {
    %c0_i32 = arith.constant 0 : i32
    %0 = arith.cmpi eq, %arg1, %c0_i32 : i32
    %1 = arith.extui %0 : i1 to i32
    %c0_i32_0 = arith.constant 0 : i32
    %2 = arith.cmpi ne, %1, %c0_i32_0 : i32
    scf.if %2 {
      %cst_35 = arith.constant 0xFF800000 : f32
      %50 = vector.broadcast %cst_35 : f32 to vector<8x8x1xf32>
      %c0_36 = arith.constant 0 : index
      %c0_37 = arith.constant 0 : index
      %c0_38 = arith.constant 0 : index
      %51 = vector.load %arg6[%c0_36, %c0_37, %c0_38] : memref<8x8x1xf32, #tpu.memory_space<vmem>>, vector<8x8x1xf32>
      tpu.vector_store %arg6[%c0_36, %c0_37, %c0_38], %50 {strides = array<i32>} : memref<8x8x1xf32, #tpu.memory_space<vmem>>, vector<8x8x1xf32>,
      %cst_39 = arith.constant 0.000000e+00 : f32
      %52 = vector.broadcast %cst_39 : f32 to vector<8x8x1xf32>
      %c0_40 = arith.constant 0 : index
      %c0_41 = arith.constant 0 : index
      %c0_42 = arith.constant 0 : index
      %53 = vector.load %arg7[%c0_40, %c0_41, %c0_42] : memref<8x8x1xf32, #tpu.memory_space<vmem>>, vector<8x8x1xf32>
      tpu.vector_store %arg7[%c0_40, %c0_41, %c0_42], %52 {strides = array<i32>} : memref<8x8x1xf32, #tpu.memory_space<vmem>>, vector<8x8x1xf32>,
      %cst_43 = arith.constant 0.000000e+00 : f32
      %54 = vector.broadcast %cst_43 : f32 to vector<8x8x8xf32>
      %c0_44 = arith.constant 0 : index
      %c0_45 = arith.constant 0 : index
      %c0_46 = arith.constant 0 : index
      %55 = vector.load %arg8[%c0_44, %c0_45, %c0_46] : memref<8x8x8xf32, #tpu.memory_space<vmem>>, vector<8x8x8xf32>
      tpu.vector_store %arg8[%c0_44, %c0_45, %c0_46], %54 {strides = array<i32>} : memref<8x8x8xf32, #tpu.memory_space<vmem>>, vector<8x8x8xf32>,
    } else {
    }
    %c0 = arith.constant 0 : index
    %c0_1 = arith.constant 0 : index
    %c0_2 = arith.constant 0 : index
    %3 = vector.load %arg2[%c0, %c0_1, %c0_2] : memref<8x8x8xbf16, #tpu.memory_space<vmem>>, vector<8x8x8xbf16>
    %c0_3 = arith.constant 0 : index
    %c0_4 = arith.constant 0 : index
    %c0_5 = arith.constant 0 : index
    %4 = vector.load %arg3[%c0_3, %c0_4, %c0_5] : memref<8x8x8xbf16, #tpu.memory_space<vmem>>, vector<8x8x8xbf16>
    "tpu.trace_start"() <{level = 10 : i32, message = "bqd,bkd->bqk"}> : () -> ()
    %cst = arith.constant dense<0.000000e+00> : vector<8x8x8xf32>
    %5 = tpu.matmul %3, %4, %cst {dimension_numbers = #tpu.dot_dimension_numbers<[2], [2], [1], [1], [0, 0, 0, 1, 1, 1], [0], [0]>} : vector<8x8x8xbf16>, vector<8x8x8xbf16>, vector<8x8x8xf32> -> vector<8x8x8xf32>
    "tpu.trace_stop"() : () -> ()
    %c8_i32 = arith.constant 8 : i32
    %6 = arith.muli %arg1, %c8_i32 : i32
    %7 = tpu.iota {dimensions = array<i32: 1>} : vector<8x8xi32>
    %8 = vector.broadcast %6 : i32 to vector<8x8xi32>
    %9 = arith.addi %8, %7 : vector<8x8xi32>
    %c8_i32_6 = arith.constant 8 : i32
    %10 = vector.broadcast %c8_i32_6 : i32 to vector<8x8xi32>
    %11 = arith.cmpi slt, %9, %10 : vector<8x8xi32>
    %c8_i32_7 = arith.constant 8 : i32
    %12 = arith.muli %arg0, %c8_i32_7 : i32
    %13 = tpu.iota {dimensions = array<i32: 0>} : vector<8x8xi32>
    %14 = vector.broadcast %12 : i32 to vector<8x8xi32>
    %15 = arith.addi %14, %13 : vector<8x8xi32>
    %16 = arith.cmpi sge, %15, %9 : vector<8x8xi32>
    %17 = arith.andi %11, %16 : vector<8x8xi1>
    %18 = vector.shape_cast %17 : vector<8x8xi1> to vector<1x8x8xi1>
    %cst_8 = arith.constant -1.000000e+30 : f32
    %19 = vector.shape_cast %18 : vector<1x8x8xi1> to vector<1x8x8xi1>
    %20 = vector.broadcast %19 : vector<1x8x8xi1> to vector<8x8x8xi1>
    %21 = vector.broadcast %cst_8 : f32 to vector<8x8x8xf32>
    %22 = arith.select %20, %5, %21 : vector<8x8x8xi1>, vector<8x8x8xf32>
    %c0_9 = arith.constant 0 : index
    %c0_10 = arith.constant 0 : index
    %c0_11 = arith.constant 0 : index
    %23 = vector.load %arg6[%c0_9, %c0_10, %c0_11] : memref<8x8x1xf32, #tpu.memory_space<vmem>>, vector<8x8x1xf32>
    %cst_12 = arith.constant dense<0xFF800000> : vector<8x8xf32>
    %24 = vector.multi_reduction <maximumf>, %22, %cst_12 [2] : vector<8x8x8xf32> to vector<8x8xf32>
    %25 = vector.shape_cast %24 : vector<8x8xf32> to vector<8x8x1xf32>
    %26 = arith.maximumf %23, %25 : vector<8x8x1xf32>
    %27 = arith.subf %23, %26 : vector<8x8x1xf32>
    %28 = math.exp %27 : vector<8x8x1xf32>
    %29 = vector.broadcast %26 : vector<8x8x1xf32> to vector<8x8x8xf32>
    %30 = arith.subf %22, %29 : vector<8x8x8xf32>
    %31 = math.exp %30 : vector<8x8x8xf32>
    %c0_13 = arith.constant 0 : index
    %c0_14 = arith.constant 0 : index
    %c0_15 = arith.constant 0 : index
    %32 = vector.load %arg7[%c0_13, %c0_14, %c0_15] : memref<8x8x1xf32, #tpu.memory_space<vmem>>, vector<8x8x1xf32>
    %33 = arith.mulf %28, %32 : vector<8x8x1xf32>
    %cst_16 = arith.constant dense<0.000000e+00> : vector<8x8xf32>
    %34 = vector.multi_reduction <add>, %31, %cst_16 [2] : vector<8x8x8xf32> to vector<8x8xf32>
    %35 = vector.shape_cast %34 : vector<8x8xf32> to vector<8x8x1xf32>
    %36 = arith.addf %33, %35 : vector<8x8x1xf32>
    %c0_17 = arith.constant 0 : index
    %c0_18 = arith.constant 0 : index
    %c0_19 = arith.constant 0 : index
    %37 = vector.load %arg7[%c0_17, %c0_18, %c0_19] : memref<8x8x1xf32, #tpu.memory_space<vmem>>, vector<8x8x1xf32>
    tpu.vector_store %arg7[%c0_17, %c0_18, %c0_19], %36 {strides = array<i32>} : memref<8x8x1xf32, #tpu.memory_space<vmem>>, vector<8x8x1xf32>,
    %c0_20 = arith.constant 0 : index
    %c0_21 = arith.constant 0 : index
    %c0_22 = arith.constant 0 : index
    %38 = vector.load %arg8[%c0_20, %c0_21, %c0_22] : memref<8x8x8xf32, #tpu.memory_space<vmem>>, vector<8x8x8xf32>
    %39 = vector.broadcast %28 : vector<8x8x1xf32> to vector<8x8x8xf32>
    %40 = arith.mulf %39, %38 : vector<8x8x8xf32>
    %41 = arith.truncf %31 : vector<8x8x8xf32> to vector<8x8x8xbf16>
    %c0_23 = arith.constant 0 : index
    %c0_24 = arith.constant 0 : index
    %c0_25 = arith.constant 0 : index
    %42 = vector.load %arg4[%c0_23, %c0_24, %c0_25] : memref<8x8x8xbf16, #tpu.memory_space<vmem>>, vector<8x8x8xbf16>
    "tpu.trace_start"() <{level = 10 : i32, message = "bqk,bkd->bqd"}> : () -> ()
    %cst_26 = arith.constant dense<0.000000e+00> : vector<8x8x8xf32>
    %43 = tpu.matmul %41, %42, %cst_26 {dimension_numbers = #tpu.dot_dimension_numbers<[2], [1], [1], [2], [0, 0, 0, 1, 1, 2], [0], [0]>} : vector<8x8x8xbf16>, vector<8x8x8xbf16>, vector<8x8x8xf32> -> vector<8x8x8xf32>
    "tpu.trace_stop"() : () -> ()
    %44 = arith.addf %40, %43 : vector<8x8x8xf32>
    %c0_27 = arith.constant 0 : index
    %c0_28 = arith.constant 0 : index
    %c0_29 = arith.constant 0 : index
    %45 = vector.load %arg8[%c0_27, %c0_28, %c0_29] : memref<8x8x8xf32, #tpu.memory_space<vmem>>, vector<8x8x8xf32>
    tpu.vector_store %arg8[%c0_27, %c0_28, %c0_29], %44 {strides = array<i32>} : memref<8x8x8xf32, #tpu.memory_space<vmem>>, vector<8x8x8xf32>,
    %c0_30 = arith.constant 0 : index
    %c0_31 = arith.constant 0 : index
    %c0_32 = arith.constant 0 : index
    %46 = vector.load %arg6[%c0_30, %c0_31, %c0_32] : memref<8x8x1xf32, #tpu.memory_space<vmem>>, vector<8x8x1xf32>
    tpu.vector_store %arg6[%c0_30, %c0_31, %c0_32], %26 {strides = array<i32>} : memref<8x8x1xf32, #tpu.memory_space<vmem>>, vector<8x8x1xf32>,
    %c0_i32_33 = arith.constant 0 : i32
    %47 = arith.cmpi eq, %arg1, %c0_i32_33 : i32
    %48 = arith.extui %47 : i1 to i32
    %c0_i32_34 = arith.constant 0 : i32
    %49 = arith.cmpi ne, %48, %c0_i32_34 : i32
    scf.if %49 {
      %c0_35 = arith.constant 0 : index
      %c0_36 = arith.constant 0 : index
      %c0_37 = arith.constant 0 : index
      %50 = vector.load %arg8[%c0_35, %c0_36, %c0_37] : memref<8x8x8xf32, #tpu.memory_space<vmem>>, vector<8x8x8xf32>
      %c0_38 = arith.constant 0 : index
      %c0_39 = arith.constant 0 : index
      %c0_40 = arith.constant 0 : index
      %51 = vector.load %arg7[%c0_38, %c0_39, %c0_40] : memref<8x8x1xf32, #tpu.memory_space<vmem>>, vector<8x8x1xf32>
      %52 = tpu.reciprocal %51 {approx = true} : vector<8x8x1xf32> -> vector<8x8x1xf32>
      %53 = vector.broadcast %52 : vector<8x8x1xf32> to vector<8x8x8xf32>
      %54 = arith.mulf %50, %53 : vector<8x8x8xf32>
      %55 = arith.truncf %54 : vector<8x8x8xf32> to vector<8x8x8xbf16>
      %c0_41 = arith.constant 0 : index
      %c0_42 = arith.constant 0 : index
      %c0_43 = arith.constant 0 : index
      %56 = vector.load %arg5[%c0_41, %c0_42, %c0_43] : memref<8x8x8xbf16, #tpu.memory_space<vmem>>, vector<8x8x8xbf16>
      tpu.vector_store %arg5[%c0_41, %c0_42, %c0_43], %55 {strides = array<i32>} : memref<8x8x8xbf16, #tpu.memory_space<vmem>>, vector<8x8x8xbf16>,
    } else {
    }
    return
  }
  func.func @transform_0(%arg0: i32, %arg1: i32) -> (i32, i32, i32) {
    %c0_i32 = arith.constant 0 : i32
    %c0_i32_0 = arith.constant 0 : i32
    %c0_i32_1 = arith.constant 0 : i32
    return %c0_i32, %arg0, %c0_i32_0 : i32, i32, i32
  }
  func.func @transform_1(%arg0: i32, %arg1: i32) -> (i32, i32, i32) {
    %c0_i32 = arith.constant 0 : i32
    %c0_i32_0 = arith.constant 0 : i32
    %c0_i32_1 = arith.constant 0 : i32
    return %c0_i32, %arg1, %c0_i32_0 : i32, i32, i32
  }
  func.func @transform_2(%arg0: i32, %arg1: i32) -> (i32, i32, i32) {
    %c0_i32 = arith.constant 0 : i32
    %c0_i32_0 = arith.constant 0 : i32
    %c0_i32_1 = arith.constant 0 : i32
    return %c0_i32, %arg1, %c0_i32_0 : i32, i32, i32
  }
  func.func @transform_3(%arg0: i32, %arg1: i32) -> (i32, i32, i32) {
    %c0_i32 = arith.constant 0 : i32
    %c0_i32_0 = arith.constant 0 : i32
    %c0_i32_1 = arith.constant 0 : i32
    return %c0_i32, %arg0, %c0_i32_0 : i32, i32, i32
  }
}

module attributes {stable_mosaic.version = 11 : i64} {
  func.func @_fused_mm_kernel(%arg0: i32, %arg1: i32, %arg2: i32, %arg3: memref<16x32xbf16, #tpu.memory_space<vmem>>, %arg4: memref<32x32xbf16, #tpu.memory_space<vmem>>, %arg5: memref<1x32xf32, #tpu.memory_space<vmem>>, %arg6: memref<16x32xbf16, #tpu.memory_space<vmem>>, %arg7: memref<16x32xbf16, #tpu.memory_space<vmem>>, %arg8: memref<16x32xf32, #tpu.memory_space<vmem>>) attributes {dimension_semantics = [#tpu.dimension_semantics<parallel>, #tpu.dimension_semantics<parallel>, #tpu.dimension_semantics<arbitrary>], iteration_bounds = array<i64: 1, 1, 1>, scalar_prefetch = 0 : i64, scratch_operands = 1 : i64, tpu.core_type = #tpu.core_type<tc>, window_params = [{transform_indices = @transform_0, window_bounds = array<i64: 16, 32>}, {transform_indices = @transform_1, window_bounds = array<i64: 32, 32>}, {transform_indices = @transform_2, window_bounds = array<i64: 1, 32>}, {transform_indices = @transform_3, window_bounds = array<i64: 16, 32>}, {transform_indices = @transform_4, window_bounds = array<i64: 16, 32>}]} {
    %c0 = arith.constant 0 : index
    %c0_0 = arith.constant 0 : index
    %0 = vector.load %arg3[%c0, %c0_0] : memref<16x32xbf16, #tpu.memory_space<vmem>>, vector<16x32xbf16>
    %c0_i32 = arith.constant 0 : i32
    %1 = arith.cmpi eq, %arg2, %c0_i32 : i32
    %2 = arith.extui %1 : i1 to i32
    %c0_i32_1 = arith.constant 0 : i32
    %3 = arith.cmpi ne, %2, %c0_i32_1 : i32
    scf.if %3 {
      %cst_10 = arith.constant 0.000000e+00 : f32
      %12 = vector.broadcast %cst_10 : f32 to vector<16x32xf32>
      %c0_11 = arith.constant 0 : index
      %c0_12 = arith.constant 0 : index
      %13 = vector.load %arg8[%c0_11, %c0_12] : memref<16x32xf32, #tpu.memory_space<vmem>>, vector<16x32xf32>
      tpu.vector_store %arg8[%c0_11, %c0_12], %12 {strides = array<i32>} : memref<16x32xf32, #tpu.memory_space<vmem>>, vector<16x32xf32>,
    } else {
    }
    %c0_2 = arith.constant 0 : index
    %c0_3 = arith.constant 0 : index
    %4 = vector.load %arg8[%c0_2, %c0_3] : memref<16x32xf32, #tpu.memory_space<vmem>>, vector<16x32xf32>
    %c0_4 = arith.constant 0 : index
    %c0_5 = arith.constant 0 : index
    %5 = vector.load %arg4[%c0_4, %c0_5] : memref<32x32xbf16, #tpu.memory_space<vmem>>, vector<32x32xbf16>
    %cst = arith.constant dense<0.000000e+00> : vector<16x32xf32>
    %6 = tpu.matmul %0, %5, %cst {dimension_numbers = #tpu.dot_dimension_numbers<[1], [0], [0], [1], [0, 0, 1, 1], [], []>} : vector<16x32xbf16>, vector<32x32xbf16>, vector<16x32xf32> -> vector<16x32xf32>
    %7 = arith.addf %4, %6 : vector<16x32xf32>
    %c0_6 = arith.constant 0 : index
    %c0_7 = arith.constant 0 : index
    %8 = vector.load %arg8[%c0_6, %c0_7] : memref<16x32xf32, #tpu.memory_space<vmem>>, vector<16x32xf32>
    tpu.vector_store %arg8[%c0_6, %c0_7], %7 {strides = array<i32>} : memref<16x32xf32, #tpu.memory_space<vmem>>, vector<16x32xf32>,
    %c0_i32_8 = arith.constant 0 : i32
    %9 = arith.cmpi eq, %arg2, %c0_i32_8 : i32
    %10 = arith.extui %9 : i1 to i32
    %c0_i32_9 = arith.constant 0 : i32
    %11 = arith.cmpi ne, %10, %c0_i32_9 : i32
    scf.if %11 {
      %c0_10 = arith.constant 0 : index
      %c0_11 = arith.constant 0 : index
      %12 = vector.load %arg8[%c0_10, %c0_11] : memref<16x32xf32, #tpu.memory_space<vmem>>, vector<16x32xf32>
      %c0_12 = arith.constant 0 : index
      %c0_13 = arith.constant 0 : index
      %13 = vector.load %arg5[%c0_12, %c0_13] : memref<1x32xf32, #tpu.memory_space<vmem>>, vector<1x32xf32>
      %14 = vector.broadcast %13 : vector<1x32xf32> to vector<16x32xf32>
      %15 = arith.addf %12, %14 : vector<16x32xf32>
      %c0_14 = arith.constant 0 : index
      %c0_15 = arith.constant 0 : index
      %16 = vector.load %arg6[%c0_14, %c0_15] : memref<16x32xbf16, #tpu.memory_space<vmem>>, vector<16x32xbf16>
      %17 = arith.extf %16 : vector<16x32xbf16> to vector<16x32xf32>
      %18 = arith.addf %15, %17 : vector<16x32xf32>
      %19 = arith.truncf %18 : vector<16x32xf32> to vector<16x32xbf16>
      %c0_16 = arith.constant 0 : index
      %c0_17 = arith.constant 0 : index
      %20 = vector.load %arg7[%c0_16, %c0_17] : memref<16x32xbf16, #tpu.memory_space<vmem>>, vector<16x32xbf16>
      tpu.vector_store %arg7[%c0_16, %c0_17], %19 {strides = array<i32>} : memref<16x32xbf16, #tpu.memory_space<vmem>>, vector<16x32xbf16>,
    } else {
    }
    return
  }
  func.func @transform_0(%arg0: i32, %arg1: i32, %arg2: i32) -> (i32, i32) {
    %c0_i32 = arith.constant 0 : i32
    return %arg0, %arg2 : i32, i32
  }
  func.func @transform_1(%arg0: i32, %arg1: i32, %arg2: i32) -> (i32, i32) {
    %c0_i32 = arith.constant 0 : i32
    return %arg2, %arg1 : i32, i32
  }
  func.func @transform_2(%arg0: i32, %arg1: i32, %arg2: i32) -> (i32, i32) {
    %c0_i32 = arith.constant 0 : i32
    %c0_i32_0 = arith.constant 0 : i32
    return %c0_i32, %arg1 : i32, i32
  }
  func.func @transform_3(%arg0: i32, %arg1: i32, %arg2: i32) -> (i32, i32) {
    %c0_i32 = arith.constant 0 : i32
    return %arg0, %arg1 : i32, i32
  }
  func.func @transform_4(%arg0: i32, %arg1: i32, %arg2: i32) -> (i32, i32) {
    %c0_i32 = arith.constant 0 : i32
    return %arg0, %arg1 : i32, i32
  }
}

module attributes {stable_mosaic.version = 11 : i64} {
  func.func @_fused_mm_kernel(%arg0: i32, %arg1: i32, %arg2: i32, %arg3: memref<16x32xbf16, #tpu.memory_space<vmem>>, %arg4: memref<1x32xf32, #tpu.memory_space<vmem>>, %arg5: memref<1x32xf32, #tpu.memory_space<vmem>>, %arg6: memref<32x32xbf16, #tpu.memory_space<vmem>>, %arg7: memref<1x32xf32, #tpu.memory_space<vmem>>, %arg8: memref<16x32xbf16, #tpu.memory_space<vmem>>, %arg9: memref<16x32xf32, #tpu.memory_space<vmem>>, %arg10: memref<16x32xbf16, #tpu.memory_space<vmem>>) attributes {dimension_semantics = [#tpu.dimension_semantics<parallel>, #tpu.dimension_semantics<arbitrary>, #tpu.dimension_semantics<arbitrary>], iteration_bounds = array<i64: 1, 1, 1>, scalar_prefetch = 0 : i64, scratch_operands = 2 : i64, tpu.core_type = #tpu.core_type<tc>, window_params = [{transform_indices = @transform_0, window_bounds = array<i64: 16, 32>}, {pipeline_mode = #tpu.pipeline_mode<synchronous>, transform_indices = @transform_1, window_bounds = array<i64: 1, 32>}, {pipeline_mode = #tpu.pipeline_mode<synchronous>, transform_indices = @transform_2, window_bounds = array<i64: 1, 32>}, {transform_indices = @transform_3, window_bounds = array<i64: 32, 32>}, {transform_indices = @transform_4, window_bounds = array<i64: 1, 32>}, {transform_indices = @transform_5, window_bounds = array<i64: 16, 32>}]} {
    %c0_i32 = arith.constant 0 : i32
    %0 = arith.cmpi eq, %arg1, %c0_i32 : i32
    %c0_i32_0 = arith.constant 0 : i32
    %1 = arith.cmpi eq, %arg2, %c0_i32_0 : i32
    %2 = arith.andi %0, %1 : i1
    %3 = arith.extui %2 : i1 to i32
    %c0_i32_1 = arith.constant 0 : i32
    %4 = arith.cmpi ne, %3, %c0_i32_1 : i32
    scf.if %4 {
      %c0_13 = arith.constant 0 : index
      %c0_14 = arith.constant 0 : index
      %17 = vector.load %arg3[%c0_13, %c0_14] : memref<16x32xbf16, #tpu.memory_space<vmem>>, vector<16x32xbf16>
      %18 = arith.extf %17 : vector<16x32xbf16> to vector<16x32xf32>
      %cst_15 = arith.constant dense<0.000000e+00> : vector<16xf32>
      %19 = vector.multi_reduction <add>, %18, %cst_15 [1] : vector<16x32xf32> to vector<16xf32>
      %20 = vector.shape_cast %19 : vector<16xf32> to vector<16x1xf32>
      %cst_16 = arith.constant 3.200000e+01 : f32
      %21 = vector.broadcast %cst_16 : f32 to vector<16x1xf32>
      %22 = arith.divf %20, %21 : vector<16x1xf32>
      %23 = vector.broadcast %22 : vector<16x1xf32> to vector<16x32xf32>
      %24 = arith.subf %18, %23 : vector<16x32xf32>
      %25 = arith.mulf %24, %24 : vector<16x32xf32>
      %cst_17 = arith.constant dense<0.000000e+00> : vector<16xf32>
      %26 = vector.multi_reduction <add>, %25, %cst_17 [1] : vector<16x32xf32> to vector<16xf32>
      %27 = vector.shape_cast %26 : vector<16xf32> to vector<16x1xf32>
      %cst_18 = arith.constant 3.200000e+01 : f32
      %28 = vector.broadcast %cst_18 : f32 to vector<16x1xf32>
      %29 = arith.divf %27, %28 : vector<16x1xf32>
      %cst_19 = arith.constant 9.99999974E-6 : f32
      %30 = vector.broadcast %cst_19 : f32 to vector<16x1xf32>
      %31 = arith.addf %29, %30 : vector<16x1xf32>
      %32 = math.rsqrt %31 : vector<16x1xf32>
      %33 = vector.broadcast %32 : vector<16x1xf32> to vector<16x32xf32>
      %34 = arith.mulf %24, %33 : vector<16x32xf32>
      %c0_20 = arith.constant 0 : index
      %c0_21 = arith.constant 0 : index
      %35 = vector.load %arg4[%c0_20, %c0_21] : memref<1x32xf32, #tpu.memory_space<vmem>>, vector<1x32xf32>
      %36 = vector.broadcast %35 : vector<1x32xf32> to vector<16x32xf32>
      %37 = arith.mulf %34, %36 : vector<16x32xf32>
      %c0_22 = arith.constant 0 : index
      %c0_23 = arith.constant 0 : index
      %38 = vector.load %arg5[%c0_22, %c0_23] : memref<1x32xf32, #tpu.memory_space<vmem>>, vector<1x32xf32>
      %39 = vector.broadcast %38 : vector<1x32xf32> to vector<16x32xf32>
      %40 = arith.addf %37, %39 : vector<16x32xf32>
      %41 = arith.truncf %40 : vector<16x32xf32> to vector<16x32xbf16>
      %c0_24 = arith.constant 0 : index
      %c0_25 = arith.constant 0 : index
      %42 = vector.load %arg10[%c0_24, %c0_25] : memref<16x32xbf16, #tpu.memory_space<vmem>>, vector<16x32xbf16>
      tpu.vector_store %arg10[%c0_24, %c0_25], %41 {strides = array<i32>} : memref<16x32xbf16, #tpu.memory_space<vmem>>, vector<16x32xbf16>,
    } else {
    }
    %c0 = arith.constant 0 : index
    %c0_2 = arith.constant 0 : index
    %5 = vector.load %arg10[%c0, %c0_2] : memref<16x32xbf16, #tpu.memory_space<vmem>>, vector<16x32xbf16>
    %c0_i32_3 = arith.constant 0 : i32
    %6 = arith.cmpi eq, %arg2, %c0_i32_3 : i32
    %7 = arith.extui %6 : i1 to i32
    %c0_i32_4 = arith.constant 0 : i32
    %8 = arith.cmpi ne, %7, %c0_i32_4 : i32
    scf.if %8 {
      %cst_13 = arith.constant 0.000000e+00 : f32
      %17 = vector.broadcast %cst_13 : f32 to vector<16x32xf32>
      %c0_14 = arith.constant 0 : index
      %c0_15 = arith.constant 0 : index
      %18 = vector.load %arg9[%c0_14, %c0_15] : memref<16x32xf32, #tpu.memory_space<vmem>>, vector<16x32xf32>
      tpu.vector_store %arg9[%c0_14, %c0_15], %17 {strides = array<i32>} : memref<16x32xf32, #tpu.memory_space<vmem>>, vector<16x32xf32>,
    } else {
    }
    %c0_5 = arith.constant 0 : index
    %c0_6 = arith.constant 0 : index
    %9 = vector.load %arg9[%c0_5, %c0_6] : memref<16x32xf32, #tpu.memory_space<vmem>>, vector<16x32xf32>
    %c0_7 = arith.constant 0 : index
    %c0_8 = arith.constant 0 : index
    %10 = vector.load %arg6[%c0_7, %c0_8] : memref<32x32xbf16, #tpu.memory_space<vmem>>, vector<32x32xbf16>
    %cst = arith.constant dense<0.000000e+00> : vector<16x32xf32>
    %11 = tpu.matmul %5, %10, %cst {dimension_numbers = #tpu.dot_dimension_numbers<[1], [0], [0], [1], [0, 0, 1, 1], [], []>} : vector<16x32xbf16>, vector<32x32xbf16>, vector<16x32xf32> -> vector<16x32xf32>
    %12 = arith.addf %9, %11 : vector<16x32xf32>
    %c0_9 = arith.constant 0 : index
    %c0_10 = arith.constant 0 : index
    %13 = vector.load %arg9[%c0_9, %c0_10] : memref<16x32xf32, #tpu.memory_space<vmem>>, vector<16x32xf32>
    tpu.vector_store %arg9[%c0_9, %c0_10], %12 {strides = array<i32>} : memref<16x32xf32, #tpu.memory_space<vmem>>, vector<16x32xf32>,
    %c0_i32_11 = arith.constant 0 : i32
    %14 = arith.cmpi eq, %arg2, %c0_i32_11 : i32
    %15 = arith.extui %14 : i1 to i32
    %c0_i32_12 = arith.constant 0 : i32
    %16 = arith.cmpi ne, %15, %c0_i32_12 : i32
    scf.if %16 {
      %c0_13 = arith.constant 0 : index
      %c0_14 = arith.constant 0 : index
      %17 = vector.load %arg9[%c0_13, %c0_14] : memref<16x32xf32, #tpu.memory_space<vmem>>, vector<16x32xf32>
      %c0_15 = arith.constant 0 : index
      %c0_16 = arith.constant 0 : index
      %18 = vector.load %arg7[%c0_15, %c0_16] : memref<1x32xf32, #tpu.memory_space<vmem>>, vector<1x32xf32>
      %19 = vector.broadcast %18 : vector<1x32xf32> to vector<16x32xf32>
      %20 = arith.addf %17, %19 : vector<16x32xf32>
      %21 = arith.truncf %20 : vector<16x32xf32> to vector<16x32xbf16>
      %c0_17 = arith.constant 0 : index
      %c0_18 = arith.constant 0 : index
      %22 = vector.load %arg8[%c0_17, %c0_18] : memref<16x32xbf16, #tpu.memory_space<vmem>>, vector<16x32xbf16>
      tpu.vector_store %arg8[%c0_17, %c0_18], %21 {strides = array<i32>} : memref<16x32xbf16, #tpu.memory_space<vmem>>, vector<16x32xbf16>,
    } else {
    }
    return
  }
  func.func @transform_0(%arg0: i32, %arg1: i32, %arg2: i32) -> (i32, i32) {
    %c0_i32 = arith.constant 0 : i32
    return %arg0, %arg2 : i32, i32
  }
  func.func @transform_1(%arg0: i32, %arg1: i32, %arg2: i32) -> (i32, i32) {
    %c0_i32 = arith.constant 0 : i32
    %c0_i32_0 = arith.constant 0 : i32
    %c0_i32_1 = arith.constant 0 : i32
    return %c0_i32, %c0_i32_0 : i32, i32
  }
  func.func @transform_2(%arg0: i32, %arg1: i32, %arg2: i32) -> (i32, i32) {
    %c0_i32 = arith.constant 0 : i32
    %c0_i32_0 = arith.constant 0 : i32
    %c0_i32_1 = arith.constant 0 : i32
    return %c0_i32, %c0_i32_0 : i32, i32
  }
  func.func @transform_3(%arg0: i32, %arg1: i32, %arg2: i32) -> (i32, i32) {
    %c0_i32 = arith.constant 0 : i32
    return %arg2, %arg1 : i32, i32
  }
  func.func @transform_4(%arg0: i32, %arg1: i32, %arg2: i32) -> (i32, i32) {
    %c0_i32 = arith.constant 0 : i32
    %c0_i32_0 = arith.constant 0 : i32
    return %c0_i32, %arg1 : i32, i32
  }
  func.func @transform_5(%arg0: i32, %arg1: i32, %arg2: i32) -> (i32, i32) {
    %c0_i32 = arith.constant 0 : i32
    return %arg0, %arg1 : i32, i32
  }
}

module attributes {stable_mosaic.version = 11 : i64} {
  func.func @_fused_mm_kernel(%arg0: i32, %arg1: i32, %arg2: i32, %arg3: memref<32x24xbf16, #tpu.memory_space<vmem>>, %arg4: memref<24x32xbf16, #tpu.memory_space<vmem>>, %arg5: memref<1x32xf32, #tpu.memory_space<vmem>>, %arg6: memref<32x32xbf16, #tpu.memory_space<vmem>>, %arg7: memref<32x32xf32, #tpu.memory_space<vmem>>) attributes {dimension_semantics = [#tpu.dimension_semantics<parallel>, #tpu.dimension_semantics<parallel>, #tpu.dimension_semantics<arbitrary>], iteration_bounds = array<i64: 1, 1, 1>, scalar_prefetch = 0 : i64, scratch_operands = 1 : i64, tpu.core_type = #tpu.core_type<tc>, window_params = [{transform_indices = @transform_0, window_bounds = array<i64: 32, 24>}, {transform_indices = @transform_1, window_bounds = array<i64: 24, 32>}, {transform_indices = @transform_2, window_bounds = array<i64: 1, 32>}, {transform_indices = @transform_3, window_bounds = array<i64: 32, 32>}]} {
    %c0 = arith.constant 0 : index
    %c0_0 = arith.constant 0 : index
    %0 = vector.load %arg3[%c0, %c0_0] : memref<32x24xbf16, #tpu.memory_space<vmem>>, vector<32x24xbf16>
    %c0_i32 = arith.constant 0 : i32
    %1 = arith.cmpi eq, %arg2, %c0_i32 : i32
    %2 = arith.extui %1 : i1 to i32
    %c0_i32_1 = arith.constant 0 : i32
    %3 = arith.cmpi ne, %2, %c0_i32_1 : i32
    scf.if %3 {
      %cst_10 = arith.constant 0.000000e+00 : f32
      %12 = vector.broadcast %cst_10 : f32 to vector<32x32xf32>
      %c0_11 = arith.constant 0 : index
      %c0_12 = arith.constant 0 : index
      %13 = vector.load %arg7[%c0_11, %c0_12] : memref<32x32xf32, #tpu.memory_space<vmem>>, vector<32x32xf32>
      tpu.vector_store %arg7[%c0_11, %c0_12], %12 {strides = array<i32>} : memref<32x32xf32, #tpu.memory_space<vmem>>, vector<32x32xf32>,
    } else {
    }
    %c0_2 = arith.constant 0 : index
    %c0_3 = arith.constant 0 : index
    %4 = vector.load %arg7[%c0_2, %c0_3] : memref<32x32xf32, #tpu.memory_space<vmem>>, vector<32x32xf32>
    %c0_4 = arith.constant 0 : index
    %c0_5 = arith.constant 0 : index
    %5 = vector.load %arg4[%c0_4, %c0_5] : memref<24x32xbf16, #tpu.memory_space<vmem>>, vector<24x32xbf16>
    %cst = arith.constant dense<0.000000e+00> : vector<32x32xf32>
    %6 = tpu.matmul %0, %5, %cst {dimension_numbers = #tpu.dot_dimension_numbers<[1], [0], [0], [1], [0, 0, 1, 1], [], []>} : vector<32x24xbf16>, vector<24x32xbf16>, vector<32x32xf32> -> vector<32x32xf32>
    %7 = arith.addf %4, %6 : vector<32x32xf32>
    %c0_6 = arith.constant 0 : index
    %c0_7 = arith.constant 0 : index
    %8 = vector.load %arg7[%c0_6, %c0_7] : memref<32x32xf32, #tpu.memory_space<vmem>>, vector<32x32xf32>
    tpu.vector_store %arg7[%c0_6, %c0_7], %7 {strides = array<i32>} : memref<32x32xf32, #tpu.memory_space<vmem>>, vector<32x32xf32>,
    %c0_i32_8 = arith.constant 0 : i32
    %9 = arith.cmpi eq, %arg2, %c0_i32_8 : i32
    %10 = arith.extui %9 : i1 to i32
    %c0_i32_9 = arith.constant 0 : i32
    %11 = arith.cmpi ne, %10, %c0_i32_9 : i32
    scf.if %11 {
      %c0_10 = arith.constant 0 : index
      %c0_11 = arith.constant 0 : index
      %12 = vector.load %arg7[%c0_10, %c0_11] : memref<32x32xf32, #tpu.memory_space<vmem>>, vector<32x32xf32>
      %c0_12 = arith.constant 0 : index
      %c0_13 = arith.constant 0 : index
      %13 = vector.load %arg5[%c0_12, %c0_13] : memref<1x32xf32, #tpu.memory_space<vmem>>, vector<1x32xf32>
      %14 = vector.broadcast %13 : vector<1x32xf32> to vector<32x32xf32>
      %15 = arith.addf %12, %14 : vector<32x32xf32>
      %cst_14 = arith.constant 5.000000e-01 : f32
      %16 = vector.broadcast %cst_14 : f32 to vector<32x32xf32>
      %17 = arith.mulf %16, %15 : vector<32x32xf32>
      %cst_15 = arith.constant 4.471500e-02 : f32
      %18 = vector.broadcast %cst_15 : f32 to vector<32x32xf32>
      %19 = arith.mulf %18, %15 : vector<32x32xf32>
      %20 = arith.mulf %19, %15 : vector<32x32xf32>
      %21 = arith.mulf %20, %15 : vector<32x32xf32>
      %22 = arith.addf %15, %21 : vector<32x32xf32>
      %cst_16 = arith.constant 0.797884583 : f32
      %23 = vector.broadcast %cst_16 : f32 to vector<32x32xf32>
      %24 = arith.mulf %23, %22 : vector<32x32xf32>
      %25 = math.tanh %24 : vector<32x32xf32>
      %cst_17 = arith.constant 1.000000e+00 : f32
      %26 = vector.broadcast %cst_17 : f32 to vector<32x32xf32>
      %27 = arith.addf %26, %25 : vector<32x32xf32>
      %28 = arith.mulf %17, %27 : vector<32x32xf32>
      %29 = arith.truncf %28 : vector<32x32xf32> to vector<32x32xbf16>
      %c0_18 = arith.constant 0 : index
      %c0_19 = arith.constant 0 : index
      %30 = vector.load %arg6[%c0_18, %c0_19] : memref<32x32xbf16, #tpu.memory_space<vmem>>, vector<32x32xbf16>
      tpu.vector_store %arg6[%c0_18, %c0_19], %29 {strides = array<i32>} : memref<32x32xbf16, #tpu.memory_space<vmem>>, vector<32x32xbf16>,
    } else {
    }
    return
  }
  func.func @transform_0(%arg0: i32, %arg1: i32, %arg2: i32) -> (i32, i32) {
    %c0_i32 = arith.constant 0 : i32
    return %arg0, %arg2 : i32, i32
  }
  func.func @transform_1(%arg0: i32, %arg1: i32, %arg2: i32) -> (i32, i32) {
    %c0_i32 = arith.constant 0 : i32
    return %arg2, %arg1 : i32, i32
  }
  func.func @transform_2(%arg0: i32, %arg1: i32, %arg2: i32) -> (i32, i32) {
    %c0_i32 = arith.constant 0 : i32
    %c0_i32_0 = arith.constant 0 : i32
    return %c0_i32, %arg1 : i32, i32
  }
  func.func @transform_3(%arg0: i32, %arg1: i32, %arg2: i32) -> (i32, i32) {
    %c0_i32 = arith.constant 0 : i32
    return %arg0, %arg1 : i32, i32
  }
}

module attributes {stable_mosaic.version = 11 : i64} {
  func.func @_fused_mm_kernel(%arg0: i32, %arg1: i32, %arg2: i32, %arg3: memref<16x96xbf16, #tpu.memory_space<vmem>>, %arg4: memref<96x32xbf16, #tpu.memory_space<vmem>>, %arg5: memref<1x32xf32, #tpu.memory_space<vmem>>, %arg6: memref<16x32xbf16, #tpu.memory_space<vmem>>, %arg7: memref<16x32xf32, #tpu.memory_space<vmem>>) attributes {dimension_semantics = [#tpu.dimension_semantics<parallel>, #tpu.dimension_semantics<parallel>, #tpu.dimension_semantics<arbitrary>], iteration_bounds = array<i64: 1, 1, 1>, scalar_prefetch = 0 : i64, scratch_operands = 1 : i64, tpu.core_type = #tpu.core_type<tc>, window_params = [{transform_indices = @transform_0, window_bounds = array<i64: 16, 96>}, {transform_indices = @transform_1, window_bounds = array<i64: 96, 32>}, {transform_indices = @transform_2, window_bounds = array<i64: 1, 32>}, {transform_indices = @transform_3, window_bounds = array<i64: 16, 32>}]} {
    %c0 = arith.constant 0 : index
    %c0_0 = arith.constant 0 : index
    %0 = vector.load %arg3[%c0, %c0_0] : memref<16x96xbf16, #tpu.memory_space<vmem>>, vector<16x96xbf16>
    %c0_i32 = arith.constant 0 : i32
    %1 = arith.cmpi eq, %arg2, %c0_i32 : i32
    %2 = arith.extui %1 : i1 to i32
    %c0_i32_1 = arith.constant 0 : i32
    %3 = arith.cmpi ne, %2, %c0_i32_1 : i32
    scf.if %3 {
      %cst_10 = arith.constant 0.000000e+00 : f32
      %12 = vector.broadcast %cst_10 : f32 to vector<16x32xf32>
      %c0_11 = arith.constant 0 : index
      %c0_12 = arith.constant 0 : index
      %13 = vector.load %arg7[%c0_11, %c0_12] : memref<16x32xf32, #tpu.memory_space<vmem>>, vector<16x32xf32>
      tpu.vector_store %arg7[%c0_11, %c0_12], %12 {strides = array<i32>} : memref<16x32xf32, #tpu.memory_space<vmem>>, vector<16x32xf32>,
    } else {
    }
    %c0_2 = arith.constant 0 : index
    %c0_3 = arith.constant 0 : index
    %4 = vector.load %arg7[%c0_2, %c0_3] : memref<16x32xf32, #tpu.memory_space<vmem>>, vector<16x32xf32>
    %c0_4 = arith.constant 0 : index
    %c0_5 = arith.constant 0 : index
    %5 = vector.load %arg4[%c0_4, %c0_5] : memref<96x32xbf16, #tpu.memory_space<vmem>>, vector<96x32xbf16>
    %cst = arith.constant dense<0.000000e+00> : vector<16x32xf32>
    %6 = tpu.matmul %0, %5, %cst {dimension_numbers = #tpu.dot_dimension_numbers<[1], [0], [0], [1], [0, 0, 1, 1], [], []>} : vector<16x96xbf16>, vector<96x32xbf16>, vector<16x32xf32> -> vector<16x32xf32>
    %7 = arith.addf %4, %6 : vector<16x32xf32>
    %c0_6 = arith.constant 0 : index
    %c0_7 = arith.constant 0 : index
    %8 = vector.load %arg7[%c0_6, %c0_7] : memref<16x32xf32, #tpu.memory_space<vmem>>, vector<16x32xf32>
    tpu.vector_store %arg7[%c0_6, %c0_7], %7 {strides = array<i32>} : memref<16x32xf32, #tpu.memory_space<vmem>>, vector<16x32xf32>,
    %c0_i32_8 = arith.constant 0 : i32
    %9 = arith.cmpi eq, %arg2, %c0_i32_8 : i32
    %10 = arith.extui %9 : i1 to i32
    %c0_i32_9 = arith.constant 0 : i32
    %11 = arith.cmpi ne, %10, %c0_i32_9 : i32
    scf.if %11 {
      %c0_10 = arith.constant 0 : index
      %c0_11 = arith.constant 0 : index
      %12 = vector.load %arg7[%c0_10, %c0_11] : memref<16x32xf32, #tpu.memory_space<vmem>>, vector<16x32xf32>
      %c0_12 = arith.constant 0 : index
      %c0_13 = arith.constant 0 : index
      %13 = vector.load %arg5[%c0_12, %c0_13] : memref<1x32xf32, #tpu.memory_space<vmem>>, vector<1x32xf32>
      %14 = vector.broadcast %13 : vector<1x32xf32> to vector<16x32xf32>
      %15 = arith.addf %12, %14 : vector<16x32xf32>
      %cst_14 = arith.constant 5.000000e-01 : f32
      %16 = vector.broadcast %cst_14 : f32 to vector<16x32xf32>
      %17 = arith.mulf %16, %15 : vector<16x32xf32>
      %cst_15 = arith.constant 4.471500e-02 : f32
      %18 = vector.broadcast %cst_15 : f32 to vector<16x32xf32>
      %19 = arith.mulf %18, %15 : vector<16x32xf32>
      %20 = arith.mulf %19, %15 : vector<16x32xf32>
      %21 = arith.mulf %20, %15 : vector<16x32xf32>
      %22 = arith.addf %15, %21 : vector<16x32xf32>
      %cst_16 = arith.constant 0.797884583 : f32
      %23 = vector.broadcast %cst_16 : f32 to vector<16x32xf32>
      %24 = arith.mulf %23, %22 : vector<16x32xf32>
      %25 = math.tanh %24 : vector<16x32xf32>
      %cst_17 = arith.constant 1.000000e+00 : f32
      %26 = vector.broadcast %cst_17 : f32 to vector<16x32xf32>
      %27 = arith.addf %26, %25 : vector<16x32xf32>
      %28 = arith.mulf %17, %27 : vector<16x32xf32>
      %29 = arith.truncf %28 : vector<16x32xf32> to vector<16x32xbf16>
      %c0_18 = arith.constant 0 : index
      %c0_19 = arith.constant 0 : index
      %30 = vector.load %arg6[%c0_18, %c0_19] : memref<16x32xbf16, #tpu.memory_space<vmem>>, vector<16x32xbf16>
      tpu.vector_store %arg6[%c0_18, %c0_19], %29 {strides = array<i32>} : memref<16x32xbf16, #tpu.memory_space<vmem>>, vector<16x32xbf16>,
    } else {
    }
    return
  }
  func.func @transform_0(%arg0: i32, %arg1: i32, %arg2: i32) -> (i32, i32) {
    %c0_i32 = arith.constant 0 : i32
    return %arg0, %arg2 : i32, i32
  }
  func.func @transform_1(%arg0: i32, %arg1: i32, %arg2: i32) -> (i32, i32) {
    %c0_i32 = arith.constant 0 : i32
    return %arg2, %arg1 : i32, i32
  }
  func.func @transform_2(%arg0: i32, %arg1: i32, %arg2: i32) -> (i32, i32) {
    %c0_i32 = arith.constant 0 : i32
    %c0_i32_0 = arith.constant 0 : i32
    return %c0_i32, %arg1 : i32, i32
  }
  func.func @transform_3(%arg0: i32, %arg1: i32, %arg2: i32) -> (i32, i32) {
    %c0_i32 = arith.constant 0 : i32
    return %arg0, %arg1 : i32, i32
  }
}

module attributes {stable_mosaic.version = 11 : i64} {
  func.func @_fused_mm_kernel(%arg0: i32, %arg1: i32, %arg2: i32, %arg3: memref<16x32xbf16, #tpu.memory_space<vmem>>, %arg4: memref<1x32xf32, #tpu.memory_space<vmem>>, %arg5: memref<1x32xf32, #tpu.memory_space<vmem>>, %arg6: memref<32x64xbf16, #tpu.memory_space<vmem>>, %arg7: memref<1x64xf32, #tpu.memory_space<vmem>>, %arg8: memref<16x64xbf16, #tpu.memory_space<vmem>>, %arg9: memref<16x64xf32, #tpu.memory_space<vmem>>, %arg10: memref<16x32xbf16, #tpu.memory_space<vmem>>) attributes {dimension_semantics = [#tpu.dimension_semantics<parallel>, #tpu.dimension_semantics<arbitrary>, #tpu.dimension_semantics<arbitrary>], iteration_bounds = array<i64: 1, 1, 1>, scalar_prefetch = 0 : i64, scratch_operands = 2 : i64, tpu.core_type = #tpu.core_type<tc>, window_params = [{transform_indices = @transform_0, window_bounds = array<i64: 16, 32>}, {pipeline_mode = #tpu.pipeline_mode<synchronous>, transform_indices = @transform_1, window_bounds = array<i64: 1, 32>}, {pipeline_mode = #tpu.pipeline_mode<synchronous>, transform_indices = @transform_2, window_bounds = array<i64: 1, 32>}, {transform_indices = @transform_3, window_bounds = array<i64: 32, 64>}, {transform_indices = @transform_4, window_bounds = array<i64: 1, 64>}, {transform_indices = @transform_5, window_bounds = array<i64: 16, 64>}]} {
    %c0_i32 = arith.constant 0 : i32
    %0 = arith.cmpi eq, %arg1, %c0_i32 : i32
    %c0_i32_0 = arith.constant 0 : i32
    %1 = arith.cmpi eq, %arg2, %c0_i32_0 : i32
    %2 = arith.andi %0, %1 : i1
    %3 = arith.extui %2 : i1 to i32
    %c0_i32_1 = arith.constant 0 : i32
    %4 = arith.cmpi ne, %3, %c0_i32_1 : i32
    scf.if %4 {
      %c0_13 = arith.constant 0 : index
      %c0_14 = arith.constant 0 : index
      %17 = vector.load %arg3[%c0_13, %c0_14] : memref<16x32xbf16, #tpu.memory_space<vmem>>, vector<16x32xbf16>
      %18 = arith.extf %17 : vector<16x32xbf16> to vector<16x32xf32>
      %cst_15 = arith.constant dense<0.000000e+00> : vector<16xf32>
      %19 = vector.multi_reduction <add>, %18, %cst_15 [1] : vector<16x32xf32> to vector<16xf32>
      %20 = vector.shape_cast %19 : vector<16xf32> to vector<16x1xf32>
      %cst_16 = arith.constant 3.200000e+01 : f32
      %21 = vector.broadcast %cst_16 : f32 to vector<16x1xf32>
      %22 = arith.divf %20, %21 : vector<16x1xf32>
      %23 = vector.broadcast %22 : vector<16x1xf32> to vector<16x32xf32>
      %24 = arith.subf %18, %23 : vector<16x32xf32>
      %25 = arith.mulf %24, %24 : vector<16x32xf32>
      %cst_17 = arith.constant dense<0.000000e+00> : vector<16xf32>
      %26 = vector.multi_reduction <add>, %25, %cst_17 [1] : vector<16x32xf32> to vector<16xf32>
      %27 = vector.shape_cast %26 : vector<16xf32> to vector<16x1xf32>
      %cst_18 = arith.constant 3.200000e+01 : f32
      %28 = vector.broadcast %cst_18 : f32 to vector<16x1xf32>
      %29 = arith.divf %27, %28 : vector<16x1xf32>
      %cst_19 = arith.constant 9.99999974E-6 : f32
      %30 = vector.broadcast %cst_19 : f32 to vector<16x1xf32>
      %31 = arith.addf %29, %30 : vector<16x1xf32>
      %32 = math.rsqrt %31 : vector<16x1xf32>
      %33 = vector.broadcast %32 : vector<16x1xf32> to vector<16x32xf32>
      %34 = arith.mulf %24, %33 : vector<16x32xf32>
      %c0_20 = arith.constant 0 : index
      %c0_21 = arith.constant 0 : index
      %35 = vector.load %arg4[%c0_20, %c0_21] : memref<1x32xf32, #tpu.memory_space<vmem>>, vector<1x32xf32>
      %36 = vector.broadcast %35 : vector<1x32xf32> to vector<16x32xf32>
      %37 = arith.mulf %34, %36 : vector<16x32xf32>
      %c0_22 = arith.constant 0 : index
      %c0_23 = arith.constant 0 : index
      %38 = vector.load %arg5[%c0_22, %c0_23] : memref<1x32xf32, #tpu.memory_space<vmem>>, vector<1x32xf32>
      %39 = vector.broadcast %38 : vector<1x32xf32> to vector<16x32xf32>
      %40 = arith.addf %37, %39 : vector<16x32xf32>
      %41 = arith.truncf %40 : vector<16x32xf32> to vector<16x32xbf16>
      %c0_24 = arith.constant 0 : index
      %c0_25 = arith.constant 0 : index
      %42 = vector.load %arg10[%c0_24, %c0_25] : memref<16x32xbf16, #tpu.memory_space<vmem>>, vector<16x32xbf16>
      tpu.vector_store %arg10[%c0_24, %c0_25], %41 {strides = array<i32>} : memref<16x32xbf16, #tpu.memory_space<vmem>>, vector<16x32xbf16>,
    } else {
    }
    %c0 = arith.constant 0 : index
    %c0_2 = arith.constant 0 : index
    %5 = vector.load %arg10[%c0, %c0_2] : memref<16x32xbf16, #tpu.memory_space<vmem>>, vector<16x32xbf16>
    %c0_i32_3 = arith.constant 0 : i32
    %6 = arith.cmpi eq, %arg2, %c0_i32_3 : i32
    %7 = arith.extui %6 : i1 to i32
    %c0_i32_4 = arith.constant 0 : i32
    %8 = arith.cmpi ne, %7, %c0_i32_4 : i32
    scf.if %8 {
      %cst_13 = arith.constant 0.000000e+00 : f32
      %17 = vector.broadcast %cst_13 : f32 to vector<16x64xf32>
      %c0_14 = arith.constant 0 : index
      %c0_15 = arith.constant 0 : index
      %18 = vector.load %arg9[%c0_14, %c0_15] : memref<16x64xf32, #tpu.memory_space<vmem>>, vector<16x64xf32>
      tpu.vector_store %arg9[%c0_14, %c0_15], %17 {strides = array<i32>} : memref<16x64xf32, #tpu.memory_space<vmem>>, vector<16x64xf32>,
    } else {
    }
    %c0_5 = arith.constant 0 : index
    %c0_6 = arith.constant 0 : index
    %9 = vector.load %arg9[%c0_5, %c0_6] : memref<16x64xf32, #tpu.memory_space<vmem>>, vector<16x64xf32>
    %c0_7 = arith.constant 0 : index
    %c0_8 = arith.constant 0 : index
    %10 = vector.load %arg6[%c0_7, %c0_8] : memref<32x64xbf16, #tpu.memory_space<vmem>>, vector<32x64xbf16>
    %cst = arith.constant dense<0.000000e+00> : vector<16x64xf32>
    %11 = tpu.matmul %5, %10, %cst {dimension_numbers = #tpu.dot_dimension_numbers<[1], [0], [0], [1], [0, 0, 1, 1], [], []>} : vector<16x32xbf16>, vector<32x64xbf16>, vector<16x64xf32> -> vector<16x64xf32>
    %12 = arith.addf %9, %11 : vector<16x64xf32>
    %c0_9 = arith.constant 0 : index
    %c0_10 = arith.constant 0 : index
    %13 = vector.load %arg9[%c0_9, %c0_10] : memref<16x64xf32, #tpu.memory_space<vmem>>, vector<16x64xf32>
    tpu.vector_store %arg9[%c0_9, %c0_10], %12 {strides = array<i32>} : memref<16x64xf32, #tpu.memory_space<vmem>>, vector<16x64xf32>,
    %c0_i32_11 = arith.constant 0 : i32
    %14 = arith.cmpi eq, %arg2, %c0_i32_11 : i32
    %15 = arith.extui %14 : i1 to i32
    %c0_i32_12 = arith.constant 0 : i32
    %16 = arith.cmpi ne, %15, %c0_i32_12 : i32
    scf.if %16 {
      %c0_13 = arith.constant 0 : index
      %c0_14 = arith.constant 0 : index
      %17 = vector.load %arg9[%c0_13, %c0_14] : memref<16x64xf32, #tpu.memory_space<vmem>>, vector<16x64xf32>
      %c0_15 = arith.constant 0 : index
      %c0_16 = arith.constant 0 : index
      %18 = vector.load %arg7[%c0_15, %c0_16] : memref<1x64xf32, #tpu.memory_space<vmem>>, vector<1x64xf32>
      %19 = vector.broadcast %18 : vector<1x64xf32> to vector<16x64xf32>
      %20 = arith.addf %17, %19 : vector<16x64xf32>
      %cst_17 = arith.constant 5.000000e-01 : f32
      %21 = vector.broadcast %cst_17 : f32 to vector<16x64xf32>
      %22 = arith.mulf %21, %20 : vector<16x64xf32>
      %cst_18 = arith.constant 4.471500e-02 : f32
      %23 = vector.broadcast %cst_18 : f32 to vector<16x64xf32>
      %24 = arith.mulf %23, %20 : vector<16x64xf32>
      %25 = arith.mulf %24, %20 : vector<16x64xf32>
      %26 = arith.mulf %25, %20 : vector<16x64xf32>
      %27 = arith.addf %20, %26 : vector<16x64xf32>
      %cst_19 = arith.constant 0.797884583 : f32
      %28 = vector.broadcast %cst_19 : f32 to vector<16x64xf32>
      %29 = arith.mulf %28, %27 : vector<16x64xf32>
      %30 = math.tanh %29 : vector<16x64xf32>
      %cst_20 = arith.constant 1.000000e+00 : f32
      %31 = vector.broadcast %cst_20 : f32 to vector<16x64xf32>
      %32 = arith.addf %31, %30 : vector<16x64xf32>
      %33 = arith.mulf %22, %32 : vector<16x64xf32>
      %34 = arith.truncf %33 : vector<16x64xf32> to vector<16x64xbf16>
      %c0_21 = arith.constant 0 : index
      %c0_22 = arith.constant 0 : index
      %35 = vector.load %arg8[%c0_21, %c0_22] : memref<16x64xbf16, #tpu.memory_space<vmem>>, vector<16x64xbf16>
      tpu.vector_store %arg8[%c0_21, %c0_22], %34 {strides = array<i32>} : memref<16x64xbf16, #tpu.memory_space<vmem>>, vector<16x64xbf16>,
    } else {
    }
    return
  }
  func.func @transform_0(%arg0: i32, %arg1: i32, %arg2: i32) -> (i32, i32) {
    %c0_i32 = arith.constant 0 : i32
    return %arg0, %arg2 : i32, i32
  }
  func.func @transform_1(%arg0: i32, %arg1: i32, %arg2: i32) -> (i32, i32) {
    %c0_i32 = arith.constant 0 : i32
    %c0_i32_0 = arith.constant 0 : i32
    %c0_i32_1 = arith.constant 0 : i32
    return %c0_i32, %c0_i32_0 : i32, i32
  }
  func.func @transform_2(%arg0: i32, %arg1: i32, %arg2: i32) -> (i32, i32) {
    %c0_i32 = arith.constant 0 : i32
    %c0_i32_0 = arith.constant 0 : i32
    %c0_i32_1 = arith.constant 0 : i32
    return %c0_i32, %c0_i32_0 : i32, i32
  }
  func.func @transform_3(%arg0: i32, %arg1: i32, %arg2: i32) -> (i32, i32) {
    %c0_i32 = arith.constant 0 : i32
    return %arg2, %arg1 : i32, i32
  }
  func.func @transform_4(%arg0: i32, %arg1: i32, %arg2: i32) -> (i32, i32) {
    %c0_i32 = arith.constant 0 : i32
    %c0_i32_0 = arith.constant 0 : i32
    return %c0_i32, %arg1 : i32, i32
  }
  func.func @transform_5(%arg0: i32, %arg1: i32, %arg2: i32) -> (i32, i32) {
    %c0_i32 = arith.constant 0 : i32
    return %arg0, %arg1 : i32, i32
  }
}

module attributes {stable_mosaic.version = 11 : i64} {
  func.func @_flash_attn_kernel(%arg0: i32, %arg1: i32, %arg2: memref<8x8x8xbf16, #tpu.memory_space<vmem>>, %arg3: memref<8x8x8xbf16, #tpu.memory_space<vmem>>, %arg4: memref<8x8x8xbf16, #tpu.memory_space<vmem>>, %arg5: memref<8x8x8xbf16, #tpu.memory_space<vmem>>, %arg6: memref<8x8x1xf32, #tpu.memory_space<vmem>>, %arg7: memref<8x8x1xf32, #tpu.memory_space<vmem>>, %arg8: memref<8x8x8xf32, #tpu.memory_space<vmem>>) attributes {dimension_semantics = [#tpu.dimension_semantics<parallel>, #tpu.dimension_semantics<arbitrary>], iteration_bounds = array<i64: 1, 1>, scalar_prefetch = 0 : i64, scratch_operands = 3 : i64, tpu.core_type = #tpu.core_type<tc>, window_params = [{transform_indices = @transform_0, window_bounds = array<i64: 8, 8, 8>}, {transform_indices = @transform_1, window_bounds = array<i64: 8, 8, 8>}, {transform_indices = @transform_2, window_bounds = array<i64: 8, 8, 8>}, {transform_indices = @transform_3, window_bounds = array<i64: 8, 8, 8>}]} {
    %c0_i32 = arith.constant 0 : i32
    %0 = arith.cmpi eq, %arg1, %c0_i32 : i32
    %1 = arith.extui %0 : i1 to i32
    %c0_i32_0 = arith.constant 0 : i32
    %2 = arith.cmpi ne, %1, %c0_i32_0 : i32
    scf.if %2 {
      %cst_34 = arith.constant 0xFF800000 : f32
      %44 = vector.broadcast %cst_34 : f32 to vector<8x8x1xf32>
      %c0_35 = arith.constant 0 : index
      %c0_36 = arith.constant 0 : index
      %c0_37 = arith.constant 0 : index
      %45 = vector.load %arg6[%c0_35, %c0_36, %c0_37] : memref<8x8x1xf32, #tpu.memory_space<vmem>>, vector<8x8x1xf32>
      tpu.vector_store %arg6[%c0_35, %c0_36, %c0_37], %44 {strides = array<i32>} : memref<8x8x1xf32, #tpu.memory_space<vmem>>, vector<8x8x1xf32>,
      %cst_38 = arith.constant 0.000000e+00 : f32
      %46 = vector.broadcast %cst_38 : f32 to vector<8x8x1xf32>
      %c0_39 = arith.constant 0 : index
      %c0_40 = arith.constant 0 : index
      %c0_41 = arith.constant 0 : index
      %47 = vector.load %arg7[%c0_39, %c0_40, %c0_41] : memref<8x8x1xf32, #tpu.memory_space<vmem>>, vector<8x8x1xf32>
      tpu.vector_store %arg7[%c0_39, %c0_40, %c0_41], %46 {strides = array<i32>} : memref<8x8x1xf32, #tpu.memory_space<vmem>>, vector<8x8x1xf32>,
      %cst_42 = arith.constant 0.000000e+00 : f32
      %48 = vector.broadcast %cst_42 : f32 to vector<8x8x8xf32>
      %c0_43 = arith.constant 0 : index
      %c0_44 = arith.constant 0 : index
      %c0_45 = arith.constant 0 : index
      %49 = vector.load %arg8[%c0_43, %c0_44, %c0_45] : memref<8x8x8xf32, #tpu.memory_space<vmem>>, vector<8x8x8xf32>
      tpu.vector_store %arg8[%c0_43, %c0_44, %c0_45], %48 {strides = array<i32>} : memref<8x8x8xf32, #tpu.memory_space<vmem>>, vector<8x8x8xf32>,
    } else {
    }
    %c0 = arith.constant 0 : index
    %c0_1 = arith.constant 0 : index
    %c0_2 = arith.constant 0 : index
    %3 = vector.load %arg2[%c0, %c0_1, %c0_2] : memref<8x8x8xbf16, #tpu.memory_space<vmem>>, vector<8x8x8xbf16>
    %c0_3 = arith.constant 0 : index
    %c0_4 = arith.constant 0 : index
    %c0_5 = arith.constant 0 : index
    %4 = vector.load %arg3[%c0_3, %c0_4, %c0_5] : memref<8x8x8xbf16, #tpu.memory_space<vmem>>, vector<8x8x8xbf16>
    "tpu.trace_start"() <{level = 10 : i32, message = "bqd,bkd->bqk"}> : () -> ()
    %cst = arith.constant dense<0.000000e+00> : vector<8x8x8xf32>
    %5 = tpu.matmul %3, %4, %cst {dimension_numbers = #tpu.dot_dimension_numbers<[2], [2], [1], [1], [0, 0, 0, 1, 1, 1], [0], [0]>} : vector<8x8x8xbf16>, vector<8x8x8xbf16>, vector<8x8x8xf32> -> vector<8x8x8xf32>
    "tpu.trace_stop"() : () -> ()
    %c8_i32 = arith.constant 8 : i32
    %6 = arith.muli %arg1, %c8_i32 : i32
    %7 = tpu.iota {dimensions = array<i32: 1>} : vector<8x8xi32>
    %8 = vector.broadcast %6 : i32 to vector<8x8xi32>
    %9 = arith.addi %8, %7 : vector<8x8xi32>
    %c8_i32_6 = arith.constant 8 : i32
    %10 = vector.broadcast %c8_i32_6 : i32 to vector<8x8xi32>
    %11 = arith.cmpi slt, %9, %10 : vector<8x8xi32>
    %12 = vector.shape_cast %11 : vector<8x8xi1> to vector<1x8x8xi1>
    %cst_7 = arith.constant -1.000000e+30 : f32
    %13 = vector.shape_cast %12 : vector<1x8x8xi1> to vector<1x8x8xi1>
    %14 = vector.broadcast %13 : vector<1x8x8xi1> to vector<8x8x8xi1>
    %15 = vector.broadcast %cst_7 : f32 to vector<8x8x8xf32>
    %16 = arith.select %14, %5, %15 : vector<8x8x8xi1>, vector<8x8x8xf32>
    %c0_8 = arith.constant 0 : index
    %c0_9 = arith.constant 0 : index
    %c0_10 = arith.constant 0 : index
    %17 = vector.load %arg6[%c0_8, %c0_9, %c0_10] : memref<8x8x1xf32, #tpu.memory_space<vmem>>, vector<8x8x1xf32>
    %cst_11 = arith.constant dense<0xFF800000> : vector<8x8xf32>
    %18 = vector.multi_reduction <maximumf>, %16, %cst_11 [2] : vector<8x8x8xf32> to vector<8x8xf32>
    %19 = vector.shape_cast %18 : vector<8x8xf32> to vector<8x8x1xf32>
    %20 = arith.maximumf %17, %19 : vector<8x8x1xf32>
    %21 = arith.subf %17, %20 : vector<8x8x1xf32>
    %22 = math.exp %21 : vector<8x8x1xf32>
    %23 = vector.broadcast %20 : vector<8x8x1xf32> to vector<8x8x8xf32>
    %24 = arith.subf %16, %23 : vector<8x8x8xf32>
    %25 = math.exp %24 : vector<8x8x8xf32>
    %c0_12 = arith.constant 0 : index
    %c0_13 = arith.constant 0 : index
    %c0_14 = arith.constant 0 : index
    %26 = vector.load %arg7[%c0_12, %c0_13, %c0_14] : memref<8x8x1xf32, #tpu.memory_space<vmem>>, vector<8x8x1xf32>
    %27 = arith.mulf %22, %26 : vector<8x8x1xf32>
    %cst_15 = arith.constant dense<0.000000e+00> : vector<8x8xf32>
    %28 = vector.multi_reduction <add>, %25, %cst_15 [2] : vector<8x8x8xf32> to vector<8x8xf32>
    %29 = vector.shape_cast %28 : vector<8x8xf32> to vector<8x8x1xf32>
    %30 = arith.addf %27, %29 : vector<8x8x1xf32>
    %c0_16 = arith.constant 0 : index
    %c0_17 = arith.constant 0 : index
    %c0_18 = arith.constant 0 : index
    %31 = vector.load %arg7[%c0_16, %c0_17, %c0_18] : memref<8x8x1xf32, #tpu.memory_space<vmem>>, vector<8x8x1xf32>
    tpu.vector_store %arg7[%c0_16, %c0_17, %c0_18], %30 {strides = array<i32>} : memref<8x8x1xf32, #tpu.memory_space<vmem>>, vector<8x8x1xf32>,
    %c0_19 = arith.constant 0 : index
    %c0_20 = arith.constant 0 : index
    %c0_21 = arith.constant 0 : index
    %32 = vector.load %arg8[%c0_19, %c0_20, %c0_21] : memref<8x8x8xf32, #tpu.memory_space<vmem>>, vector<8x8x8xf32>
    %33 = vector.broadcast %22 : vector<8x8x1xf32> to vector<8x8x8xf32>
    %34 = arith.mulf %33, %32 : vector<8x8x8xf32>
    %35 = arith.truncf %25 : vector<8x8x8xf32> to vector<8x8x8xbf16>
    %c0_22 = arith.constant 0 : index
    %c0_23 = arith.constant 0 : index
    %c0_24 = arith.constant 0 : index
    %36 = vector.load %arg4[%c0_22, %c0_23, %c0_24] : memref<8x8x8xbf16, #tpu.memory_space<vmem>>, vector<8x8x8xbf16>
    "tpu.trace_start"() <{level = 10 : i32, message = "bqk,bkd->bqd"}> : () -> ()
    %cst_25 = arith.constant dense<0.000000e+00> : vector<8x8x8xf32>
    %37 = tpu.matmul %35, %36, %cst_25 {dimension_numbers = #tpu.dot_dimension_numbers<[2], [1], [1], [2], [0, 0, 0, 1, 1, 2], [0], [0]>} : vector<8x8x8xbf16>, vector<8x8x8xbf16>, vector<8x8x8xf32> -> vector<8x8x8xf32>
    "tpu.trace_stop"() : () -> ()
    %38 = arith.addf %34, %37 : vector<8x8x8xf32>
    %c0_26 = arith.constant 0 : index
    %c0_27 = arith.constant 0 : index
    %c0_28 = arith.constant 0 : index
    %39 = vector.load %arg8[%c0_26, %c0_27, %c0_28] : memref<8x8x8xf32, #tpu.memory_space<vmem>>, vector<8x8x8xf32>
    tpu.vector_store %arg8[%c0_26, %c0_27, %c0_28], %38 {strides = array<i32>} : memref<8x8x8xf32, #tpu.memory_space<vmem>>, vector<8x8x8xf32>,
    %c0_29 = arith.constant 0 : index
    %c0_30 = arith.constant 0 : index
    %c0_31 = arith.constant 0 : index
    %40 = vector.load %arg6[%c0_29, %c0_30, %c0_31] : memref<8x8x1xf32, #tpu.memory_space<vmem>>, vector<8x8x1xf32>
    tpu.vector_store %arg6[%c0_29, %c0_30, %c0_31], %20 {strides = array<i32>} : memref<8x8x1xf32, #tpu.memory_space<vmem>>, vector<8x8x1xf32>,
    %c0_i32_32 = arith.constant 0 : i32
    %41 = arith.cmpi eq, %arg1, %c0_i32_32 : i32
    %42 = arith.extui %41 : i1 to i32
    %c0_i32_33 = arith.constant 0 : i32
    %43 = arith.cmpi ne, %42, %c0_i32_33 : i32
    scf.if %43 {
      %c0_34 = arith.constant 0 : index
      %c0_35 = arith.constant 0 : index
      %c0_36 = arith.constant 0 : index
      %44 = vector.load %arg8[%c0_34, %c0_35, %c0_36] : memref<8x8x8xf32, #tpu.memory_space<vmem>>, vector<8x8x8xf32>
      %c0_37 = arith.constant 0 : index
      %c0_38 = arith.constant 0 : index
      %c0_39 = arith.constant 0 : index
      %45 = vector.load %arg7[%c0_37, %c0_38, %c0_39] : memref<8x8x1xf32, #tpu.memory_space<vmem>>, vector<8x8x1xf32>
      %46 = tpu.reciprocal %45 {approx = true} : vector<8x8x1xf32> -> vector<8x8x1xf32>
      %47 = vector.broadcast %46 : vector<8x8x1xf32> to vector<8x8x8xf32>
      %48 = arith.mulf %44, %47 : vector<8x8x8xf32>
      %49 = arith.truncf %48 : vector<8x8x8xf32> to vector<8x8x8xbf16>
      %c0_40 = arith.constant 0 : index
      %c0_41 = arith.constant 0 : index
      %c0_42 = arith.constant 0 : index
      %50 = vector.load %arg5[%c0_40, %c0_41, %c0_42] : memref<8x8x8xbf16, #tpu.memory_space<vmem>>, vector<8x8x8xbf16>
      tpu.vector_store %arg5[%c0_40, %c0_41, %c0_42], %49 {strides = array<i32>} : memref<8x8x8xbf16, #tpu.memory_space<vmem>>, vector<8x8x8xbf16>,
    } else {
    }
    return
  }
  func.func @transform_0(%arg0: i32, %arg1: i32) -> (i32, i32, i32) {
    %c0_i32 = arith.constant 0 : i32
    %c0_i32_0 = arith.constant 0 : i32
    %c0_i32_1 = arith.constant 0 : i32
    return %c0_i32, %arg0, %c0_i32_0 : i32, i32, i32
  }
  func.func @transform_1(%arg0: i32, %arg1: i32) -> (i32, i32, i32) {
    %c0_i32 = arith.constant 0 : i32
    %c0_i32_0 = arith.constant 0 : i32
    %c0_i32_1 = arith.constant 0 : i32
    return %c0_i32, %arg1, %c0_i32_0 : i32, i32, i32
  }
  func.func @transform_2(%arg0: i32, %arg1: i32) -> (i32, i32, i32) {
    %c0_i32 = arith.constant 0 : i32
    %c0_i32_0 = arith.constant 0 : i32
    %c0_i32_1 = arith.constant 0 : i32
    return %c0_i32, %arg1, %c0_i32_0 : i32, i32, i32
  }
  func.func @transform_3(%arg0: i32, %arg1: i32) -> (i32, i32, i32) {
    %c0_i32 = arith.constant 0 : i32
    %c0_i32_0 = arith.constant 0 : i32
    %c0_i32_1 = arith.constant 0 : i32
    return %c0_i32, %arg0, %c0_i32_0 : i32, i32, i32
  }
}

module attributes {stable_mosaic.version = 11 : i64} {
  func.func @_fused_mm_kernel(%arg0: i32, %arg1: i32, %arg2: i32, %arg3: memref<16x64xbf16, #tpu.memory_space<vmem>>, %arg4: memref<64x32xbf16, #tpu.memory_space<vmem>>, %arg5: memref<1x32xf32, #tpu.memory_space<vmem>>, %arg6: memref<16x32xbf16, #tpu.memory_space<vmem>>, %arg7: memref<16x32xbf16, #tpu.memory_space<vmem>>, %arg8: memref<16x32xf32, #tpu.memory_space<vmem>>) attributes {dimension_semantics = [#tpu.dimension_semantics<parallel>, #tpu.dimension_semantics<parallel>, #tpu.dimension_semantics<arbitrary>], iteration_bounds = array<i64: 1, 1, 1>, scalar_prefetch = 0 : i64, scratch_operands = 1 : i64, tpu.core_type = #tpu.core_type<tc>, window_params = [{transform_indices = @transform_0, window_bounds = array<i64: 16, 64>}, {transform_indices = @transform_1, window_bounds = array<i64: 64, 32>}, {transform_indices = @transform_2, window_bounds = array<i64: 1, 32>}, {transform_indices = @transform_3, window_bounds = array<i64: 16, 32>}, {transform_indices = @transform_4, window_bounds = array<i64: 16, 32>}]} {
    %c0 = arith.constant 0 : index
    %c0_0 = arith.constant 0 : index
    %0 = vector.load %arg3[%c0, %c0_0] : memref<16x64xbf16, #tpu.memory_space<vmem>>, vector<16x64xbf16>
    %c0_i32 = arith.constant 0 : i32
    %1 = arith.cmpi eq, %arg2, %c0_i32 : i32
    %2 = arith.extui %1 : i1 to i32
    %c0_i32_1 = arith.constant 0 : i32
    %3 = arith.cmpi ne, %2, %c0_i32_1 : i32
    scf.if %3 {
      %cst_10 = arith.constant 0.000000e+00 : f32
      %12 = vector.broadcast %cst_10 : f32 to vector<16x32xf32>
      %c0_11 = arith.constant 0 : index
      %c0_12 = arith.constant 0 : index
      %13 = vector.load %arg8[%c0_11, %c0_12] : memref<16x32xf32, #tpu.memory_space<vmem>>, vector<16x32xf32>
      tpu.vector_store %arg8[%c0_11, %c0_12], %12 {strides = array<i32>} : memref<16x32xf32, #tpu.memory_space<vmem>>, vector<16x32xf32>,
    } else {
    }
    %c0_2 = arith.constant 0 : index
    %c0_3 = arith.constant 0 : index
    %4 = vector.load %arg8[%c0_2, %c0_3] : memref<16x32xf32, #tpu.memory_space<vmem>>, vector<16x32xf32>
    %c0_4 = arith.constant 0 : index
    %c0_5 = arith.constant 0 : index
    %5 = vector.load %arg4[%c0_4, %c0_5] : memref<64x32xbf16, #tpu.memory_space<vmem>>, vector<64x32xbf16>
    %cst = arith.constant dense<0.000000e+00> : vector<16x32xf32>
    %6 = tpu.matmul %0, %5, %cst {dimension_numbers = #tpu.dot_dimension_numbers<[1], [0], [0], [1], [0, 0, 1, 1], [], []>} : vector<16x64xbf16>, vector<64x32xbf16>, vector<16x32xf32> -> vector<16x32xf32>
    %7 = arith.addf %4, %6 : vector<16x32xf32>
    %c0_6 = arith.constant 0 : index
    %c0_7 = arith.constant 0 : index
    %8 = vector.load %arg8[%c0_6, %c0_7] : memref<16x32xf32, #tpu.memory_space<vmem>>, vector<16x32xf32>
    tpu.vector_store %arg8[%c0_6, %c0_7], %7 {strides = array<i32>} : memref<16x32xf32, #tpu.memory_space<vmem>>, vector<16x32xf32>,
    %c0_i32_8 = arith.constant 0 : i32
    %9 = arith.cmpi eq, %arg2, %c0_i32_8 : i32
    %10 = arith.extui %9 : i1 to i32
    %c0_i32_9 = arith.constant 0 : i32
    %11 = arith.cmpi ne, %10, %c0_i32_9 : i32
    scf.if %11 {
      %c0_10 = arith.constant 0 : index
      %c0_11 = arith.constant 0 : index
      %12 = vector.load %arg8[%c0_10, %c0_11] : memref<16x32xf32, #tpu.memory_space<vmem>>, vector<16x32xf32>
      %c0_12 = arith.constant 0 : index
      %c0_13 = arith.constant 0 : index
      %13 = vector.load %arg5[%c0_12, %c0_13] : memref<1x32xf32, #tpu.memory_space<vmem>>, vector<1x32xf32>
      %14 = vector.broadcast %13 : vector<1x32xf32> to vector<16x32xf32>
      %15 = arith.addf %12, %14 : vector<16x32xf32>
      %c0_14 = arith.constant 0 : index
      %c0_15 = arith.constant 0 : index
      %16 = vector.load %arg6[%c0_14, %c0_15] : memref<16x32xbf16, #tpu.memory_space<vmem>>, vector<16x32xbf16>
      %17 = arith.extf %16 : vector<16x32xbf16> to vector<16x32xf32>
      %18 = arith.addf %15, %17 : vector<16x32xf32>
      %19 = arith.truncf %18 : vector<16x32xf32> to vector<16x32xbf16>
      %c0_16 = arith.constant 0 : index
      %c0_17 = arith.constant 0 : index
      %20 = vector.load %arg7[%c0_16, %c0_17] : memref<16x32xbf16, #tpu.memory_space<vmem>>, vector<16x32xbf16>
      tpu.vector_store %arg7[%c0_16, %c0_17], %19 {strides = array<i32>} : memref<16x32xbf16, #tpu.memory_space<vmem>>, vector<16x32xbf16>,
    } else {
    }
    return
  }
  func.func @transform_0(%arg0: i32, %arg1: i32, %arg2: i32) -> (i32, i32) {
    %c0_i32 = arith.constant 0 : i32
    return %arg0, %arg2 : i32, i32
  }
  func.func @transform_1(%arg0: i32, %arg1: i32, %arg2: i32) -> (i32, i32) {
    %c0_i32 = arith.constant 0 : i32
    return %arg2, %arg1 : i32, i32
  }
  func.func @transform_2(%arg0: i32, %arg1: i32, %arg2: i32) -> (i32, i32) {
    %c0_i32 = arith.constant 0 : i32
    %c0_i32_0 = arith.constant 0 : i32
    return %c0_i32, %arg1 : i32, i32
  }
  func.func @transform_3(%arg0: i32, %arg1: i32, %arg2: i32) -> (i32, i32) {
    %c0_i32 = arith.constant 0 : i32
    return %arg0, %arg1 : i32, i32
  }
  func.func @transform_4(%arg0: i32, %arg1: i32, %arg2: i32) -> (i32, i32) {
    %c0_i32 = arith.constant 0 : i32
    return %arg0, %arg1 : i32, i32
  }
}

module attributes {stable_mosaic.version = 11 : i64} {
  func.func @_ln_kernel(%arg0: i32, %arg1: memref<16x32xbf16, #tpu.memory_space<vmem>>, %arg2: memref<1x32xf32, #tpu.memory_space<vmem>>, %arg3: memref<1x32xf32, #tpu.memory_space<vmem>>, %arg4: memref<16x32xbf16, #tpu.memory_space<vmem>>) attributes {dimension_semantics = [#tpu.dimension_semantics<parallel>], iteration_bounds = array<i64: 1>, scalar_prefetch = 0 : i64, scratch_operands = 0 : i64, tpu.core_type = #tpu.core_type<tc>, window_params = [{transform_indices = @transform_0, window_bounds = array<i64: 16, 32>}, {pipeline_mode = #tpu.pipeline_mode<synchronous>, transform_indices = @transform_1, window_bounds = array<i64: 1, 32>}, {pipeline_mode = #tpu.pipeline_mode<synchronous>, transform_indices = @transform_2, window_bounds = array<i64: 1, 32>}, {transform_indices = @transform_3, window_bounds = array<i64: 16, 32>}]} {
    %c0 = arith.constant 0 : index
    %c0_0 = arith.constant 0 : index
    %0 = vector.load %arg1[%c0, %c0_0] : memref<16x32xbf16, #tpu.memory_space<vmem>>, vector<16x32xbf16>
    %1 = arith.extf %0 : vector<16x32xbf16> to vector<16x32xf32>
    %cst = arith.constant dense<0.000000e+00> : vector<16xf32>
    %2 = vector.multi_reduction <add>, %1, %cst [1] : vector<16x32xf32> to vector<16xf32>
    %3 = vector.shape_cast %2 : vector<16xf32> to vector<16x1xf32>
    %cst_1 = arith.constant 3.200000e+01 : f32
    %4 = vector.broadcast %cst_1 : f32 to vector<16x1xf32>
    %5 = arith.divf %3, %4 : vector<16x1xf32>
    %6 = vector.broadcast %5 : vector<16x1xf32> to vector<16x32xf32>
    %7 = arith.subf %1, %6 : vector<16x32xf32>
    %8 = arith.mulf %7, %7 : vector<16x32xf32>
    %cst_2 = arith.constant dense<0.000000e+00> : vector<16xf32>
    %9 = vector.multi_reduction <add>, %8, %cst_2 [1] : vector<16x32xf32> to vector<16xf32>
    %10 = vector.shape_cast %9 : vector<16xf32> to vector<16x1xf32>
    %cst_3 = arith.constant 3.200000e+01 : f32
    %11 = vector.broadcast %cst_3 : f32 to vector<16x1xf32>
    %12 = arith.divf %10, %11 : vector<16x1xf32>
    %cst_4 = arith.constant 9.99999974E-6 : f32
    %13 = vector.broadcast %cst_4 : f32 to vector<16x1xf32>
    %14 = arith.addf %12, %13 : vector<16x1xf32>
    %15 = math.rsqrt %14 : vector<16x1xf32>
    %16 = vector.broadcast %15 : vector<16x1xf32> to vector<16x32xf32>
    %17 = arith.mulf %7, %16 : vector<16x32xf32>
    %c0_5 = arith.constant 0 : index
    %c0_6 = arith.constant 0 : index
    %18 = vector.load %arg2[%c0_5, %c0_6] : memref<1x32xf32, #tpu.memory_space<vmem>>, vector<1x32xf32>
    %19 = vector.broadcast %18 : vector<1x32xf32> to vector<16x32xf32>
    %20 = arith.mulf %17, %19 : vector<16x32xf32>
    %c0_7 = arith.constant 0 : index
    %c0_8 = arith.constant 0 : index
    %21 = vector.load %arg3[%c0_7, %c0_8] : memref<1x32xf32, #tpu.memory_space<vmem>>, vector<1x32xf32>
    %22 = vector.broadcast %21 : vector<1x32xf32> to vector<16x32xf32>
    %23 = arith.addf %20, %22 : vector<16x32xf32>
    %24 = arith.truncf %23 : vector<16x32xf32> to vector<16x32xbf16>
    %c0_9 = arith.constant 0 : index
    %c0_10 = arith.constant 0 : index
    %25 = vector.load %arg4[%c0_9, %c0_10] : memref<16x32xbf16, #tpu.memory_space<vmem>>, vector<16x32xbf16>
    tpu.vector_store %arg4[%c0_9, %c0_10], %24 {strides = array<i32>} : memref<16x32xbf16, #tpu.memory_space<vmem>>, vector<16x32xbf16>,
    return
  }
  func.func @transform_0(%arg0: i32) -> (i32, i32) {
    %c0_i32 = arith.constant 0 : i32
    %c0_i32_0 = arith.constant 0 : i32
    return %arg0, %c0_i32 : i32, i32
  }
  func.func @transform_1(%arg0: i32) -> (i32, i32) {
    %c0_i32 = arith.constant 0 : i32
    %c0_i32_0 = arith.constant 0 : i32
    %c0_i32_1 = arith.constant 0 : i32
    return %c0_i32, %c0_i32_0 : i32, i32
  }
  func.func @transform_2(%arg0: i32) -> (i32, i32) {
    %c0_i32 = arith.constant 0 : i32
    %c0_i32_0 = arith.constant 0 : i32
    %c0_i32_1 = arith.constant 0 : i32
    return %c0_i32, %c0_i32_0 : i32, i32
  }
  func.func @transform_3(%arg0: i32) -> (i32, i32) {
    %c0_i32 = arith.constant 0 : i32
    %c0_i32_0 = arith.constant 0 : i32
    return %arg0, %c0_i32 : i32, i32
  }
}

module attributes {stable_mosaic.version = 11 : i64} {
  func.func @_fused_mm_kernel(%arg0: i32, %arg1: i32, %arg2: i32, %arg3: memref<16x32xbf16, #tpu.memory_space<vmem>>, %arg4: memref<32x64xbf16, #tpu.memory_space<vmem>>, %arg5: memref<1x64xf32, #tpu.memory_space<vmem>>, %arg6: memref<16x64xbf16, #tpu.memory_space<vmem>>, %arg7: memref<16x64xf32, #tpu.memory_space<vmem>>) attributes {dimension_semantics = [#tpu.dimension_semantics<parallel>, #tpu.dimension_semantics<parallel>, #tpu.dimension_semantics<arbitrary>], iteration_bounds = array<i64: 1, 1, 1>, scalar_prefetch = 0 : i64, scratch_operands = 1 : i64, tpu.core_type = #tpu.core_type<tc>, window_params = [{transform_indices = @transform_0, window_bounds = array<i64: 16, 32>}, {transform_indices = @transform_1, window_bounds = array<i64: 32, 64>}, {transform_indices = @transform_2, window_bounds = array<i64: 1, 64>}, {transform_indices = @transform_3, window_bounds = array<i64: 16, 64>}]} {
    %c0 = arith.constant 0 : index
    %c0_0 = arith.constant 0 : index
    %0 = vector.load %arg3[%c0, %c0_0] : memref<16x32xbf16, #tpu.memory_space<vmem>>, vector<16x32xbf16>
    %c0_i32 = arith.constant 0 : i32
    %1 = arith.cmpi eq, %arg2, %c0_i32 : i32
    %2 = arith.extui %1 : i1 to i32
    %c0_i32_1 = arith.constant 0 : i32
    %3 = arith.cmpi ne, %2, %c0_i32_1 : i32
    scf.if %3 {
      %cst_10 = arith.constant 0.000000e+00 : f32
      %12 = vector.broadcast %cst_10 : f32 to vector<16x64xf32>
      %c0_11 = arith.constant 0 : index
      %c0_12 = arith.constant 0 : index
      %13 = vector.load %arg7[%c0_11, %c0_12] : memref<16x64xf32, #tpu.memory_space<vmem>>, vector<16x64xf32>
      tpu.vector_store %arg7[%c0_11, %c0_12], %12 {strides = array<i32>} : memref<16x64xf32, #tpu.memory_space<vmem>>, vector<16x64xf32>,
    } else {
    }
    %c0_2 = arith.constant 0 : index
    %c0_3 = arith.constant 0 : index
    %4 = vector.load %arg7[%c0_2, %c0_3] : memref<16x64xf32, #tpu.memory_space<vmem>>, vector<16x64xf32>
    %c0_4 = arith.constant 0 : index
    %c0_5 = arith.constant 0 : index
    %5 = vector.load %arg4[%c0_4, %c0_5] : memref<32x64xbf16, #tpu.memory_space<vmem>>, vector<32x64xbf16>
    %cst = arith.constant dense<0.000000e+00> : vector<16x64xf32>
    %6 = tpu.matmul %0, %5, %cst {dimension_numbers = #tpu.dot_dimension_numbers<[1], [0], [0], [1], [0, 0, 1, 1], [], []>} : vector<16x32xbf16>, vector<32x64xbf16>, vector<16x64xf32> -> vector<16x64xf32>
    %7 = arith.addf %4, %6 : vector<16x64xf32>
    %c0_6 = arith.constant 0 : index
    %c0_7 = arith.constant 0 : index
    %8 = vector.load %arg7[%c0_6, %c0_7] : memref<16x64xf32, #tpu.memory_space<vmem>>, vector<16x64xf32>
    tpu.vector_store %arg7[%c0_6, %c0_7], %7 {strides = array<i32>} : memref<16x64xf32, #tpu.memory_space<vmem>>, vector<16x64xf32>,
    %c0_i32_8 = arith.constant 0 : i32
    %9 = arith.cmpi eq, %arg2, %c0_i32_8 : i32
    %10 = arith.extui %9 : i1 to i32
    %c0_i32_9 = arith.constant 0 : i32
    %11 = arith.cmpi ne, %10, %c0_i32_9 : i32
    scf.if %11 {
      %c0_10 = arith.constant 0 : index
      %c0_11 = arith.constant 0 : index
      %12 = vector.load %arg7[%c0_10, %c0_11] : memref<16x64xf32, #tpu.memory_space<vmem>>, vector<16x64xf32>
      %c0_12 = arith.constant 0 : index
      %c0_13 = arith.constant 0 : index
      %13 = vector.load %arg5[%c0_12, %c0_13] : memref<1x64xf32, #tpu.memory_space<vmem>>, vector<1x64xf32>
      %14 = vector.broadcast %13 : vector<1x64xf32> to vector<16x64xf32>
      %15 = arith.addf %12, %14 : vector<16x64xf32>
      %16 = arith.truncf %15 : vector<16x64xf32> to vector<16x64xbf16>
      %c0_14 = arith.constant 0 : index
      %c0_15 = arith.constant 0 : index
      %17 = vector.load %arg6[%c0_14, %c0_15] : memref<16x64xbf16, #tpu.memory_space<vmem>>, vector<16x64xbf16>
      tpu.vector_store %arg6[%c0_14, %c0_15], %16 {strides = array<i32>} : memref<16x64xbf16, #tpu.memory_space<vmem>>, vector<16x64xbf16>,
    } else {
    }
    return
  }
  func.func @transform_0(%arg0: i32, %arg1: i32, %arg2: i32) -> (i32, i32) {
    %c0_i32 = arith.constant 0 : i32
    return %arg0, %arg2 : i32, i32
  }
  func.func @transform_1(%arg0: i32, %arg1: i32, %arg2: i32) -> (i32, i32) {
    %c0_i32 = arith.constant 0 : i32
    return %arg2, %arg1 : i32, i32
  }
  func.func @transform_2(%arg0: i32, %arg1: i32, %arg2: i32) -> (i32, i32) {
    %c0_i32 = arith.constant 0 : i32
    %c0_i32_0 = arith.constant 0 : i32
    return %c0_i32, %arg1 : i32, i32
  }
  func.func @transform_3(%arg0: i32, %arg1: i32, %arg2: i32) -> (i32, i32) {
    %c0_i32 = arith.constant 0 : i32
    return %arg0, %arg1 : i32, i32
  }
}

module attributes {stable_mosaic.version = 11 : i64} {
  func.func @_fused_mm_kernel(%arg0: i32, %arg1: i32, %arg2: i32, %arg3: memref<16x32xbf16, #tpu.memory_space<vmem>>, %arg4: memref<32x128xbf16, #tpu.memory_space<vmem>>, %arg5: memref<16x128xf32, #tpu.memory_space<vmem>>, %arg6: memref<16x128xf32, #tpu.memory_space<vmem>>) attributes {dimension_semantics = [#tpu.dimension_semantics<parallel>, #tpu.dimension_semantics<parallel>, #tpu.dimension_semantics<arbitrary>], iteration_bounds = array<i64: 1, 1, 1>, scalar_prefetch = 0 : i64, scratch_operands = 1 : i64, tpu.core_type = #tpu.core_type<tc>, window_params = [{transform_indices = @transform_0, window_bounds = array<i64: 16, 32>}, {transform_indices = @transform_1, window_bounds = array<i64: 32, 128>}, {transform_indices = @transform_2, window_bounds = array<i64: 16, 128>}]} {
    %c0 = arith.constant 0 : index
    %c0_0 = arith.constant 0 : index
    %0 = vector.load %arg3[%c0, %c0_0] : memref<16x32xbf16, #tpu.memory_space<vmem>>, vector<16x32xbf16>
    %c0_i32 = arith.constant 0 : i32
    %1 = arith.cmpi eq, %arg2, %c0_i32 : i32
    %2 = arith.extui %1 : i1 to i32
    %c0_i32_1 = arith.constant 0 : i32
    %3 = arith.cmpi ne, %2, %c0_i32_1 : i32
    scf.if %3 {
      %cst_10 = arith.constant 0.000000e+00 : f32
      %12 = vector.broadcast %cst_10 : f32 to vector<16x128xf32>
      %c0_11 = arith.constant 0 : index
      %c0_12 = arith.constant 0 : index
      %13 = vector.load %arg6[%c0_11, %c0_12] : memref<16x128xf32, #tpu.memory_space<vmem>>, vector<16x128xf32>
      tpu.vector_store %arg6[%c0_11, %c0_12], %12 {strides = array<i32>} : memref<16x128xf32, #tpu.memory_space<vmem>>, vector<16x128xf32>,
    } else {
    }
    %c0_2 = arith.constant 0 : index
    %c0_3 = arith.constant 0 : index
    %4 = vector.load %arg6[%c0_2, %c0_3] : memref<16x128xf32, #tpu.memory_space<vmem>>, vector<16x128xf32>
    %c0_4 = arith.constant 0 : index
    %c0_5 = arith.constant 0 : index
    %5 = vector.load %arg4[%c0_4, %c0_5] : memref<32x128xbf16, #tpu.memory_space<vmem>>, vector<32x128xbf16>
    %cst = arith.constant dense<0.000000e+00> : vector<16x128xf32>
    %6 = tpu.matmul %0, %5, %cst {dimension_numbers = #tpu.dot_dimension_numbers<[1], [0], [0], [1], [0, 0, 1, 1], [], []>} : vector<16x32xbf16>, vector<32x128xbf16>, vector<16x128xf32> -> vector<16x128xf32>
    %7 = arith.addf %4, %6 : vector<16x128xf32>
    %c0_6 = arith.constant 0 : index
    %c0_7 = arith.constant 0 : index
    %8 = vector.load %arg6[%c0_6, %c0_7] : memref<16x128xf32, #tpu.memory_space<vmem>>, vector<16x128xf32>
    tpu.vector_store %arg6[%c0_6, %c0_7], %7 {strides = array<i32>} : memref<16x128xf32, #tpu.memory_space<vmem>>, vector<16x128xf32>,
    %c0_i32_8 = arith.constant 0 : i32
    %9 = arith.cmpi eq, %arg2, %c0_i32_8 : i32
    %10 = arith.extui %9 : i1 to i32
    %c0_i32_9 = arith.constant 0 : i32
    %11 = arith.cmpi ne, %10, %c0_i32_9 : i32
    scf.if %11 {
      %c0_10 = arith.constant 0 : index
      %c0_11 = arith.constant 0 : index
      %12 = vector.load %arg6[%c0_10, %c0_11] : memref<16x128xf32, #tpu.memory_space<vmem>>, vector<16x128xf32>
      %c0_12 = arith.constant 0 : index
      %c0_13 = arith.constant 0 : index
      %13 = vector.load %arg5[%c0_12, %c0_13] : memref<16x128xf32, #tpu.memory_space<vmem>>, vector<16x128xf32>
      tpu.vector_store %arg5[%c0_12, %c0_13], %12 {strides = array<i32>} : memref<16x128xf32, #tpu.memory_space<vmem>>, vector<16x128xf32>,
    } else {
    }
    return
  }
  func.func @transform_0(%arg0: i32, %arg1: i32, %arg2: i32) -> (i32, i32) {
    %c0_i32 = arith.constant 0 : i32
    return %arg0, %arg2 : i32, i32
  }
  func.func @transform_1(%arg0: i32, %arg1: i32, %arg2: i32) -> (i32, i32) {
    %c0_i32 = arith.constant 0 : i32
    return %arg2, %arg1 : i32, i32
  }
  func.func @transform_2(%arg0: i32, %arg1: i32, %arg2: i32) -> (i32, i32) {
    %c0_i32 = arith.constant 0 : i32
    return %arg0, %arg1 : i32, i32
  }
}

</mosaic_0001>

<bundles_post_ra>
// kernel: _lambda_.46
= control target key start
LH: loop header
LB: loop body
LE: loop exit
PB: predicated region body
PF: predicated region fallthrough
CT: control target
= control target key end

     0   :  { %vm31_vm0 = vcmask 261120   ;;  %v205_v5 = vmov 32.0   ;;  %vm105_vm2 = vcmask 785408   ;;  %v206_v34 = vmov 0.0   ;;  %s270_s0 = inlined_call_operand.vmem [shape: bf16[16,32], index: 0, kind: input, shape index: {}]   ;;  %s271_s1 = inlined_call_operand.vmem [shape: f32[1,32], index: 1, kind: input, shape index: {}]   ;;  %s272_s2 = inlined_call_operand.vmem [shape: f32[1,32], index: 2, kind: input, shape index: {}]   ;;  %s273_s4 = inlined_call_operand.vmem [shape: f32[1,96], index: 4, kind: input, shape index: {}]   ;;  %s274_s3 = inlined_call_operand.vmem [shape: bf16[32,96], index: 3, kind: input, shape index: {}]   ;;  %s275_s5 = inlined_call_operand.vmem [shape: bf16[16,96], index: 5, kind: output, shape index: {}]  }
   0x1   :  { %v191_v0 = vld [vmem:[%s270_s0] sm:$0xff]   ;;  %199 = vrcp.f32 %v205_v5  ;;  %v189_v25 = vld [vmem:[%s274_s3 + $0x8] sm:$0xff]  ;;  %106 = vst.msk [vmem:[#allocation2] sm:$0xff] %vm105_vm2, %v206_v34  ;;  %vm97_vm7 = vcmask 257024   ;;  %vm167_vm10 = vcmask 781312  }
   0x2   :  { %v192_v1 = vunpack.c.l.bf16 %v191_v0  ;;  %v193_v3 = vunpack.c.h.bf16 %v191_v0  ;;  %141 = vmatpush.bf16.msra.mxu0 %v189_v25  ;;  %v188_v28 = vld [vmem:[%s274_s3] sm:$0xff]  ;;  %107 = vst.msk [vmem:[#allocation2 + $0x8] sm:$0xff] %vm105_vm2, %v206_v34 }
   0x3   :  { %v196_v39 = vld [vmem:[%s271_s1] ss:$0 sm:$0xff] }
   0x4   :  { %v32_v2 = vsel %vm31_vm0, %v192_v1, 0.0  ;;  %v35_v4 = vsel %vm31_vm0, %v193_v3, 0.0  ;;  %v197_v42 = vld [vmem:[%s272_s2] ss:$0 sm:$0xff] }
   0x5   :  { %33 = vadd.xlane.f32.xlu0 %v32_v2  ;;  %v198_v60 = vld [vmem:[%s273_s4] ss:$0 sm:$0xff] }
   0x6   :  { %142 = vmatpush.bf16.msra.mxu0 %v188_v28 }
   0x7   :  { %v200_v6 = vpop.eup %199 }
   0x8   :  { %v39_v7 = vmul.f32 32.0, %v200_v6  ;;  %vm43_vm1 = vweird.f32 %v200_v6  ;;  %v108_v56 = vld [vmem:[#allocation2] sm:$0xff] }
   0x9   :  { %v109_v59 = vld [vmem:[#allocation2 + $0x8] sm:$0xff] }
   0xa   :  { %v40_v8 = vsub.f32 1.0, %v39_v7 }
   0xc   :  { %v41_v9 = vmul.f32 %v200_v6, %v40_v8 }
   0xd   :  { %36 = vadd.xlane.f32.xlu0 %v35_v4 }
   0xe   :  { %v42_v10 = vadd.f32 %v200_v6, %v41_v9 }
  0x10   :  { %v44_v11 = vsel %vm43_vm1, %v200_v6, %v42_v10 }
  0x78   :  { %v34_v12 = vpop.xlane.xlu0 %33 }
  0x79   :  { %v45_v13 = vmul.f32 %v44_v11, %v34_v12 }
  0x7b   :  { %v47_v14 = vsub.f32 %v192_v1, %v45_v13 }
  0x7d   :  { %v49_v15 = vmul.f32 %v47_v14, %v47_v14 }
  0x7f   :  { %v51_v16 = vsel %vm31_vm0, %v49_v15, 0.0 }
  0x80   :  { %52 = vadd.xlane.f32.xlu1 %v51_v16  ;;  %v37_v17 = vpop.xlane.xlu0 %36 }
  0x81   :  { %v46_v18 = vmul.f32 %v44_v11, %v37_v17 }
  0x83   :  { %v48_v19 = vsub.f32 %v193_v3, %v46_v18 }
  0x85   :  { %v50_v20 = vmul.f32 %v48_v19, %v48_v19 }
  0x87   :  { %v54_v21 = vsel %vm31_vm0, %v50_v20, 0.0 }
  0x88   :  { %55 = vadd.xlane.f32.xlu1 %v54_v21 }
  0xf3   :  { %v53_v22 = vpop.xlane.xlu1 %52 }
  0xf4   :  { %v57_v23 = vmul.f32 %v53_v22, %v44_v11 }
  0xf6   :  { %v59_v24 = vadd.f32 1e-05, %v57_v23 }
  0xf8   :  { %201 = vrsqrt.f32 %v59_v24  ;;  %vm67_vm4 = vweird.f32 %v59_v24 }
  0xfb   :  { %v56_v26 = vpop.xlane.xlu1 %55 }
  0xfc   :  { %v58_v27 = vmul.f32 %v56_v26, %v44_v11 }
  0xfe   :  { %v202_v29 = vpop.eup %201  ;;  %v60_v30 = vadd.f32 1e-05, %v58_v27 }
  0xff   :  { %v62_v31 = vmul.f32 %v202_v29, %v59_v24  ;;  %vm68_vm3 = vweird.f32 %v202_v29 }
 0x100   :  { %203 = vrsqrt.f32 %v60_v30  ;;  %vm69_vm5 = vmor %vm67_vm4, %vm68_vm3  ;;  %vm77_vm8 = vweird.f32 %v60_v30 }
 0x101   :  { %v63_v32 = vmul.f32 %v202_v29, %v62_v31 }
 0x103   :  { %v64_v33 = vmul.f32 0.5, %v63_v32 }
 0x105   :  { %v65_v35 = vsub.f32 1.5, %v64_v33 }
 0x106   :  { %v204_v36 = vpop.eup %203 }
 0x107   :  { %v66_v37 = vmul.f32 %v202_v29, %v65_v35  ;;  %v72_v38 = vmul.f32 %v204_v36, %v60_v30  ;;  %vm78_vm6 = vweird.f32 %v204_v36 }
 0x108   :  { %vm79_vm9 = vmor %vm77_vm8, %vm78_vm6 }
 0x109   :  { %v70_v40 = vsel %vm69_vm5, %v202_v29, %v66_v37  ;;  %v73_v41 = vmul.f32 %v204_v36, %v72_v38 }
 0x10a   :  { %v81_v43 = vmul.f32 %v70_v40, %v47_v14 }
 0x10b   :  { %v74_v44 = vmul.f32 0.5, %v73_v41 }
 0x10c   :  { %v87_v45 = vmul.f32 %v196_v39, %v81_v43 }
 0x10d   :  { %v75_v46 = vsub.f32 1.5, %v74_v44 }
 0x10e   :  { %v93_v47 = vadd.f32 %v197_v42, %v87_v45 }
 0x10f   :  { %v76_v48 = vmul.f32 %v204_v36, %v75_v46 }
 0x110   :  { %v95_v49 = vpack.c.bf16 %v93_v47, %v93_v47 }
 0x111   :  { %v80_v50 = vsel %vm79_vm9, %v204_v36, %v76_v48 }
 0x112   :  { %98 = vst.msk [vmem:[#allocation3] sm:$0xf] %vm97_vm7, %v95_v49  ;;  %v82_v51 = vmul.f32 %v80_v50, %v48_v19 }
 0x114   :  { %v88_v52 = vmul.f32 %v196_v39, %v82_v51 }
 0x116   :  { %v94_v53 = vadd.f32 %v197_v42, %v88_v52 }
 0x118   :  { %v96_v54 = vpack.c.bf16 %v94_v53, %v94_v53 }
 0x11a   :  { %99 = vst.msk [vmem:[#allocation3 + $0x4] sm:$0xf] %vm97_vm7, %v96_v54 }
 0x121   :  { %v187_v55 = vld [vmem:[#allocation3] sm:$0xff] }
 0x122   :  { %186 = vmatmul.msk.bf16.vlgmr.msra.gmra.mxu0 %vm31_vm0, %v187_v55 }
 0x19f   :  { %v144_v57 = vpop.f32.mrf.mxu0 }
 0x1a0   :  { %v149_v58 = vadd.f32 %v144_v57, %v108_v56 }
 0x1a2   :  { %152 = vst.msk [vmem:[#allocation2] sm:$0xff] %vm105_vm2, %v149_v58 }
 0x1a7   :  { %v146_v61 = vpop.f32.mrf.mxu0 }
 0x1a8   :  { %v150_v62 = vadd.f32 %v146_v61, %v109_v59 }
 0x1a9   :  { %v157_v63 = vld [vmem:[#allocation2] sm:$0xff] }
 0x1aa   :  { %v163_v0 = vadd.f32 %v198_v60, %v157_v63  ;;  %153 = vst.msk [vmem:[#allocation2 + $0x8] sm:$0xff] %vm105_vm2, %v150_v62 }
 0x1ac   :  { %v165_v1 = vpack.c.bf16 %v163_v0, %v163_v0 }
 0x1ae   :  { %168 = vst.msk [vmem:[%s275_s5] sm:$0xf] %vm167_vm10, %v165_v1 }
 0x1b1   :  { %v158_v2 = vld [vmem:[#allocation2 + $0x8] sm:$0xff] }
 0x1b2   :  { %v164_v3 = vadd.f32 %v198_v60, %v158_v2 }
 0x1b4   :  { %v166_v4 = vpack.c.bf16 %v164_v3, %v164_v3 }
 0x1b6   :  { %169 = vst.msk [vmem:[%s275_s5 + $0x4] sm:$0xf] %vm167_vm10, %v166_v4 }

// kernel: _lambda_.48
= control target key start
LH: loop header
LB: loop body
LE: loop exit
PB: predicated region body
PF: predicated region fallthrough
CT: control target
= control target key end

     0   :  { %vm24_vm0 = vcmask 261120   ;;  %v120_v1 = vmov 0.0   ;;  %vm91_vm1 = vcmask 257024   ;;  %s172_s1 = inlined_call_operand.vmem [shape: bf16[32,32], index: 1, kind: input, shape index: {}]   ;;  %s173_s2 = inlined_call_operand.vmem [shape: f32[1,32], index: 2, kind: input, shape index: {}]   ;;  %s174_s0 = inlined_call_operand.vmem [shape: bf16[16,32], index: 0, kind: input, shape index: {}]   ;;  %s175_s3 = inlined_call_operand.vmem [shape: bf16[16,32], index: 3, kind: input, shape index: {}]   ;;  %s176_s4 = inlined_call_operand.vmem [shape: bf16[16,32], index: 4, kind: output, shape index: {}]  }
   0x1   :  { %v113_v0 = vld [vmem:[%s172_s1 + $0x8] sm:$0xff]  ;;  %25 = vst.msk [vmem:[#allocation2] sm:$0xff] %vm24_vm0, %v120_v1  ;;  %v112_v2 = vld [vmem:[%s172_s1] sm:$0xff] }
   0x2   :  { %26 = vst.msk [vmem:[#allocation2 + $0x8] sm:$0xff] %vm24_vm0, %v120_v1  ;;  %60 = vmatpush.bf16.msra.mxu0 %v113_v0  ;;  %v111_v3 = vld [vmem:[%s174_s0] sm:$0xff] }
   0x3   :  { %v115_v7 = vld [vmem:[%s175_s3] sm:$0xff]  }
   0x4   :  { %v119_v9 = vld [vmem:[%s173_s2] ss:$0 sm:$0xff]  ;;  %v116_v11 = vunpack.c.l.bf16 %v115_v7  ;;  %v117_v17 = vunpack.c.h.bf16 %v115_v7 }
   0x6   :  { %61 = vmatpush.bf16.msra.mxu0 %v112_v2 }
   0x8   :  { %v27_v4 = vld [vmem:[#allocation2] sm:$0xff] }
   0x9   :  { %110 = vmatmul.msk.bf16.vlgmr.msra.gmra.mxu0 %vm24_vm0, %v111_v3  ;;  %v28_v8 = vld [vmem:[#allocation2 + $0x8] sm:$0xff] }
  0x86   :  { %v63_v5 = vpop.f32.mrf.mxu0 }
  0x87   :  { %v68_v6 = vadd.f32 %v63_v5, %v27_v4 }
  0x89   :  { %70 = vst.msk [vmem:[#allocation2] sm:$0xff] %vm24_vm0, %v68_v6 }
  0x8e   :  { %v65_v10 = vpop.f32.mrf.mxu0 }
  0x8f   :  { %v69_v12 = vadd.f32 %v65_v10, %v28_v8 }
  0x90   :  { %v75_v13 = vld [vmem:[#allocation2] sm:$0xff] }
  0x91   :  { %v81_v14 = vadd.f32 %v119_v9, %v75_v13  ;;  %71 = vst.msk [vmem:[#allocation2 + $0x8] sm:$0xff] %vm24_vm0, %v69_v12 }
  0x93   :  { %v87_v15 = vadd.f32 %v116_v11, %v81_v14 }
  0x95   :  { %v89_v16 = vpack.c.bf16 %v87_v15, %v87_v15 }
  0x97   :  { %92 = vst.msk [vmem:[%s176_s4] sm:$0xf] %vm91_vm1, %v89_v16 }
  0x98   :  { %v76_v18 = vld [vmem:[#allocation2 + $0x8] sm:$0xff] }
  0x99   :  { %v82_v19 = vadd.f32 %v119_v9, %v76_v18 }
  0x9b   :  { %v88_v20 = vadd.f32 %v117_v17, %v82_v19 }
  0x9d   :  { %v90_v21 = vpack.c.bf16 %v88_v20, %v88_v20 }
  0x9f   :  { %93 = vst.msk [vmem:[%s176_s4 + $0x4] sm:$0xf] %vm91_vm1, %v90_v21 }

// kernel: _lambda_.49
= control target key start
LH: loop header
LB: loop body
LE: loop exit
PB: predicated region body
PF: predicated region fallthrough
CT: control target
= control target key end

     0   :  { %vm31_vm0 = vcmask 261120   ;;  %v204_v5 = vmov 32.0   ;;  %v205_v34 = vmov 0.0   ;;  %vm97_vm6 = vcmask 257024   ;;  %s273_s0 = inlined_call_operand.vmem [shape: bf16[16,32], index: 0, kind: input, shape index: {}]   ;;  %s274_s1 = inlined_call_operand.vmem [shape: f32[1,32], index: 1, kind: input, shape index: {}]   ;;  %s275_s2 = inlined_call_operand.vmem [shape: f32[1,32], index: 2, kind: input, shape index: {}]   ;;  %s276_s4 = inlined_call_operand.vmem [shape: f32[1,32], index: 4, kind: input, shape index: {}]   ;;  %s277_s3 = inlined_call_operand.vmem [shape: bf16[32,32], index: 3, kind: input, shape index: {}]   ;;  %s278_s5 = inlined_call_operand.vmem [shape: bf16[16,32], index: 5, kind: output, shape index: {}]  }
   0x1   :  { %v190_v0 = vld [vmem:[%s273_s0] sm:$0xff]   ;;  %198 = vrcp.f32 %v204_v5  ;;  %v188_v25 = vld [vmem:[%s277_s3 + $0x8] sm:$0xff]  ;;  %106 = vst.msk [vmem:[#allocation2] sm:$0xff] %vm31_vm0, %v205_v34 }
   0x2   :  { %v191_v1 = vunpack.c.l.bf16 %v190_v0  ;;  %v192_v3 = vunpack.c.h.bf16 %v190_v0  ;;  %141 = vmatpush.bf16.msra.mxu0 %v188_v25  ;;  %v187_v28 = vld [vmem:[%s277_s3] sm:$0xff]  ;;  %107 = vst.msk [vmem:[#allocation2 + $0x8] sm:$0xff] %vm31_vm0, %v205_v34 }
   0x3   :  { %v195_v39 = vld [vmem:[%s274_s1] ss:$0 sm:$0xff] }
   0x4   :  { %v32_v2 = vsel %vm31_vm0, %v191_v1, 0.0  ;;  %v35_v4 = vsel %vm31_vm0, %v192_v3, 0.0  ;;  %v196_v42 = vld [vmem:[%s275_s2] ss:$0 sm:$0xff] }
   0x5   :  { %33 = vadd.xlane.f32.xlu0 %v32_v2  ;;  %v197_v60 = vld [vmem:[%s276_s4] ss:$0 sm:$0xff] }
   0x6   :  { %142 = vmatpush.bf16.msra.mxu0 %v187_v28 }
   0x7   :  { %v199_v6 = vpop.eup %198 }
   0x8   :  { %v39_v7 = vmul.f32 32.0, %v199_v6  ;;  %vm43_vm1 = vweird.f32 %v199_v6  ;;  %v108_v56 = vld [vmem:[#allocation2] sm:$0xff] }
   0x9   :  { %v109_v59 = vld [vmem:[#allocation2 + $0x8] sm:$0xff] }
   0xa   :  { %v40_v8 = vsub.f32 1.0, %v39_v7 }
   0xc   :  { %v41_v9 = vmul.f32 %v199_v6, %v40_v8 }
   0xd   :  { %36 = vadd.xlane.f32.xlu0 %v35_v4 }
   0xe   :  { %v42_v10 = vadd.f32 %v199_v6, %v41_v9 }
  0x10   :  { %v44_v11 = vsel %vm43_vm1, %v199_v6, %v42_v10 }
  0x78   :  { %v34_v12 = vpop.xlane.xlu0 %33 }
  0x79   :  { %v45_v13 = vmul.f32 %v44_v11, %v34_v12 }
  0x7b   :  { %v47_v14 = vsub.f32 %v191_v1, %v45_v13 }
  0x7d   :  { %v49_v15 = vmul.f32 %v47_v14, %v47_v14 }
  0x7f   :  { %v51_v16 = vsel %vm31_vm0, %v49_v15, 0.0 }
  0x80   :  { %52 = vadd.xlane.f32.xlu1 %v51_v16  ;;  %v37_v17 = vpop.xlane.xlu0 %36 }
  0x81   :  { %v46_v18 = vmul.f32 %v44_v11, %v37_v17 }
  0x83   :  { %v48_v19 = vsub.f32 %v192_v3, %v46_v18 }
  0x85   :  { %v50_v20 = vmul.f32 %v48_v19, %v48_v19 }
  0x87   :  { %v54_v21 = vsel %vm31_vm0, %v50_v20, 0.0 }
  0x88   :  { %55 = vadd.xlane.f32.xlu1 %v54_v21 }
  0xf3   :  { %v53_v22 = vpop.xlane.xlu1 %52 }
  0xf4   :  { %v57_v23 = vmul.f32 %v53_v22, %v44_v11 }
  0xf6   :  { %v59_v24 = vadd.f32 1e-05, %v57_v23 }
  0xf8   :  { %200 = vrsqrt.f32 %v59_v24  ;;  %vm67_vm3 = vweird.f32 %v59_v24 }
  0xfb   :  { %v56_v26 = vpop.xlane.xlu1 %55 }
  0xfc   :  { %v58_v27 = vmul.f32 %v56_v26, %v44_v11 }
  0xfe   :  { %v201_v29 = vpop.eup %200  ;;  %v60_v30 = vadd.f32 1e-05, %v58_v27 }
  0xff   :  { %v62_v31 = vmul.f32 %v201_v29, %v59_v24  ;;  %vm68_vm2 = vweird.f32 %v201_v29 }
 0x100   :  { %202 = vrsqrt.f32 %v60_v30  ;;  %vm69_vm4 = vmor %vm67_vm3, %vm68_vm2  ;;  %vm77_vm7 = vweird.f32 %v60_v30 }
 0x101   :  { %v63_v32 = vmul.f32 %v201_v29, %v62_v31 }
 0x103   :  { %v64_v33 = vmul.f32 0.5, %v63_v32 }
 0x105   :  { %v65_v35 = vsub.f32 1.5, %v64_v33 }
 0x106   :  { %v203_v36 = vpop.eup %202 }
 0x107   :  { %v66_v37 = vmul.f32 %v201_v29, %v65_v35  ;;  %v72_v38 = vmul.f32 %v203_v36, %v60_v30  ;;  %vm78_vm5 = vweird.f32 %v203_v36 }
 0x108   :  { %vm79_vm8 = vmor %vm77_vm7, %vm78_vm5 }
 0x109   :  { %v70_v40 = vsel %vm69_vm4, %v201_v29, %v66_v37  ;;  %v73_v41 = vmul.f32 %v203_v36, %v72_v38 }
 0x10a   :  { %v81_v43 = vmul.f32 %v70_v40, %v47_v14 }
 0x10b   :  { %v74_v44 = vmul.f32 0.5, %v73_v41 }
 0x10c   :  { %v87_v45 = vmul.f32 %v195_v39, %v81_v43 }
 0x10d   :  { %v75_v46 = vsub.f32 1.5, %v74_v44 }
 0x10e   :  { %v93_v47 = vadd.f32 %v196_v42, %v87_v45 }
 0x10f   :  { %v76_v48 = vmul.f32 %v203_v36, %v75_v46 }
 0x110   :  { %v95_v49 = vpack.c.bf16 %v93_v47, %v93_v47 }
 0x111   :  { %v80_v50 = vsel %vm79_vm8, %v203_v36, %v76_v48 }
 0x112   :  { %98 = vst.msk [vmem:[#allocation3] sm:$0xf] %vm97_vm6, %v95_v49  ;;  %v82_v51 = vmul.f32 %v80_v50, %v48_v19 }
 0x114   :  { %v88_v52 = vmul.f32 %v195_v39, %v82_v51 }
 0x116   :  { %v94_v53 = vadd.f32 %v196_v42, %v88_v52 }
 0x118   :  { %v96_v54 = vpack.c.bf16 %v94_v53, %v94_v53 }
 0x11a   :  { %99 = vst.msk [vmem:[#allocation3 + $0x4] sm:$0xf] %vm97_vm6, %v96_v54 }
 0x121   :  { %v186_v55 = vld [vmem:[#allocation3] sm:$0xff] }
 0x122   :  { %185 = vmatmul.msk.bf16.vlgmr.msra.gmra.mxu0 %vm31_vm0, %v186_v55 }
 0x19f   :  { %v144_v57 = vpop.f32.mrf.mxu0 }
 0x1a0   :  { %v149_v58 = vadd.f32 %v144_v57, %v108_v56 }
 0x1a2   :  { %151 = vst.msk [vmem:[#allocation2] sm:$0xff] %vm31_vm0, %v149_v58 }
 0x1a7   :  { %v146_v61 = vpop.f32.mrf.mxu0 }
 0x1a8   :  { %v150_v62 = vadd.f32 %v146_v61, %v109_v59 }
 0x1a9   :  { %v156_v63 = vld [vmem:[#allocation2] sm:$0xff] }
 0x1aa   :  { %v162_v0 = vadd.f32 %v197_v60, %v156_v63  ;;  %152 = vst.msk [vmem:[#allocation2 + $0x8] sm:$0xff] %vm31_vm0, %v150_v62 }
 0x1ac   :  { %v164_v1 = vpack.c.bf16 %v162_v0, %v162_v0 }
 0x1ae   :  { %167 = vst.msk [vmem:[%s278_s5] sm:$0xf] %vm97_vm6, %v164_v1 }
 0x1b1   :  { %v157_v2 = vld [vmem:[#allocation2 + $0x8] sm:$0xff] }
 0x1b2   :  { %v163_v3 = vadd.f32 %v197_v60, %v157_v2 }
 0x1b4   :  { %v165_v4 = vpack.c.bf16 %v163_v3, %v163_v3 }
 0x1b6   :  { %168 = vst.msk [vmem:[%s278_s5 + $0x4] sm:$0xf] %vm97_vm6, %v165_v4 }

// kernel: _lambda_.47
= control target key start
LH: loop header
LB: loop body
LE: loop exit
PB: predicated region body
PF: predicated region fallthrough
CT: control target
= control target key end

     0   :  { %vm36_vm0 = vcmask 64512   ;;  %v215_v24 = vlaneseq  ;;  %vm19_vm4 = vcmask 7168   ;;  %v837_v31 = vmov -inf   ;;  %s1165_s1 = inlined_call_operand.vmem [shape: bf16[8,8,8], index: 1, kind: input, shape index: {}]   ;;  %s1166_s0 = inlined_call_operand.vmem [shape: bf16[8,8,8], index: 0, kind: input, shape index: {}]   ;;  %s1167_s2 = inlined_call_operand.vmem [shape: bf16[8,8,8], index: 2, kind: input, shape index: {}]   ;;  %s1168_s3 = inlined_call_operand.vmem [shape: bf16[8,8,8], index: 3, kind: output, shape index: {}]  }
   0x1   :  { %v53_v0 = vld [vmem:[%s1165_s1] sm:$0xf]  ;;  %v55_v1 = vld [vmem:[%s1165_s1 + $0x8] sm:$0xf]  ;;  %v56_v2 = vld [vmem:[%s1165_s1 + $0xc] sm:$0xf] }
   0x2   :  { %v66_v3 = vsel %vm36_vm0, %v53_v0, 0  ;;  %v104_v4 = vsel %vm36_vm0, %v55_v1, 0  ;;  %v123_v5 = vsel %vm36_vm0, %v56_v2, 0  ;;  %v59_v6 = vld [vmem:[%s1165_s1 + $0x18] sm:$0xf]  ;;  %v216_v25 = vand.u32 127, %v215_v24 }
   0x3   :  { %75 = vmatpush.bf16.xpose.msra.mxu0 %v66_v3  ;;  %113 = vmatpush.bf16.xpose.msra.mxu2 %v104_v4  ;;  %v180_v7 = vsel %vm36_vm0, %v59_v6, 0  ;;  %v54_v8 = vld [vmem:[%s1165_s1 + $0x4] sm:$0xf]  ;;  %v60_v9 = vld [vmem:[%s1165_s1 + $0x1c] sm:$0xf]  ;;  %v222_v26 = vshrl.u32 %v215_v24, 7 }
   0x4   :  { %132 = vmatpush.bf16.xpose.msra.mxu3 %v123_v5  ;;  %v85_v10 = vsel %vm36_vm0, %v54_v8, 0  ;;  %v199_v11 = vsel %vm36_vm0, %v60_v9, 0  ;;  %v58_v12 = vld [vmem:[%s1165_s1 + $0x14] sm:$0xf]  ;;  %v57_v13 = vld [vmem:[%s1165_s1 + $0x10] sm:$0xf] }
   0x5   :  { %94 = vmatpush.bf16.xpose.msra.mxu1 %v85_v10  ;;  %v45_v14 = vld [vmem:[%s1166_s0] sm:$0xf]  ;;  %v47_v15 = vld [vmem:[%s1166_s0 + $0x8] sm:$0xf]  ;;  %v161_v16 = vsel %vm36_vm0, %v58_v12, 0  ;;  %v142_v17 = vsel %vm36_vm0, %v57_v13, 0  ;;  %vm225_vm2 = vcmp.ge.s32.totalorder %v222_v26, %v216_v25 }
   0x6   :  { %v48_v18 = vld [vmem:[%s1166_s0 + $0xc] sm:$0xf]  ;;  %v46_v19 = vld [vmem:[%s1166_s0 + $0x4] sm:$0xf]  ;;  %v51_v20 = vld [vmem:[%s1166_s0 + $0x18] sm:$0xf] }
   0x7   :  { %v49_v21 = vld [vmem:[%s1166_s0 + $0x10] sm:$0xf]  ;;  %v52_v22 = vld [vmem:[%s1166_s0 + $0x1c] sm:$0xf]  ;;  %v50_v23 = vld [vmem:[%s1166_s0 + $0x14] sm:$0xf] }
   0x8   :  { %vm219_vm1 = vcmp.lt.s32.totalorder %v216_v25, 8  ;;  %20 = vst.msk [vmem:[#allocation2] sm:$0xff] %vm19_vm4, %v837_v31  ;;  %v838_v61 = vmov 0   ;;  %v839_v62 = vmov 0.0   ;;  %vm497_vm5 = vcmask 1043456  }
   0x9   :  { %vm924_vm3 = vmand %vm219_vm1, %vm225_vm2  ;;  %21 = vst.msk [vmem:[#allocation2 + $0x8] sm:$0xff] %vm19_vm4, %v837_v31  ;;  %788 = vset.pattern.permute.xlu1 %v838_v61  ;;  %786 = vset.pattern.permute.xlu2 %v838_v61  ;;  %vm754_vm6 = vcmask 60416  }
   0xa   :  { %767 = vmatmul.msk.bf16.vlgmr.msra.gmra.mxu0 %vm36_vm0, %v45_v14  ;;  %769 = vmatmul.msk.bf16.vlgmr.msra.gmra.mxu2 %vm36_vm0, %v47_v15  ;;  %22 = vst.msk [vmem:[#allocation2 + $0x10] sm:$0xff] %vm19_vm4, %v837_v31 }
   0xb   :  { %189 = vmatpush.bf16.xpose.msrb.mxu2 %v180_v7  ;;  %151 = vmatpush.bf16.xpose.msrb.mxu0 %v142_v17  ;;  %23 = vst.msk [vmem:[#allocation2 + $0x18] sm:$0xff] %vm19_vm4, %v837_v31 }
   0xc   :  { %208 = vmatpush.bf16.xpose.msrb.mxu3 %v199_v11  ;;  %768 = vmatmul.msk.bf16.vlgmr.msra.gmra.mxu1 %vm36_vm0, %v46_v19  ;;  %24 = vst.msk [vmem:[#allocation2 + $0x20] sm:$0xff] %vm19_vm4, %v837_v31 }
   0xd   :  { %170 = vmatpush.bf16.xpose.msrb.mxu1 %v161_v16  ;;  %770 = vmatmul.msk.bf16.vlgmr.msra.gmra.mxu3 %vm36_vm0, %v48_v18  ;;  %25 = vst.msk [vmem:[#allocation2 + $0x28] sm:$0xff] %vm19_vm4, %v837_v31 }
   0xe   :  { %26 = vst.msk [vmem:[#allocation2 + $0x30] sm:$0xff] %vm19_vm4, %v837_v31  ;;  %787 = vset.pattern.permute.xlu0 %v838_v61 }
   0xf   :  { %27 = vst.msk [vmem:[#allocation2 + $0x38] sm:$0xff] %vm19_vm4, %v837_v31  ;;  %v237_v63 = vld [vmem:[#allocation2] sm:$0xff] }
  0x10   :  { %38 = vst.msk [vmem:[#allocation4 + $0x8] sm:$0xff] %vm36_vm0, %v839_v62  ;;  %v238_v4 = vld [vmem:[#allocation2 + $0x8] sm:$0xff] }
  0x11   :  { %28 = vst.msk [vmem:[#allocation3] sm:$0xff] %vm19_vm4, %v839_v62  ;;  %v239_v2 = vld [vmem:[#allocation2 + $0x10] sm:$0xff] }
  0x12   :  { %29 = vst.msk [vmem:[#allocation3 + $0x8] sm:$0xff] %vm19_vm4, %v839_v62  ;;  %v240_v9 = vld [vmem:[#allocation2 + $0x18] sm:$0xff] }
  0x13   :  { %30 = vst.msk [vmem:[#allocation3 + $0x10] sm:$0xff] %vm19_vm4, %v839_v62  ;;  %v241_v16 = vld [vmem:[#allocation2 + $0x20] sm:$0xff] }
  0x14   :  { %31 = vst.msk [vmem:[#allocation3 + $0x18] sm:$0xff] %vm19_vm4, %v839_v62  ;;  %v242_v13 = vld [vmem:[#allocation2 + $0x28] sm:$0xff] }
  0x15   :  { %32 = vst.msk [vmem:[#allocation3 + $0x20] sm:$0xff] %vm19_vm4, %v839_v62  ;;  %v243_v15 = vld [vmem:[#allocation2 + $0x30] sm:$0xff] }
  0x16   :  { %33 = vst.msk [vmem:[#allocation3 + $0x28] sm:$0xff] %vm19_vm4, %v839_v62  ;;  %v1010_v26 = vld [vmem:[#allocation2 + $0x38] sm:$0xff] }
  0x17   :  { %34 = vst.msk [vmem:[#allocation3 + $0x30] sm:$0xff] %vm19_vm4, %v839_v62 }
  0x18   :  { %35 = vst.msk [vmem:[#allocation3 + $0x38] sm:$0xff] %vm19_vm4, %v839_v62 }
  0x19   :  { %37 = vst.msk [vmem:[#allocation4] sm:$0xff] %vm36_vm0, %v839_v62 }
  0x1a   :  { %773 = vmatmul.msk.bf16.vlgmr.msrb.gmra.mxu2 %vm36_vm0, %v51_v20  ;;  %771 = vmatmul.msk.bf16.vlgmr.msrb.gmra.mxu0 %vm36_vm0, %v49_v21  ;;  %39 = vst.msk [vmem:[#allocation4 + $0x10] sm:$0xff] %vm36_vm0, %v839_v62 }
  0x1b   :  { %40 = vst.msk [vmem:[#allocation4 + $0x18] sm:$0xff] %vm36_vm0, %v839_v62 }
  0x1c   :  { %772 = vmatmul.msk.bf16.vlgmr.msrb.gmra.mxu1 %vm36_vm0, %v50_v23  ;;  %41 = vst.msk [vmem:[#allocation4 + $0x20] sm:$0xff] %vm36_vm0, %v839_v62 }
  0x1d   :  { %774 = vmatmul.msk.bf16.vlgmr.msrb.gmra.mxu3 %vm36_vm0, %v52_v22  ;;  %42 = vst.msk [vmem:[#allocation4 + $0x28] sm:$0xff] %vm36_vm0, %v839_v62 }
  0x1e   :  { %43 = vst.msk [vmem:[#allocation4 + $0x30] sm:$0xff] %vm36_vm0, %v839_v62 }
  0x1f   :  { %44 = vst.msk [vmem:[#allocation4 + $0x38] sm:$0xff] %vm36_vm0, %v839_v62 }
  0x87   :  { %v77_v28 = vpop.f32.mrf.mxu0 }
  0x88   :  { %v930_v29 = vsel %vm924_vm3, %v77_v28, -1e+30 }
  0x89   :  { %v245_v30 = vsel %vm36_vm0, %v930_v29, -inf  ;;  %v96_v32 = vpop.f32.mrf.mxu1 }
  0x8a   :  { %246 = vmax.xlane.f32.xlu1 %v245_v30  ;;  %v939_v33 = vsel %vm924_vm3, %v96_v32, -1e+30 }
  0x8b   :  { %v248_v38 = vsel %vm36_vm0, %v939_v33, -inf }
  0x8d   :  { %v115_v34 = vpop.f32.mrf.mxu2 }
  0x8e   :  { %v945_v35 = vsel %vm924_vm3, %v115_v34, -1e+30 }
  0x8f   :  { %v251_v37 = vsel %vm36_vm0, %v945_v35, -inf  ;;  %v79_v39 = vpop.f32.mrf.mxu0 }
  0x90   :  { %v134_v36 = vpop.f32.mrf.mxu3  ;;  %252 = vmax.xlane.f32.xlu0 %v251_v37 }
  0x91   :  { %v956_v40 = vsel %vm924_vm3, %v134_v36, -1e+30  ;;  %v98_v41 = vpop.f32.mrf.mxu1 }
  0x92   :  { %249 = vmax.xlane.f32.xlu1 %v248_v38  ;;  %v254_v43 = vsel %vm36_vm0, %v956_v40, -inf }
  0x95   :  { %v117_v42 = vpop.f32.mrf.mxu2 }
  0x97   :  { %v153_v45 = vpop.f32.mrf.mxu0 }
  0x98   :  { %v136_v44 = vpop.f32.mrf.mxu3  ;;  %255 = vmax.xlane.f32.xlu0 %v254_v43  ;;  %v962_v46 = vsel %vm924_vm3, %v153_v45, -1e+30 }
  0x99   :  { %v172_v47 = vpop.f32.mrf.mxu1  ;;  %v257_v51 = vsel %vm36_vm0, %v962_v46, -inf }
  0x9a   :  { %v966_v48 = vsel %vm924_vm3, %v172_v47, -1e+30 }
  0x9b   :  { %v260_v49 = vsel %vm36_vm0, %v966_v48, -inf }
  0x9c   :  { %261 = vmax.xlane.f32.xlu1 %v260_v49 }
  0x9d   :  { %v191_v50 = vpop.f32.mrf.mxu2 }
  0x9e   :  { %v974_v52 = vsel %vm924_vm3, %v191_v50, -1e+30 }
  0x9f   :  { %v263_v54 = vsel %vm36_vm0, %v974_v52, -inf  ;;  %v155_v55 = vpop.f32.mrf.mxu0 }
  0xa0   :  { %v210_v53 = vpop.f32.mrf.mxu3  ;;  %264 = vmax.xlane.f32.xlu2 %v263_v54  ;;  %258 = vmax.xlane.f32.xlu0 %v257_v51  ;;  %v488_v51 = vld [vmem:[%s1167_s2 + $0x8] sm:$0xf]  ;;  %v487_v54 = vld [vmem:[%s1167_s2 + $0x4] sm:$0xf] }
  0xa1   :  { %v980_v56 = vsel %vm924_vm3, %v210_v53, -1e+30  ;;  %v174_v57 = vpop.f32.mrf.mxu1  ;;  %v537_v53 = vsel %vm497_vm5, %v488_v51, 0  ;;  %v518_v55 = vsel %vm497_vm5, %v487_v54, 0 }
  0xa2   :  { %v266_v59 = vsel %vm36_vm0, %v980_v56, -inf  ;;  %546 = vmatpush.bf16.msra.mxu2 %v537_v53  ;;  %527 = vmatpush.bf16.msra.mxu1 %v518_v55  ;;  %v492_v57 = vld [vmem:[%s1167_s2 + $0x18] sm:$0xf] }
  0xa5   :  { %v193_v58 = vpop.f32.mrf.mxu2 }
  0xa6   :  { %v613_v58 = vsel %vm497_vm5, %v492_v57, 0 }
  0xa7   :  { %622 = vmatpush.bf16.msrb.mxu2 %v613_v58 }
  0xa8   :  { %v212_v60 = vpop.f32.mrf.mxu3  ;;  %267 = vmax.xlane.f32.xlu2 %v266_v59  ;;  %v486_v59 = vld [vmem:[%s1167_s2] sm:$0xf] }
  0xa9   :  { %v499_v60 = vsel %vm497_vm5, %v486_v59, 0 }
  0xaa   :  { %508 = vmatpush.bf16.msra.mxu0 %v499_v60 }
  0xfd   :  { %v247_v0 = vpop.xlane.xlu1 %246 }
  0xfe   :  { %v269_v1 = vmax.f32 %v237_v63, %v247_v0 }
 0x100   :  { %663 = vst.msk [vmem:[#allocation2] sm:$0xff] %vm19_vm4, %v269_v1  ;;  %303 = vperm.xlu1 %788, %v269_v1   ;;  %v277_v34 = vsub.f32 %v237_v63, %v269_v1 }
 0x102   :  { %v285_v38 = vmul.f32 1.442695, %v277_v34 }
 0x103   :  { %v253_v3 = vpop.xlane.xlu0 %252 }
 0x104   :  { %v271_v5 = vmax.f32 %v239_v2, %v253_v3 }
 0x105   :  { %v250_v6 = vpop.xlane.xlu1 %249 }
 0x106   :  { %665 = vst.msk [vmem:[#allocation2 + $0x10] sm:$0xff] %vm19_vm4, %v271_v5  ;;  %313 = vperm.xlu2 %786, %v271_v5   ;;  %v270_v7 = vmax.f32 %v238_v4, %v250_v6  ;;  %v279_v8 = vsub.f32 %v239_v2, %v271_v5  ;;  %v489_v2 = vld [vmem:[%s1167_s2 + $0xc] sm:$0xf] }
 0x107   :  { %v556_v5 = vsel %vm497_vm5, %v489_v2, 0 }
 0x108   :  { %664 = vst.msk [vmem:[#allocation2 + $0x8] sm:$0xff] %vm19_vm4, %v270_v7  ;;  %v289_v10 = vmul.f32 1.442695, %v279_v8  ;;  %v278_v24 = vsub.f32 %v238_v4, %v270_v7  ;;  %565 = vmatpush.bf16.msra.mxu3 %v556_v5  ;;  %v367_v5 = vld [vmem:[#allocation3 + $0x10] sm:$0xff] }
 0x10a   :  { %789 = vpow2.f32 %v289_v10  ;;  %v287_v27 = vmul.f32 1.442695, %v278_v24 }
 0x10b   :  { %v256_v11 = vpop.xlane.xlu0 %255 }
 0x10c   :  { %v272_v12 = vmax.f32 %v240_v9, %v256_v11 }
 0x10e   :  { %666 = vst.msk [vmem:[#allocation2 + $0x18] sm:$0xff] %vm19_vm4, %v272_v12  ;;  %308 = vperm.xlu2 %786, %v270_v7   ;;  %318 = vperm.xlu0 %787, %v272_v12   ;;  %v280_v41 = vsub.f32 %v240_v9, %v272_v12 }
 0x10f   :  { %v262_v14 = vpop.xlane.xlu1 %261 }
 0x110   :  { %v274_v17 = vmax.f32 %v242_v13, %v262_v14  ;;  %v1005_v22 = vpop.eup %789  ;;  %v291_v43 = vmul.f32 1.442695, %v280_v41 }
 0x112   :  { %668 = vst.msk [vmem:[#allocation2 + $0x28] sm:$0xff] %vm19_vm4, %v274_v17  ;;  %v282_v31 = vsub.f32 %v242_v13, %v274_v17 }
 0x113   :  { %v265_v18 = vpop.xlane.xlu2 %264  ;;  %v259_v19 = vpop.xlane.xlu0 %258 }
 0x114   :  { %v275_v20 = vmax.f32 %v243_v15, %v265_v18  ;;  %v273_v21 = vmax.f32 %v241_v16, %v259_v19  ;;  %v295_v37 = vmul.f32 1.442695, %v282_v31 }
 0x116   :  { %669 = vst.msk [vmem:[#allocation2 + $0x30] sm:$0xff] %vm19_vm4, %v275_v20  ;;  %333 = vperm.xlu2 %786, %v275_v20   ;;  %442 = vperm.xlu0 %787, %v1005_v22   ;;  %v281_v23 = vsub.f32 %v241_v16, %v273_v21  ;;  %v283_v45 = vsub.f32 %v243_v15, %v275_v20 }
 0x117   :  { %667 = vst.msk [vmem:[#allocation2 + $0x20] sm:$0xff] %vm19_vm4, %v273_v21 }
 0x118   :  { %v293_v25 = vmul.f32 1.442695, %v281_v23  ;;  %v297_v47 = vmul.f32 1.442695, %v283_v45 }
 0x11a   :  { %791 = vpow2.f32 %v293_v25 }
 0x11b   :  { %v268_v28 = vpop.xlane.xlu2 %267  ;;  %793 = vpow2.f32 %v287_v27 }
 0x11c   :  { %v1013_v30 = vmax.f32 %v1010_v26, %v268_v28  ;;  %795 = vpow2.f32 %v295_v37  ;;  %v491_v28 = vld [vmem:[%s1167_s2 + $0x14] sm:$0xf] }
 0x11d   :  { %797 = vpow2.f32 %v285_v38  ;;  %v594_v37 = vsel %vm497_vm5, %v491_v28, 0 }
 0x11e   :  { %v284_v32 = vsub.f32 %v1010_v26, %v1013_v30  ;;  %670 = vst.msk [vmem:[#allocation2 + $0x38] sm:$0xff] %vm19_vm4, %v1013_v30  ;;  %338 = vperm.xlu1 %788, %v1013_v30   ;;  %323 = vperm.xlu2 %786, %v273_v21   ;;  %799 = vpow2.f32 %v291_v43 }
 0x11f   :  { %801 = vpow2.f32 %v297_v47  ;;  %603 = vmatpush.bf16.msrb.mxu1 %v594_v37  ;;  %v368_v37 = vld [vmem:[#allocation3 + $0x18] sm:$0xff] }
 0x120   :  { %v1020_v36 = vpop.eup %791 }
 0x121   :  { %452 = vperm.xlu0 %787, %v1020_v36   ;;  %v1023_v39 = vpop.eup %793 }
 0x122   :  { %v1026_v42 = vpop.eup %795 }
 0x123   :  { %v1028_v44 = vpop.eup %797 }
 0x124   :  { %v1032_v49 = vpop.eup %799 }
 0x125   :  { %v1035_v50 = vpop.eup %801 }
 0x126   :  { %328 = vperm.xlu1 %788, %v274_v17   ;;  %437 = vperm.xlu2 %786, %v1023_v39  }
 0x12e   :  { %432 = vperm.xlu1 %788, %v1028_v44   ;;  %457 = vperm.xlu2 %786, %v1026_v42  }
 0x136   :  { %447 = vperm.xlu1 %788, %v1032_v49  }
 0x13e   :  { %462 = vperm.xlu1 %788, %v1035_v50  }
 0x160   :  { %v314_v61 = vpop.permute.xlu2 %313 }
 0x161   :  { %v343_v62 = vsub.f32 %v945_v35, %v314_v61  ;;  %v490_v35 = vld [vmem:[%s1167_s2 + $0x10] sm:$0xf] }
 0x163   :  { %v353_v63 = vmul.f32 1.442695, %v343_v62 }
 0x165   :  { %803 = vpow2.f32 %v353_v63 }
 0x168   :  { %v309_v0 = vpop.permute.xlu2 %308 }
 0x169   :  { %v342_v1 = vsub.f32 %v939_v33, %v309_v0  ;;  %v575_v33 = vsel %vm497_vm5, %v490_v35, 0  ;;  %v299_v0 = vmul.f32 1.442695, %v284_v32  ;;  %v366_v32 = vld [vmem:[#allocation3 + $0x8] sm:$0xff] }
 0x16a   :  { %584 = vmatpush.bf16.msrb.mxu0 %v575_v33  ;;  %v374_v33 = vmul.f32 %v1023_v39, %v366_v32 }
 0x16b   :  { %v804_v3 = vpop.eup %803  ;;  %v351_v4 = vmul.f32 1.442695, %v342_v1 }
 0x16c   :  { %v480_v6 = vpack.c.bf16 %v804_v3, %v804_v3  ;;  %v387_v7 = vsel %vm36_vm0, %v804_v3, 0.0 }
 0x16d   :  { %805 = vpow2.f32 %v351_v4  ;;  %388 = vadd.xlane.f32.xlu1 %v387_v7 }
 0x16e   :  { %777 = vmatmul.msk.bf16.vlgmr.msra.gmra.mxu2 %vm36_vm0, %v480_v6  ;;  %v375_v6 = vmul.f32 %v1005_v22, %v367_v5  ;;  %v365_v22 = vld [vmem:[#allocation3] sm:$0xff] }
 0x170   :  { %v334_v8 = vpop.permute.xlu2 %333 }
 0x171   :  { %v347_v9 = vsub.f32 %v974_v52, %v334_v8  ;;  %v493_v52 = vld [vmem:[%s1167_s2 + $0x1c] sm:$0xf] }
 0x172   :  { %v304_v10 = vpop.permute.xlu1 %303 }
 0x173   :  { %v806_v11 = vpop.eup %805  ;;  %v361_v12 = vmul.f32 1.442695, %v347_v9  ;;  %v341_v13 = vsub.f32 %v930_v29, %v304_v10  ;;  %v632_v29 = vsel %vm497_vm5, %v493_v52, 0 }
 0x174   :  { %v479_v14 = vpack.c.bf16 %v806_v11, %v806_v11  ;;  %v384_v15 = vsel %vm36_vm0, %v806_v11, 0.0  ;;  %641 = vmatpush.bf16.msrb.mxu3 %v632_v29 }
 0x175   :  { %807 = vpow2.f32 %v361_v12  ;;  %v349_v16 = vmul.f32 1.442695, %v341_v13  ;;  %385 = vadd.xlane.f32.xlu2 %v384_v15  ;;  %v424_v12 = vld [vmem:[#allocation4 + $0x10] sm:$0xff]  ;;  %v423_v13 = vld [vmem:[#allocation4 + $0x8] sm:$0xff] }
 0x176   :  { %776 = vmatmul.msk.bf16.vlgmr.msra.gmra.mxu1 %vm36_vm0, %v479_v14 }
 0x177   :  { %809 = vpow2.f32 %v349_v16 }
 0x178   :  { %v324_v17 = vpop.permute.xlu2 %323 }
 0x179   :  { %v345_v18 = vsub.f32 %v962_v46, %v324_v17  ;;  %v373_v17 = vmul.f32 %v1028_v44, %v365_v22 }
 0x17b   :  { %v808_v19 = vpop.eup %807  ;;  %v357_v20 = vmul.f32 1.442695, %v345_v18 }
 0x17c   :  { %v484_v21 = vpack.c.bf16 %v808_v19, %v808_v19  ;;  %v399_v54 = vsel %vm36_vm0, %v808_v19, 0.0 }
 0x17d   :  { %v810_v23 = vpop.eup %809  ;;  %811 = vpow2.f32 %v357_v20 }
 0x17e   :  { %v478_v24 = vpack.c.bf16 %v810_v23, %v810_v23  ;;  %781 = vmatmul.msk.bf16.vlgmr.msrb.gmra.mxu2 %vm36_vm0, %v484_v21  ;;  %v381_v25 = vsel %vm36_vm0, %v810_v23, 0.0  ;;  %v369_v23 = vld [vmem:[#allocation3 + $0x20] sm:$0xff] }
 0x17f   :  { %382 = vadd.xlane.f32.xlu0 %v381_v25  ;;  %v422_v25 = vld [vmem:[#allocation4] sm:$0xff]  ;;  %v377_v44 = vmul.f32 %v1020_v36, %v369_v23 }
 0x180   :  { %775 = vmatmul.msk.bf16.vlgmr.msra.gmra.mxu0 %vm36_vm0, %v478_v24  ;;  %v319_v46 = vpop.permute.xlu0 %318  ;;  %v438_v3 = vpop.permute.xlu2 %437 }
 0x181   :  { %v344_v27 = vsub.f32 %v956_v40, %v319_v46  ;;  %v471_v18 = vmul.f32 %v438_v3, %v423_v13  ;;  %v372_v3 = vld [vmem:[#allocation3 + $0x38] sm:$0xff] }
 0x183   :  { %v812_v31 = vpop.eup %811  ;;  %v355_v34 = vmul.f32 1.442695, %v344_v27 }
 0x184   :  { %v393_v38 = vsel %vm36_vm0, %v812_v31, 0.0  ;;  %v482_v47 = vpack.c.bf16 %v812_v31, %v812_v31 }
 0x185   :  { %813 = vpow2.f32 %v355_v34 }
 0x187   :  { %394 = vadd.xlane.f32.xlu0 %v393_v38 }
 0x188   :  { %v1103_v7 = vpop.permute.xlu2 %457  ;;  %v443_v30 = vpop.permute.xlu0 %442 }
 0x189   :  { %v472_v14 = vmul.f32 %v443_v30, %v424_v12 }
 0x18b   :  { %v814_v41 = vpop.eup %813 }
 0x18c   :  { %v481_v43 = vpack.c.bf16 %v814_v41, %v814_v41  ;;  %v390_v45 = vsel %vm36_vm0, %v814_v41, 0.0  ;;  %v428_v41 = vld [vmem:[#allocation4 + $0x30] sm:$0xff] }
 0x18d   :  { %391 = vadd.xlane.f32.xlu2 %v390_v45 }
 0x18e   :  { %778 = vmatmul.msk.bf16.vlgmr.msra.gmra.mxu3 %vm36_vm0, %v481_v43 }
 0x190   :  { %v339_v40 = vpop.permute.xlu1 %338  ;;  %779 = vmatmul.msk.bf16.vlgmr.msrb.gmra.mxu0 %vm36_vm0, %v482_v47  ;;  %v376_v47 = vmul.f32 %v1032_v49, %v368_v37 }
 0x191   :  { %v348_v51 = vsub.f32 %v980_v56, %v339_v40 }
 0x193   :  { %v363_v53 = vmul.f32 1.442695, %v348_v51  ;;  %v1107_v10 = vpop.permute.xlu0 %452 }
 0x195   :  { %815 = vpow2.f32 %v363_v53  ;;  %400 = vadd.xlane.f32.xlu2 %v399_v54 }
 0x198   :  { %v329_v55 = vpop.permute.xlu1 %328 }
 0x199   :  { %v346_v57 = vsub.f32 %v966_v48, %v329_v55 }
 0x19b   :  { %v816_v58 = vpop.eup %815  ;;  %v359_v59 = vmul.f32 1.442695, %v346_v57  ;;  %v371_v57 = vld [vmem:[#allocation3 + $0x30] sm:$0xff] }
 0x19c   :  { %v485_v60 = vpack.c.bf16 %v816_v58, %v816_v58  ;;  %v402_v61 = vsel %vm36_vm0, %v816_v58, 0.0 }
 0x19d   :  { %817 = vpow2.f32 %v359_v59  ;;  %403 = vadd.xlane.f32.xlu0 %v402_v61  ;;  %v426_v61 = vld [vmem:[#allocation4 + $0x20] sm:$0xff] }
 0x19e   :  { %782 = vmatmul.msk.bf16.vlgmr.msrb.gmra.mxu3 %vm36_vm0, %v485_v60  ;;  %819 = vpow2.f32 %v299_v0  ;;  %v379_v60 = vmul.f32 %v1035_v50, %v371_v57 }
 0x1a0   :  { %v433_v1 = vpop.permute.xlu1 %432 }
 0x1a1   :  { %v470_v34 = vmul.f32 %v433_v1, %v422_v25  ;;  %v474_v1 = vmul.f32 %v1107_v10, %v426_v61  ;;  %v370_v10 = vld [vmem:[#allocation3 + $0x28] sm:$0xff] }
 0x1a3   :  { %v818_v62 = vpop.eup %817 }
 0x1a4   :  { %v483_v63 = vpack.c.bf16 %v818_v62, %v818_v62  ;;  %v396_v56 = vsel %vm36_vm0, %v818_v62, 0.0  ;;  %v1097_v48 = vpop.eup %819 }
 0x1a5   :  { %397 = vadd.xlane.f32.xlu1 %v396_v56 }
 0x1a6   :  { %780 = vmatmul.msk.bf16.vlgmr.msrb.gmra.mxu1 %vm36_vm0, %v483_v63 }
 0x1a8   :  { %v1100_v2 = vpop.permute.xlu1 %447 }
 0x1b0   :  { %v463_v4 = vpop.permute.xlu1 %462 }
 0x1b1   :  { %467 = vperm.xlu0 %787, %v1097_v48   ;;  %v476_v40 = vmul.f32 %v463_v4, %v428_v41  ;;  %v425_v4 = vld [vmem:[#allocation4 + $0x18] sm:$0xff] }
 0x1b2   :  { %v473_v50 = vmul.f32 %v1100_v2, %v425_v4 }
 0x1e0   :  { %v389_v35 = vpop.xlane.xlu1 %388 }
 0x1e1   :  { %v407_v26 = vadd.f32 %v389_v35, %v375_v6  ;;  %v380_v35 = vmul.f32 %v1097_v48, %v372_v3  ;;  %v378_v48 = vmul.f32 %v1026_v42, %v370_v10 }
 0x1e3   :  { %416 = vst.msk [vmem:[#allocation3 + $0x10] sm:$0xff] %vm19_vm4, %v407_v26 }
 0x1e8   :  { %v386_v8 = vpop.xlane.xlu2 %385 }
 0x1e9   :  { %v406_v9 = vadd.f32 %v386_v8, %v374_v33 }
 0x1ea   :  { %v684_v11 = vld [vmem:[#allocation3 + $0x10] sm:$0xff] }
 0x1eb   :  { %415 = vst.msk [vmem:[#allocation3 + $0x8] sm:$0xff] %vm19_vm4, %v406_v9  ;;  %821 = vrcp.f32 %v684_v11 }
 0x1f1   :  { %v822_v15 = vpop.eup %821  ;;  %v548_v16 = vpop.f32.mrf.mxu2 }
 0x1f2   :  { %v649_v52 = vadd.f32 %v548_v16, %v472_v14  ;;  %710 = vperm.xlu0 %787, %v822_v15   ;;  %v383_v39 = vpop.xlane.xlu0 %382  ;;  %v683_v19 = vld [vmem:[#allocation3 + $0x8] sm:$0xff] }
 0x1f3   :  { %v405_v20 = vadd.f32 %v383_v39, %v373_v17  ;;  %v529_v29 = vpop.f32.mrf.mxu1  ;;  %823 = vrcp.f32 %v683_v19  ;;  %v427_v15 = vld [vmem:[#allocation4 + $0x28] sm:$0xff] }
 0x1f4   :  { %657 = vst.msk [vmem:[#allocation4 + $0x10] sm:$0xff] %vm36_vm0, %v649_v52  ;;  %v648_v21 = vadd.f32 %v529_v29, %v471_v18  ;;  %v429_v18 = vld [vmem:[#allocation4 + $0x38] sm:$0xff]  ;;  %v475_v52 = vmul.f32 %v1103_v7, %v427_v15 }
 0x1f5   :  { %414 = vst.msk [vmem:[#allocation3] sm:$0xff] %vm19_vm4, %v405_v20 }
 0x1f6   :  { %656 = vst.msk [vmem:[#allocation4 + $0x8] sm:$0xff] %vm36_vm0, %v648_v21 }
 0x1f9   :  { %v824_v24 = vpop.eup %823  ;;  %v550_v46 = vpop.f32.mrf.mxu2 }
 0x1fa   :  { %705 = vperm.xlu1 %788, %v824_v24   ;;  %v395_v27 = vpop.xlane.xlu0 %394 }
 0x1fb   :  { %v409_v28 = vadd.f32 %v395_v27, %v377_v44  ;;  %v531_v31 = vpop.f32.mrf.mxu1 }
 0x1fc   :  { %v682_v38 = vld [vmem:[#allocation3] sm:$0xff] }
 0x1fd   :  { %418 = vst.msk [vmem:[#allocation3 + $0x20] sm:$0xff] %vm19_vm4, %v409_v28  ;;  %v510_v43 = vpop.f32.mrf.mxu0  ;;  %825 = vrcp.f32 %v682_v38  ;;  %v676_v28 = vld [vmem:[#allocation4 + $0x10] sm:$0xff]  ;;  %v675_v38 = vld [vmem:[#allocation4 + $0x8] sm:$0xff] }
 0x1fe   :  { %v647_v45 = vadd.f32 %v510_v43, %v470_v34 }
 0x200   :  { %655 = vst.msk [vmem:[#allocation4] sm:$0xff] %vm36_vm0, %v647_v45  ;;  %v392_v51 = vpop.xlane.xlu2 %391 }
 0x201   :  { %v408_v36 = vadd.f32 %v392_v51, %v376_v47  ;;  %v624_v53 = vpop.f32.mrf.mxu2 }
 0x202   :  { %v653_v54 = vadd.f32 %v624_v53, %v476_v40 }
 0x203   :  { %v826_v55 = vpop.eup %825  ;;  %417 = vst.msk [vmem:[#allocation3 + $0x18] sm:$0xff] %vm19_vm4, %v408_v36 }
 0x204   :  { %661 = vst.msk [vmem:[#allocation4 + $0x30] sm:$0xff] %vm36_vm0, %v653_v54  ;;  %700 = vperm.xlu2 %786, %v826_v55   ;;  %v686_v58 = vld [vmem:[#allocation3 + $0x20] sm:$0xff] }
 0x205   :  { %v512_v59 = vpop.f32.mrf.mxu0  ;;  %827 = vrcp.f32 %v686_v58 }
 0x207   :  { %v674_v44 = vld [vmem:[#allocation4] sm:$0xff] }
 0x208   :  { %v401_v49 = vpop.xlane.xlu2 %400 }
 0x209   :  { %v411_v62 = vadd.f32 %v401_v49, %v379_v60  ;;  %v626_v63 = vpop.f32.mrf.mxu2 }
 0x20a   :  { %v685_v56 = vld [vmem:[#allocation3 + $0x18] sm:$0xff] }
 0x20b   :  { %v828_v0 = vpop.eup %827  ;;  %420 = vst.msk [vmem:[#allocation3 + $0x30] sm:$0xff] %vm19_vm4, %v411_v62  ;;  %829 = vrcp.f32 %v685_v56  ;;  %v680_v53 = vld [vmem:[#allocation4 + $0x30] sm:$0xff] }
 0x20c   :  { %720 = vperm.xlu1 %788, %v828_v0  }
 0x20d   :  { %v586_v5 = vpop.f32.mrf.mxu0 }
 0x20e   :  { %v651_v6 = vadd.f32 %v586_v5, %v474_v1 }
 0x210   :  { %659 = vst.msk [vmem:[#allocation4 + $0x20] sm:$0xff] %vm36_vm0, %v651_v6  ;;  %v404_v26 = vpop.xlane.xlu0 %403 }
 0x211   :  { %v830_v30 = vpop.eup %829  ;;  %v412_v32 = vadd.f32 %v404_v26, %v380_v35  ;;  %v567_v33 = vpop.f32.mrf.mxu3 }
 0x212   :  { %v650_v8 = vadd.f32 %v567_v33, %v473_v50  ;;  %715 = vperm.xlu2 %786, %v830_v30   ;;  %v688_v9 = vld [vmem:[#allocation3 + $0x30] sm:$0xff] }
 0x213   :  { %421 = vst.msk [vmem:[#allocation3 + $0x38] sm:$0xff] %vm19_vm4, %v412_v32  ;;  %831 = vrcp.f32 %v688_v9 }
 0x214   :  { %658 = vst.msk [vmem:[#allocation4 + $0x18] sm:$0xff] %vm36_vm0, %v650_v8 }
 0x215   :  { %v588_v11 = vpop.f32.mrf.mxu0 }
 0x217   :  { %v678_v59 = vld [vmem:[#allocation4 + $0x20] sm:$0xff] }
 0x218   :  { %v398_v12 = vpop.xlane.xlu1 %397 }
 0x219   :  { %v832_v2 = vpop.eup %831  ;;  %v410_v22 = vadd.f32 %v398_v12, %v378_v48  ;;  %v569_v13 = vpop.f32.mrf.mxu3 }
 0x21a   :  { %730 = vperm.xlu2 %786, %v832_v2   ;;  %v689_v14 = vld [vmem:[#allocation3 + $0x38] sm:$0xff] }
 0x21b   :  { %419 = vst.msk [vmem:[#allocation3 + $0x28] sm:$0xff] %vm19_vm4, %v410_v22  ;;  %833 = vrcp.f32 %v689_v14  ;;  %v677_v43 = vld [vmem:[#allocation4 + $0x18] sm:$0xff] }
 0x221   :  { %v834_v16 = vpop.eup %833  ;;  %v643_v17 = vpop.f32.mrf.mxu3 }
 0x222   :  { %735 = vperm.xlu1 %788, %v834_v16   ;;  %v687_v39 = vld [vmem:[#allocation3 + $0x28] sm:$0xff] }
 0x223   :  { %v605_v19 = vpop.f32.mrf.mxu1  ;;  %v468_v20 = vpop.permute.xlu0 %467  ;;  %835 = vrcp.f32 %v687_v39 }
 0x224   :  { %v652_v42 = vadd.f32 %v605_v19, %v475_v52  ;;  %v477_v29 = vmul.f32 %v468_v20, %v429_v18 }
 0x226   :  { %660 = vst.msk [vmem:[#allocation4 + $0x28] sm:$0xff] %vm36_vm0, %v652_v42  ;;  %v654_v21 = vadd.f32 %v643_v17, %v477_v29 }
 0x228   :  { %662 = vst.msk [vmem:[#allocation4 + $0x38] sm:$0xff] %vm36_vm0, %v654_v21 }
 0x229   :  { %v836_v23 = vpop.eup %835  ;;  %v645_v24 = vpop.f32.mrf.mxu3 }
 0x22a   :  { %725 = vperm.xlu0 %787, %v836_v23  }
 0x22b   :  { %v607_v25 = vpop.f32.mrf.mxu1 }
 0x22d   :  { %v679_v0 = vld [vmem:[#allocation4 + $0x28] sm:$0xff] }
 0x22f   :  { %v681_v62 = vld [vmem:[#allocation4 + $0x38] sm:$0xff] }
 0x25e   :  { %v701_v46 = vpop.permute.xlu2 %700 }
 0x25f   :  { %v738_v27 = vmul.f32 %v701_v46, %v674_v44 }
 0x261   :  { %v746_v7 = vpack.c.bf16 %v738_v27, %v738_v27 }
 0x263   :  { %755 = vst.msk [vmem:[%s1168_s3] sm:$0xf] %vm754_vm6, %v746_v7 }
 0x264   :  { %v711_v31 = vpop.permute.xlu0 %710 }
 0x265   :  { %v740_v34 = vmul.f32 %v711_v31, %v676_v28 }
 0x267   :  { %v748_v37 = vpack.c.bf16 %v740_v34, %v740_v34 }
 0x269   :  { %757 = vst.msk [vmem:[%s1168_s3 + $0x8] sm:$0xf] %vm754_vm6, %v748_v37 }
 0x26c   :  { %v706_v41 = vpop.permute.xlu1 %705  ;;  %v716_v45 = vpop.permute.xlu2 %715 }
 0x26d   :  { %v739_v47 = vmul.f32 %v706_v41, %v675_v38  ;;  %v741_v40 = vmul.f32 %v716_v45, %v677_v43 }
 0x26f   :  { %v747_v51 = vpack.c.bf16 %v739_v47, %v739_v47  ;;  %v749_v36 = vpack.c.bf16 %v741_v40, %v741_v40 }
 0x271   :  { %756 = vst.msk [vmem:[%s1168_s3 + $0x4] sm:$0xf] %vm754_vm6, %v747_v51 }
 0x272   :  { %758 = vst.msk [vmem:[%s1168_s3 + $0xc] sm:$0xf] %vm754_vm6, %v749_v36 }
 0x274   :  { %v731_v54 = vpop.permute.xlu2 %730 }
 0x275   :  { %v744_v55 = vmul.f32 %v731_v54, %v680_v53 }
 0x277   :  { %v752_v57 = vpack.c.bf16 %v744_v55, %v744_v55 }
 0x279   :  { %761 = vst.msk [vmem:[%s1168_s3 + $0x18] sm:$0xf] %vm754_vm6, %v752_v57 }
 0x27e   :  { %v721_v58 = vpop.permute.xlu1 %720 }
 0x27f   :  { %v742_v60 = vmul.f32 %v721_v58, %v678_v59 }
 0x281   :  { %v750_v49 = vpack.c.bf16 %v742_v60, %v742_v60 }
 0x283   :  { %759 = vst.msk [vmem:[%s1168_s3 + $0x10] sm:$0xf] %vm754_vm6, %v750_v49 }
 0x294   :  { %v736_v61 = vpop.permute.xlu1 %735 }
 0x295   :  { %v745_v63 = vmul.f32 %v736_v61, %v681_v62 }
 0x297   :  { %v753_v56 = vpack.c.bf16 %v745_v63, %v745_v63 }
 0x299   :  { %762 = vst.msk [vmem:[%s1168_s3 + $0x1c] sm:$0xf] %vm754_vm6, %v753_v56 }
 0x29c   :  { %v726_v1 = vpop.permute.xlu0 %725 }
 0x29d   :  { %v743_v3 = vmul.f32 %v726_v1, %v679_v0 }
 0x29f   :  { %v751_v4 = vpack.c.bf16 %v743_v3, %v743_v3 }
 0x2a1   :  { %760 = vst.msk [vmem:[%s1168_s3 + $0x14] sm:$0xf] %vm754_vm6, %v751_v4 }

// kernel: _lambda_.33
= control target key start
LH: loop header
LB: loop body
LE: loop exit
PB: predicated region body
PF: predicated region fallthrough
CT: control target
= control target key end

     0   :  { %vm23_vm0 = vcmask 261120   ;;  %v186_v1 = vmov 0.0   ;;  %vm61_vm1 = vcmask 1043456   ;;  %vm54_vm2 = vcmask 195584   ;;  %s246_s1 = inlined_call_operand.vmem [shape: bf16[24,32], index: 1, kind: input, shape index: {}]   ;;  %s247_s2 = inlined_call_operand.vmem [shape: f32[1,32], index: 2, kind: input, shape index: {}]   ;;  %s248_s0 = inlined_call_operand.vmem [shape: bf16[32,24], index: 0, kind: input, shape index: {}]   ;;  %s249_s3 = inlined_call_operand.vmem [shape: bf16[32,32], index: 3, kind: output, shape index: {}]  }
   0x1   :  { %v34_v0 = vld [vmem:[%s246_s1 + $0x8] sm:$0xf]  ;;  %24 = vst.msk [vmem:[#allocation2] sm:$0xff] %vm23_vm0, %v186_v1  ;;  %v173_v5 = vld [vmem:[%s246_s1] sm:$0xff]  ;;  %vm148_vm3 = vcmask 257024  }
   0x2   :  { %v50_v2 = vunpack.c.l.b16 %v34_v0  ;;  %25 = vst.msk [vmem:[#allocation2 + $0x8] sm:$0xff] %vm23_vm0, %v186_v1  ;;  %v171_v6 = vld [vmem:[%s248_s0] sm:$0xff]  ;;  %v172_v7 = vld [vmem:[%s248_s0 + $0x8] sm:$0xff] }
   0x3   :  { %26 = vst.msk [vmem:[#allocation2 + $0x10] sm:$0xff] %vm23_vm0, %v186_v1  ;;  %v177_v16 = vld [vmem:[%s247_s2] ss:$0 sm:$0xff] }
   0x4   :  { %v52_v3 = vpack.c.b16 %v50_v2, %v50_v2  ;;  %27 = vst.msk [vmem:[#allocation2 + $0x18] sm:$0xff] %vm23_vm0, %v186_v1 }
   0x6   :  { %v63_v4 = vsel %vm61_vm1, %v52_v3, 0 }
   0x7   :  { %71 = vmatpush.bf16.msra.mxu0 %v63_v4  ;;  %174 = vmatpush.bf16.msra.mxu1 %v63_v4 }
   0x8   :  { %v28_v8 = vld [vmem:[#allocation2] sm:$0xff] }
   0x9   :  { %v29_v14 = vld [vmem:[#allocation2 + $0x8] sm:$0xff] }
   0xa   :  { %v30_v9 = vld [vmem:[#allocation2 + $0x10] sm:$0xff] }
   0xb   :  { %72 = vmatpush.bf16.msra.mxu0 %v173_v5  ;;  %175 = vmatpush.bf16.msra.mxu1 %v173_v5  ;;  %v31_v15 = vld [vmem:[#allocation2 + $0x18] sm:$0xff] }
   0xe   :  { %169 = vmatmul.msk.bf16.vlgmr.msra.gmra.mxu0 %vm54_vm2, %v171_v6  ;;  %170 = vmatmul.msk.bf16.vlgmr.msra.gmra.mxu1 %vm54_vm2, %v172_v7 }
  0x8b   :  { %v74_v10 = vpop.f32.mrf.mxu0  ;;  %v79_v11 = vpop.f32.mrf.mxu1 }
  0x8c   :  { %v84_v12 = vadd.f32 %v74_v10, %v28_v8  ;;  %v86_v13 = vadd.f32 %v79_v11, %v30_v9 }
  0x8e   :  { %89 = vst.msk [vmem:[#allocation2] sm:$0xff] %vm23_vm0, %v84_v12 }
  0x8f   :  { %91 = vst.msk [vmem:[#allocation2 + $0x10] sm:$0xff] %vm23_vm0, %v86_v13 }
  0x93   :  { %v76_v17 = vpop.f32.mrf.mxu0  ;;  %v81_v18 = vpop.f32.mrf.mxu1 }
  0x94   :  { %v85_v19 = vadd.f32 %v76_v17, %v29_v14  ;;  %v87_v20 = vadd.f32 %v81_v18, %v31_v15 }
  0x95   :  { %v96_v21 = vld [vmem:[#allocation2] sm:$0xff] }
  0x96   :  { %v104_v22 = vadd.f32 %v177_v16, %v96_v21  ;;  %v98_v23 = vld [vmem:[#allocation2 + $0x10] sm:$0xff]  ;;  %90 = vst.msk [vmem:[#allocation2 + $0x8] sm:$0xff] %vm23_vm0, %v85_v19 }
  0x97   :  { %v106_v24 = vadd.f32 %v177_v16, %v98_v23  ;;  %92 = vst.msk [vmem:[#allocation2 + $0x18] sm:$0xff] %vm23_vm0, %v87_v20 }
  0x98   :  { %v112_v25 = vmul.f32 0.044715, %v104_v22  ;;  %v108_v50 = vmul.f32 0.5, %v104_v22 }
  0x99   :  { %v114_v26 = vmul.f32 0.044715, %v106_v24  ;;  %v110_v53 = vmul.f32 0.5, %v106_v24 }
  0x9a   :  { %v116_v27 = vmul.f32 %v112_v25, %v104_v22 }
  0x9b   :  { %v118_v28 = vmul.f32 %v114_v26, %v106_v24 }
  0x9c   :  { %v120_v29 = vmul.f32 %v116_v27, %v104_v22 }
  0x9d   :  { %v122_v30 = vmul.f32 %v118_v28, %v106_v24  ;;  %v97_v31 = vld [vmem:[#allocation2 + $0x8] sm:$0xff] }
  0x9e   :  { %v124_v32 = vadd.f32 %v120_v29, %v104_v22  ;;  %v105_v33 = vadd.f32 %v177_v16, %v97_v31  ;;  %v99_v34 = vld [vmem:[#allocation2 + $0x18] sm:$0xff] }
  0x9f   :  { %v126_v35 = vadd.f32 %v122_v30, %v106_v24  ;;  %v107_v36 = vadd.f32 %v177_v16, %v99_v34 }
  0xa0   :  { %v128_v37 = vmul.f32 0.7978846, %v124_v32  ;;  %v113_v38 = vmul.f32 0.044715, %v105_v33  ;;  %v109_v61 = vmul.f32 0.5, %v105_v33 }
  0xa1   :  { %v130_v39 = vmul.f32 0.7978846, %v126_v35  ;;  %v115_v40 = vmul.f32 0.044715, %v107_v36  ;;  %v111_v63 = vmul.f32 0.5, %v107_v36 }
  0xa2   :  { %178 = vtanh.f32 %v128_v37  ;;  %v117_v41 = vmul.f32 %v113_v38, %v105_v33 }
  0xa3   :  { %180 = vtanh.f32 %v130_v39  ;;  %v119_v42 = vmul.f32 %v115_v40, %v107_v36 }
  0xa4   :  { %v121_v43 = vmul.f32 %v117_v41, %v105_v33 }
  0xa5   :  { %v123_v44 = vmul.f32 %v119_v42, %v107_v36 }
  0xa6   :  { %v125_v45 = vadd.f32 %v121_v43, %v105_v33 }
  0xa7   :  { %v127_v46 = vadd.f32 %v123_v44, %v107_v36 }
  0xa8   :  { %v179_v47 = vpop.eup %178  ;;  %v129_v48 = vmul.f32 0.7978846, %v125_v45 }
  0xa9   :  { %v181_v49 = vpop.eup %180  ;;  %v136_v51 = vadd.f32 1.0, %v179_v47  ;;  %v131_v52 = vmul.f32 0.7978846, %v127_v46 }
  0xaa   :  { %v138_v54 = vadd.f32 1.0, %v181_v49  ;;  %182 = vtanh.f32 %v129_v48 }
  0xab   :  { %v140_v55 = vmul.f32 %v136_v51, %v108_v50  ;;  %184 = vtanh.f32 %v131_v52 }
  0xac   :  { %v142_v56 = vmul.f32 %v138_v54, %v110_v53 }
  0xad   :  { %v144_v57 = vpack.c.bf16 %v140_v55, %v140_v55 }
  0xae   :  { %v146_v58 = vpack.c.bf16 %v142_v56, %v142_v56 }
  0xaf   :  { %149 = vst.msk [vmem:[%s249_s3] sm:$0xf] %vm148_vm3, %v144_v57 }
  0xb0   :  { %v183_v59 = vpop.eup %182  ;;  %151 = vst.msk [vmem:[%s249_s3 + $0x8] sm:$0xf] %vm148_vm3, %v146_v58 }
  0xb1   :  { %v185_v60 = vpop.eup %184  ;;  %v137_v62 = vadd.f32 1.0, %v183_v59 }
  0xb2   :  { %v139_v0 = vadd.f32 1.0, %v185_v60 }
  0xb3   :  { %v141_v1 = vmul.f32 %v137_v62, %v109_v61 }
  0xb4   :  { %v143_v2 = vmul.f32 %v139_v0, %v111_v63 }
  0xb5   :  { %v145_v3 = vpack.c.bf16 %v141_v1, %v141_v1 }
  0xb6   :  { %v147_v4 = vpack.c.bf16 %v143_v2, %v143_v2 }
  0xb7   :  { %150 = vst.msk [vmem:[%s249_s3 + $0x4] sm:$0xf] %vm148_vm3, %v145_v3 }
  0xb8   :  { %152 = vst.msk [vmem:[%s249_s3 + $0xc] sm:$0xf] %vm148_vm3, %v147_v4 }

// kernel: _lambda_.34
= control target key start
LH: loop header
LB: loop body
LE: loop exit
PB: predicated region body
PF: predicated region fallthrough
CT: control target
= control target key end

     0   :  { %vm21_vm0 = vcmask 261120   ;;  %v182_v1 = vmov 0.0   ;;  %vm79_vm1 = vcmask 785408   ;;  %vm133_vm2 = vcmask 257024   ;;  %s237_s1 = inlined_call_operand.vmem [shape: bf16[96,32], index: 1, kind: input, shape index: {}]   ;;  %s238_s2 = inlined_call_operand.vmem [shape: f32[1,32], index: 2, kind: input, shape index: {}]   ;;  %s239_s0 = inlined_call_operand.vmem [shape: bf16[16,96], index: 0, kind: input, shape index: {}]   ;;  %s240_s3 = inlined_call_operand.vmem [shape: bf16[16,32], index: 3, kind: output, shape index: {}]  }
   0x1   :  { %v175_v0 = vld [vmem:[%s237_s1 + $0x28] sm:$0xff]  ;;  %22 = vst.msk [vmem:[#allocation2] sm:$0xff] %vm21_vm0, %v182_v1  ;;  %v174_v2 = vld [vmem:[%s237_s1 + $0x20] sm:$0xff]  ;;  %v173_v3 = vld [vmem:[%s237_s1 + $0x18] sm:$0xff] }
   0x2   :  { %23 = vst.msk [vmem:[#allocation2 + $0x8] sm:$0xff] %vm21_vm0, %v182_v1  ;;  %85 = vmatpush.bf16.msra.mxu0 %v175_v0  ;;  %v172_v4 = vld [vmem:[%s237_s1 + $0x10] sm:$0xff]  ;;  %v171_v5 = vld [vmem:[%s237_s1 + $0x8] sm:$0xff]  ;;  %v170_v6 = vld [vmem:[%s237_s1] sm:$0xff] }
   0x3   :  { %v169_v7 = vld [vmem:[%s239_s0] sm:$0xff] }
   0x4   :  { %v177_v12 = vld [vmem:[%s238_s2] ss:$0 sm:$0xff] }
   0x6   :  { %86 = vmatpush.bf16.msra.mxu0 %v174_v2 }
   0x8   :  { %v24_v8 = vld [vmem:[#allocation2] sm:$0xff] }
   0x9   :  { %v25_v11 = vld [vmem:[#allocation2 + $0x8] sm:$0xff] }
   0xa   :  { %87 = vmatpush.bf16.msra.mxu0 %v173_v3 }
   0xe   :  { %88 = vmatpush.bf16.msra.mxu0 %v172_v4 }
  0x12   :  { %89 = vmatpush.bf16.msra.mxu0 %v171_v5 }
  0x16   :  { %90 = vmatpush.bf16.msra.mxu0 %v170_v6 }
  0x19   :  { %168 = vmatmul.msk.bf16.vlgmr.msra.gmra.mxu0 %vm79_vm1, %v169_v7 }
  0x96   :  { %v92_v9 = vpop.f32.mrf.mxu0 }
  0x97   :  { %v97_v10 = vadd.f32 %v92_v9, %v24_v8 }
  0x99   :  { %100 = vst.msk [vmem:[#allocation2] sm:$0xff] %vm21_vm0, %v97_v10 }
  0x9e   :  { %v94_v13 = vpop.f32.mrf.mxu0 }
  0x9f   :  { %v98_v14 = vadd.f32 %v94_v13, %v25_v11 }
  0xa0   :  { %v105_v15 = vld [vmem:[#allocation2] sm:$0xff] }
  0xa1   :  { %v111_v16 = vadd.f32 %v177_v12, %v105_v15  ;;  %101 = vst.msk [vmem:[#allocation2 + $0x8] sm:$0xff] %vm21_vm0, %v98_v14 }
  0xa3   :  { %v115_v17 = vmul.f32 0.044715, %v111_v16  ;;  %v113_v30 = vmul.f32 0.5, %v111_v16 }
  0xa5   :  { %v117_v18 = vmul.f32 %v115_v17, %v111_v16 }
  0xa7   :  { %v119_v19 = vmul.f32 %v117_v18, %v111_v16 }
  0xa8   :  { %v106_v20 = vld [vmem:[#allocation2 + $0x8] sm:$0xff] }
  0xa9   :  { %v121_v21 = vadd.f32 %v119_v19, %v111_v16  ;;  %v112_v22 = vadd.f32 %v177_v12, %v106_v20 }
  0xab   :  { %v123_v23 = vmul.f32 0.7978846, %v121_v21  ;;  %v116_v24 = vmul.f32 0.044715, %v112_v22  ;;  %v114_v35 = vmul.f32 0.5, %v112_v22 }
  0xad   :  { %178 = vtanh.f32 %v123_v23  ;;  %v118_v25 = vmul.f32 %v116_v24, %v112_v22 }
  0xaf   :  { %v120_v26 = vmul.f32 %v118_v25, %v112_v22 }
  0xb1   :  { %v122_v27 = vadd.f32 %v120_v26, %v112_v22 }
  0xb3   :  { %v179_v28 = vpop.eup %178  ;;  %v124_v29 = vmul.f32 0.7978846, %v122_v27 }
  0xb4   :  { %v127_v31 = vadd.f32 1.0, %v179_v28 }
  0xb5   :  { %180 = vtanh.f32 %v124_v29 }
  0xb6   :  { %v129_v32 = vmul.f32 %v127_v31, %v113_v30 }
  0xb8   :  { %v131_v33 = vpack.c.bf16 %v129_v32, %v129_v32 }
  0xba   :  { %134 = vst.msk [vmem:[%s240_s3] sm:$0xf] %vm133_vm2, %v131_v33 }
  0xbb   :  { %v181_v34 = vpop.eup %180 }
  0xbc   :  { %v128_v36 = vadd.f32 1.0, %v181_v34 }
  0xbe   :  { %v130_v37 = vmul.f32 %v128_v36, %v114_v35 }
  0xc0   :  { %v132_v38 = vpack.c.bf16 %v130_v37, %v130_v37 }
  0xc2   :  { %135 = vst.msk [vmem:[%s240_s3 + $0x4] sm:$0xf] %vm133_vm2, %v132_v38 }

// kernel: _lambda_.38
= control target key start
LH: loop header
LB: loop body
LE: loop exit
PB: predicated region body
PF: predicated region fallthrough
CT: control target
= control target key end

     0   :  { %vm31_vm0 = vcmask 261120   ;;  %v227_v5 = vmov 32.0   ;;  %vm105_vm2 = vcmask 523264   ;;  %v228_v34 = vmov 0.0   ;;  %s292_s0 = inlined_call_operand.vmem [shape: bf16[16,32], index: 0, kind: input, shape index: {}]   ;;  %s293_s1 = inlined_call_operand.vmem [shape: f32[1,32], index: 1, kind: input, shape index: {}]   ;;  %s294_s2 = inlined_call_operand.vmem [shape: f32[1,32], index: 2, kind: input, shape index: {}]   ;;  %s295_s4 = inlined_call_operand.vmem [shape: f32[1,64], index: 4, kind: input, shape index: {}]   ;;  %s296_s3 = inlined_call_operand.vmem [shape: bf16[32,64], index: 3, kind: input, shape index: {}]   ;;  %s297_s5 = inlined_call_operand.vmem [shape: bf16[16,64], index: 5, kind: output, shape index: {}]  }
   0x1   :  { %v209_v0 = vld [vmem:[%s292_s0] sm:$0xff]   ;;  %217 = vrcp.f32 %v227_v5  ;;  %v207_v25 = vld [vmem:[%s296_s3 + $0x8] sm:$0xff]  ;;  %106 = vst.msk [vmem:[#allocation2] sm:$0xff] %vm105_vm2, %v228_v34  ;;  %vm97_vm7 = vcmask 257024   ;;  %vm185_vm10 = vcmask 519168  }
   0x2   :  { %v210_v1 = vunpack.c.l.bf16 %v209_v0  ;;  %v211_v3 = vunpack.c.h.bf16 %v209_v0  ;;  %141 = vmatpush.bf16.msra.mxu0 %v207_v25  ;;  %v206_v28 = vld [vmem:[%s296_s3] sm:$0xff]  ;;  %107 = vst.msk [vmem:[#allocation2 + $0x8] sm:$0xff] %vm105_vm2, %v228_v34 }
   0x3   :  { %v214_v39 = vld [vmem:[%s293_s1] ss:$0 sm:$0xff] }
   0x4   :  { %v32_v2 = vsel %vm31_vm0, %v210_v1, 0.0  ;;  %v35_v4 = vsel %vm31_vm0, %v211_v3, 0.0  ;;  %v215_v42 = vld [vmem:[%s294_s2] ss:$0 sm:$0xff] }
   0x5   :  { %33 = vadd.xlane.f32.xlu0 %v32_v2  ;;  %v216_v60 = vld [vmem:[%s295_s4] ss:$0 sm:$0xff] }
   0x6   :  { %142 = vmatpush.bf16.msra.mxu0 %v206_v28 }
   0x7   :  { %v218_v6 = vpop.eup %217 }
   0x8   :  { %v39_v7 = vmul.f32 32.0, %v218_v6  ;;  %vm43_vm1 = vweird.f32 %v218_v6  ;;  %v108_v56 = vld [vmem:[#allocation2] sm:$0xff] }
   0x9   :  { %v109_v59 = vld [vmem:[#allocation2 + $0x8] sm:$0xff] }
   0xa   :  { %v40_v8 = vsub.f32 1.0, %v39_v7 }
   0xc   :  { %v41_v9 = vmul.f32 %v218_v6, %v40_v8 }
   0xd   :  { %36 = vadd.xlane.f32.xlu0 %v35_v4 }
   0xe   :  { %v42_v10 = vadd.f32 %v218_v6, %v41_v9 }
  0x10   :  { %v44_v11 = vsel %vm43_vm1, %v218_v6, %v42_v10 }
  0x78   :  { %v34_v12 = vpop.xlane.xlu0 %33 }
  0x79   :  { %v45_v13 = vmul.f32 %v44_v11, %v34_v12 }
  0x7b   :  { %v47_v14 = vsub.f32 %v210_v1, %v45_v13 }
  0x7d   :  { %v49_v15 = vmul.f32 %v47_v14, %v47_v14 }
  0x7f   :  { %v51_v16 = vsel %vm31_vm0, %v49_v15, 0.0 }
  0x80   :  { %52 = vadd.xlane.f32.xlu1 %v51_v16  ;;  %v37_v17 = vpop.xlane.xlu0 %36 }
  0x81   :  { %v46_v18 = vmul.f32 %v44_v11, %v37_v17 }
  0x83   :  { %v48_v19 = vsub.f32 %v211_v3, %v46_v18 }
  0x85   :  { %v50_v20 = vmul.f32 %v48_v19, %v48_v19 }
  0x87   :  { %v54_v21 = vsel %vm31_vm0, %v50_v20, 0.0 }
  0x88   :  { %55 = vadd.xlane.f32.xlu1 %v54_v21 }
  0xf3   :  { %v53_v22 = vpop.xlane.xlu1 %52 }
  0xf4   :  { %v57_v23 = vmul.f32 %v53_v22, %v44_v11 }
  0xf6   :  { %v59_v24 = vadd.f32 1e-05, %v57_v23 }
  0xf8   :  { %219 = vrsqrt.f32 %v59_v24  ;;  %vm67_vm4 = vweird.f32 %v59_v24 }
  0xfb   :  { %v56_v26 = vpop.xlane.xlu1 %55 }
  0xfc   :  { %v58_v27 = vmul.f32 %v56_v26, %v44_v11 }
  0xfe   :  { %v220_v29 = vpop.eup %219  ;;  %v60_v30 = vadd.f32 1e-05, %v58_v27 }
  0xff   :  { %v62_v31 = vmul.f32 %v220_v29, %v59_v24  ;;  %vm68_vm3 = vweird.f32 %v220_v29 }
 0x100   :  { %221 = vrsqrt.f32 %v60_v30  ;;  %vm69_vm5 = vmor %vm67_vm4, %vm68_vm3  ;;  %vm77_vm8 = vweird.f32 %v60_v30 }
 0x101   :  { %v63_v32 = vmul.f32 %v220_v29, %v62_v31 }
 0x103   :  { %v64_v33 = vmul.f32 0.5, %v63_v32 }
 0x105   :  { %v65_v35 = vsub.f32 1.5, %v64_v33 }
 0x106   :  { %v222_v36 = vpop.eup %221 }
 0x107   :  { %v66_v37 = vmul.f32 %v220_v29, %v65_v35  ;;  %v72_v38 = vmul.f32 %v222_v36, %v60_v30  ;;  %vm78_vm6 = vweird.f32 %v222_v36 }
 0x108   :  { %vm79_vm9 = vmor %vm77_vm8, %vm78_vm6 }
 0x109   :  { %v70_v40 = vsel %vm69_vm5, %v220_v29, %v66_v37  ;;  %v73_v41 = vmul.f32 %v222_v36, %v72_v38 }
 0x10a   :  { %v81_v43 = vmul.f32 %v70_v40, %v47_v14 }
 0x10b   :  { %v74_v44 = vmul.f32 0.5, %v73_v41 }
 0x10c   :  { %v87_v45 = vmul.f32 %v214_v39, %v81_v43 }
 0x10d   :  { %v75_v46 = vsub.f32 1.5, %v74_v44 }
 0x10e   :  { %v93_v47 = vadd.f32 %v215_v42, %v87_v45 }
 0x10f   :  { %v76_v48 = vmul.f32 %v222_v36, %v75_v46 }
 0x110   :  { %v95_v49 = vpack.c.bf16 %v93_v47, %v93_v47 }
 0x111   :  { %v80_v50 = vsel %vm79_vm9, %v222_v36, %v76_v48 }
 0x112   :  { %98 = vst.msk [vmem:[#allocation3] sm:$0xf] %vm97_vm7, %v95_v49  ;;  %v82_v51 = vmul.f32 %v80_v50, %v48_v19 }
 0x114   :  { %v88_v52 = vmul.f32 %v214_v39, %v82_v51 }
 0x116   :  { %v94_v53 = vadd.f32 %v215_v42, %v88_v52 }
 0x118   :  { %v96_v54 = vpack.c.bf16 %v94_v53, %v94_v53 }
 0x11a   :  { %99 = vst.msk [vmem:[#allocation3 + $0x4] sm:$0xf] %vm97_vm7, %v96_v54 }
 0x121   :  { %v205_v55 = vld [vmem:[#allocation3] sm:$0xff] }
 0x122   :  { %204 = vmatmul.msk.bf16.vlgmr.msra.gmra.mxu0 %vm31_vm0, %v205_v55 }
 0x19f   :  { %v144_v57 = vpop.f32.mrf.mxu0 }
 0x1a0   :  { %v149_v58 = vadd.f32 %v144_v57, %v108_v56 }
 0x1a2   :  { %152 = vst.msk [vmem:[#allocation2] sm:$0xff] %vm105_vm2, %v149_v58 }
 0x1a7   :  { %v146_v61 = vpop.f32.mrf.mxu0 }
 0x1a8   :  { %v150_v62 = vadd.f32 %v146_v61, %v109_v59 }
 0x1a9   :  { %v157_v63 = vld [vmem:[#allocation2] sm:$0xff] }
 0x1aa   :  { %v163_v0 = vadd.f32 %v216_v60, %v157_v63  ;;  %153 = vst.msk [vmem:[#allocation2 + $0x8] sm:$0xff] %vm105_vm2, %v150_v62 }
 0x1ac   :  { %v167_v1 = vmul.f32 0.044715, %v163_v0  ;;  %v165_v14 = vmul.f32 0.5, %v163_v0 }
 0x1ae   :  { %v169_v2 = vmul.f32 %v167_v1, %v163_v0 }
 0x1b0   :  { %v171_v3 = vmul.f32 %v169_v2, %v163_v0 }
 0x1b1   :  { %v158_v4 = vld [vmem:[#allocation2 + $0x8] sm:$0xff] }
 0x1b2   :  { %v173_v5 = vadd.f32 %v171_v3, %v163_v0  ;;  %v164_v6 = vadd.f32 %v216_v60, %v158_v4 }
 0x1b4   :  { %v175_v7 = vmul.f32 0.7978846, %v173_v5  ;;  %v168_v8 = vmul.f32 0.044715, %v164_v6  ;;  %v166_v19 = vmul.f32 0.5, %v164_v6 }
 0x1b6   :  { %223 = vtanh.f32 %v175_v7  ;;  %v170_v9 = vmul.f32 %v168_v8, %v164_v6 }
 0x1b8   :  { %v172_v10 = vmul.f32 %v170_v9, %v164_v6 }
 0x1ba   :  { %v174_v11 = vadd.f32 %v172_v10, %v164_v6 }
 0x1bc   :  { %v224_v12 = vpop.eup %223  ;;  %v176_v13 = vmul.f32 0.7978846, %v174_v11 }
 0x1bd   :  { %v179_v15 = vadd.f32 1.0, %v224_v12 }
 0x1be   :  { %225 = vtanh.f32 %v176_v13 }
 0x1bf   :  { %v181_v16 = vmul.f32 %v179_v15, %v165_v14 }
 0x1c1   :  { %v183_v17 = vpack.c.bf16 %v181_v16, %v181_v16 }
 0x1c3   :  { %186 = vst.msk [vmem:[%s297_s5] sm:$0xf] %vm185_vm10, %v183_v17 }
 0x1c4   :  { %v226_v18 = vpop.eup %225 }
 0x1c5   :  { %v180_v20 = vadd.f32 1.0, %v226_v18 }
 0x1c7   :  { %v182_v21 = vmul.f32 %v180_v20, %v166_v19 }
 0x1c9   :  { %v184_v22 = vpack.c.bf16 %v182_v21, %v182_v21 }
 0x1cb   :  { %187 = vst.msk [vmem:[%s297_s5 + $0x4] sm:$0xf] %vm185_vm10, %v184_v22 }

// kernel: _lambda_.39
= control target key start
LH: loop header
LB: loop body
LE: loop exit
PB: predicated region body
PF: predicated region fallthrough
CT: control target
= control target key end

     0   :  { %vm24_vm0 = vcmask 261120   ;;  %v147_v1 = vmov 0.0   ;;  %vm66_vm1 = vcmask 523264   ;;  %vm108_vm2 = vcmask 257024   ;;  %s204_s1 = inlined_call_operand.vmem [shape: bf16[64,32], index: 1, kind: input, shape index: {}]   ;;  %s205_s2 = inlined_call_operand.vmem [shape: f32[1,32], index: 2, kind: input, shape index: {}]   ;;  %s206_s0 = inlined_call_operand.vmem [shape: bf16[16,64], index: 0, kind: input, shape index: {}]   ;;  %s207_s3 = inlined_call_operand.vmem [shape: bf16[16,32], index: 3, kind: input, shape index: {}]   ;;  %s208_s4 = inlined_call_operand.vmem [shape: bf16[16,32], index: 4, kind: output, shape index: {}]  }
   0x1   :  { %v140_v0 = vld [vmem:[%s204_s1 + $0x18] sm:$0xff]  ;;  %25 = vst.msk [vmem:[#allocation2] sm:$0xff] %vm24_vm0, %v147_v1  ;;  %v139_v2 = vld [vmem:[%s204_s1 + $0x10] sm:$0xff]  ;;  %v138_v3 = vld [vmem:[%s204_s1 + $0x8] sm:$0xff] }
   0x2   :  { %26 = vst.msk [vmem:[#allocation2 + $0x8] sm:$0xff] %vm24_vm0, %v147_v1  ;;  %74 = vmatpush.bf16.msra.mxu0 %v140_v0  ;;  %v137_v4 = vld [vmem:[%s204_s1] sm:$0xff] }
   0x3   :  { %v136_v5 = vld [vmem:[%s206_s0] sm:$0xff] }
   0x4   :  { %v142_v9 = vld [vmem:[%s207_s3] sm:$0xff]  }
   0x5   :  { %v146_v11 = vld [vmem:[%s205_s2] ss:$0 sm:$0xff]  ;;  %v143_v13 = vunpack.c.l.bf16 %v142_v9  ;;  %v144_v19 = vunpack.c.h.bf16 %v142_v9 }
   0x6   :  { %75 = vmatpush.bf16.msra.mxu0 %v139_v2 }
   0x8   :  { %v27_v6 = vld [vmem:[#allocation2] sm:$0xff] }
   0x9   :  { %v28_v10 = vld [vmem:[#allocation2 + $0x8] sm:$0xff] }
   0xa   :  { %76 = vmatpush.bf16.msra.mxu0 %v138_v3 }
   0xe   :  { %77 = vmatpush.bf16.msra.mxu0 %v137_v4 }
  0x11   :  { %135 = vmatmul.msk.bf16.vlgmr.msra.gmra.mxu0 %vm66_vm1, %v136_v5 }
  0x8e   :  { %v79_v7 = vpop.f32.mrf.mxu0 }
  0x8f   :  { %v84_v8 = vadd.f32 %v79_v7, %v27_v6 }
  0x91   :  { %87 = vst.msk [vmem:[#allocation2] sm:$0xff] %vm24_vm0, %v84_v8 }
  0x96   :  { %v81_v12 = vpop.f32.mrf.mxu0 }
  0x97   :  { %v85_v14 = vadd.f32 %v81_v12, %v28_v10 }
  0x98   :  { %v92_v15 = vld [vmem:[#allocation2] sm:$0xff] }
  0x99   :  { %v98_v16 = vadd.f32 %v146_v11, %v92_v15  ;;  %88 = vst.msk [vmem:[#allocation2 + $0x8] sm:$0xff] %vm24_vm0, %v85_v14 }
  0x9b   :  { %v104_v17 = vadd.f32 %v143_v13, %v98_v16 }
  0x9d   :  { %v106_v18 = vpack.c.bf16 %v104_v17, %v104_v17 }
  0x9f   :  { %109 = vst.msk [vmem:[%s208_s4] sm:$0xf] %vm108_vm2, %v106_v18 }
  0xa0   :  { %v93_v20 = vld [vmem:[#allocation2 + $0x8] sm:$0xff] }
  0xa1   :  { %v99_v21 = vadd.f32 %v146_v11, %v93_v20 }
  0xa3   :  { %v105_v22 = vadd.f32 %v144_v19, %v99_v21 }
  0xa5   :  { %v107_v23 = vpack.c.bf16 %v105_v22, %v105_v22 }
  0xa7   :  { %110 = vst.msk [vmem:[%s208_s4 + $0x4] sm:$0xf] %vm108_vm2, %v107_v23 }

// kernel: _lambda_.45
= control target key start
LH: loop header
LB: loop body
LE: loop exit
PB: predicated region body
PF: predicated region fallthrough
CT: control target
= control target key end

     0   :  { %vm18_vm0 = vcmask 261120   ;;  %v104_v5 = vmov 32.0   ;;  %vm84_vm6 = vcmask 257024   ;;  %s144_s0 = inlined_call_operand.vmem [shape: bf16[16,32], index: 0, kind: input, shape index: {}]   ;;  %s145_s1 = inlined_call_operand.vmem [shape: f32[1,32], index: 1, kind: input, shape index: {}]   ;;  %s146_s2 = inlined_call_operand.vmem [shape: f32[1,32], index: 2, kind: input, shape index: {}]   ;;  %s147_s3 = inlined_call_operand.vmem [shape: bf16[16,32], index: 3, kind: output, shape index: {}]  }
   0x1   :  { %v92_v0 = vld [vmem:[%s144_s0] sm:$0xff]   ;;  %98 = vrcp.f32 %v104_v5 }
   0x2   :  { %v93_v1 = vunpack.c.l.bf16 %v92_v0  ;;  %v94_v3 = vunpack.c.h.bf16 %v92_v0  ;;  %v96_v36 = vld [vmem:[%s145_s1] ss:$0 sm:$0xff] }
   0x3   :  { %v97_v39 = vld [vmem:[%s146_s2] ss:$0 sm:$0xff] }
   0x4   :  { %v19_v2 = vsel %vm18_vm0, %v93_v1, 0.0  ;;  %v22_v4 = vsel %vm18_vm0, %v94_v3, 0.0 }
   0x5   :  { %20 = vadd.xlane.f32.xlu0 %v19_v2 }
   0x7   :  { %v99_v6 = vpop.eup %98 }
   0x8   :  { %v26_v7 = vmul.f32 32.0, %v99_v6  ;;  %vm30_vm1 = vweird.f32 %v99_v6 }
   0xa   :  { %v27_v8 = vsub.f32 1.0, %v26_v7 }
   0xc   :  { %v28_v9 = vmul.f32 %v99_v6, %v27_v8 }
   0xd   :  { %23 = vadd.xlane.f32.xlu0 %v22_v4 }
   0xe   :  { %v29_v10 = vadd.f32 %v99_v6, %v28_v9 }
  0x10   :  { %v31_v11 = vsel %vm30_vm1, %v99_v6, %v29_v10 }
  0x78   :  { %v21_v12 = vpop.xlane.xlu0 %20 }
  0x79   :  { %v32_v13 = vmul.f32 %v31_v11, %v21_v12 }
  0x7b   :  { %v34_v14 = vsub.f32 %v93_v1, %v32_v13 }
  0x7d   :  { %v36_v15 = vmul.f32 %v34_v14, %v34_v14 }
  0x7f   :  { %v38_v16 = vsel %vm18_vm0, %v36_v15, 0.0 }
  0x80   :  { %39 = vadd.xlane.f32.xlu1 %v38_v16  ;;  %v24_v17 = vpop.xlane.xlu0 %23 }
  0x81   :  { %v33_v18 = vmul.f32 %v31_v11, %v24_v17 }
  0x83   :  { %v35_v19 = vsub.f32 %v94_v3, %v33_v18 }
  0x85   :  { %v37_v20 = vmul.f32 %v35_v19, %v35_v19 }
  0x87   :  { %v41_v21 = vsel %vm18_vm0, %v37_v20, 0.0 }
  0x88   :  { %42 = vadd.xlane.f32.xlu1 %v41_v21 }
  0xf3   :  { %v40_v22 = vpop.xlane.xlu1 %39 }
  0xf4   :  { %v44_v23 = vmul.f32 %v40_v22, %v31_v11 }
  0xf6   :  { %v46_v24 = vadd.f32 1e-05, %v44_v23 }
  0xf8   :  { %100 = vrsqrt.f32 %v46_v24  ;;  %vm54_vm3 = vweird.f32 %v46_v24 }
  0xfb   :  { %v43_v25 = vpop.xlane.xlu1 %42 }
  0xfc   :  { %v45_v26 = vmul.f32 %v43_v25, %v31_v11 }
  0xfe   :  { %v101_v27 = vpop.eup %100  ;;  %v47_v28 = vadd.f32 1e-05, %v45_v26 }
  0xff   :  { %v49_v29 = vmul.f32 %v101_v27, %v46_v24  ;;  %vm55_vm2 = vweird.f32 %v101_v27 }
 0x100   :  { %102 = vrsqrt.f32 %v47_v28  ;;  %vm56_vm4 = vmor %vm54_vm3, %vm55_vm2  ;;  %vm64_vm7 = vweird.f32 %v47_v28 }
 0x101   :  { %v50_v30 = vmul.f32 %v101_v27, %v49_v29 }
 0x103   :  { %v51_v31 = vmul.f32 0.5, %v50_v30 }
 0x105   :  { %v52_v32 = vsub.f32 1.5, %v51_v31 }
 0x106   :  { %v103_v33 = vpop.eup %102 }
 0x107   :  { %v53_v34 = vmul.f32 %v101_v27, %v52_v32  ;;  %v59_v35 = vmul.f32 %v103_v33, %v47_v28  ;;  %vm65_vm5 = vweird.f32 %v103_v33 }
 0x108   :  { %vm66_vm8 = vmor %vm64_vm7, %vm65_vm5 }
 0x109   :  { %v57_v37 = vsel %vm56_vm4, %v101_v27, %v53_v34  ;;  %v60_v38 = vmul.f32 %v103_v33, %v59_v35 }
 0x10a   :  { %v68_v40 = vmul.f32 %v57_v37, %v34_v14 }
 0x10b   :  { %v61_v41 = vmul.f32 0.5, %v60_v38 }
 0x10c   :  { %v74_v42 = vmul.f32 %v96_v36, %v68_v40 }
 0x10d   :  { %v62_v43 = vsub.f32 1.5, %v61_v41 }
 0x10e   :  { %v80_v44 = vadd.f32 %v97_v39, %v74_v42 }
 0x10f   :  { %v63_v45 = vmul.f32 %v103_v33, %v62_v43 }
 0x110   :  { %v82_v46 = vpack.c.bf16 %v80_v44, %v80_v44 }
 0x111   :  { %v67_v47 = vsel %vm66_vm8, %v103_v33, %v63_v45 }
 0x112   :  { %85 = vst.msk [vmem:[%s147_s3] sm:$0xf] %vm84_vm6, %v82_v46  ;;  %v69_v48 = vmul.f32 %v67_v47, %v35_v19 }
 0x114   :  { %v75_v49 = vmul.f32 %v96_v36, %v69_v48 }
 0x116   :  { %v81_v50 = vadd.f32 %v97_v39, %v75_v49 }
 0x118   :  { %v83_v51 = vpack.c.bf16 %v81_v50, %v81_v50 }
 0x11a   :  { %86 = vst.msk [vmem:[%s147_s3 + $0x4] sm:$0xf] %vm84_vm6, %v83_v51 }

// kernel: _lambda_.36
= control target key start
LH: loop header
LB: loop body
LE: loop exit
PB: predicated region body
PF: predicated region fallthrough
CT: control target
= control target key end

     0   :  { %vm36_vm0 = vcmask 64512   ;;  %v215_v24 = vlaneseq  ;;  %vm19_vm2 = vcmask 7168   ;;  %v830_v29 = vmov -inf   ;;  %s1146_s1 = inlined_call_operand.vmem [shape: bf16[8,8,8], index: 1, kind: input, shape index: {}]   ;;  %s1147_s0 = inlined_call_operand.vmem [shape: bf16[8,8,8], index: 0, kind: input, shape index: {}]   ;;  %s1148_s2 = inlined_call_operand.vmem [shape: bf16[8,8,8], index: 2, kind: input, shape index: {}]   ;;  %s1149_s3 = inlined_call_operand.vmem [shape: bf16[8,8,8], index: 3, kind: output, shape index: {}]  }
   0x1   :  { %v53_v0 = vld [vmem:[%s1146_s1] sm:$0xf]  ;;  %v55_v1 = vld [vmem:[%s1146_s1 + $0x8] sm:$0xf]  ;;  %v56_v2 = vld [vmem:[%s1146_s1 + $0xc] sm:$0xf] }
   0x2   :  { %v66_v3 = vsel %vm36_vm0, %v53_v0, 0  ;;  %v104_v4 = vsel %vm36_vm0, %v55_v1, 0  ;;  %v123_v5 = vsel %vm36_vm0, %v56_v2, 0  ;;  %v59_v6 = vld [vmem:[%s1146_s1 + $0x18] sm:$0xf]  ;;  %v216_v25 = vand.u32 127, %v215_v24 }
   0x3   :  { %75 = vmatpush.bf16.xpose.msra.mxu0 %v66_v3  ;;  %113 = vmatpush.bf16.xpose.msra.mxu2 %v104_v4  ;;  %v180_v7 = vsel %vm36_vm0, %v59_v6, 0  ;;  %v54_v8 = vld [vmem:[%s1146_s1 + $0x4] sm:$0xf]  ;;  %v60_v9 = vld [vmem:[%s1146_s1 + $0x1c] sm:$0xf]  ;;  %20 = vst.msk [vmem:[#allocation2] sm:$0xff] %vm19_vm2, %v830_v29 }
   0x4   :  { %132 = vmatpush.bf16.xpose.msra.mxu3 %v123_v5  ;;  %v85_v10 = vsel %vm36_vm0, %v54_v8, 0  ;;  %v199_v11 = vsel %vm36_vm0, %v60_v9, 0  ;;  %v58_v12 = vld [vmem:[%s1146_s1 + $0x14] sm:$0xf]  ;;  %v57_v13 = vld [vmem:[%s1146_s1 + $0x10] sm:$0xf] }
   0x5   :  { %94 = vmatpush.bf16.xpose.msra.mxu1 %v85_v10  ;;  %v45_v14 = vld [vmem:[%s1147_s0] sm:$0xf]  ;;  %v47_v15 = vld [vmem:[%s1147_s0 + $0x8] sm:$0xf]  ;;  %v161_v16 = vsel %vm36_vm0, %v58_v12, 0  ;;  %v142_v17 = vsel %vm36_vm0, %v57_v13, 0 }
   0x6   :  { %v48_v18 = vld [vmem:[%s1147_s0 + $0xc] sm:$0xf]  ;;  %v46_v19 = vld [vmem:[%s1147_s0 + $0x4] sm:$0xf]  ;;  %v51_v20 = vld [vmem:[%s1147_s0 + $0x18] sm:$0xf] }
   0x7   :  { %v49_v21 = vld [vmem:[%s1147_s0 + $0x10] sm:$0xf]  ;;  %v52_v22 = vld [vmem:[%s1147_s0 + $0x1c] sm:$0xf]  ;;  %v50_v23 = vld [vmem:[%s1147_s0 + $0x14] sm:$0xf] }
   0x8   :  { %vm219_vm1 = vcmp.lt.s32.totalorder %v216_v25, 8  ;;  %21 = vst.msk [vmem:[#allocation2 + $0x8] sm:$0xff] %vm19_vm2, %v830_v29  ;;  %v831_v59 = vmov 0   ;;  %v832_v60 = vmov 0.0   ;;  %vm490_vm3 = vcmask 1043456  }
   0x9   :  { %22 = vst.msk [vmem:[#allocation2 + $0x10] sm:$0xff] %vm19_vm2, %v830_v29  ;;  %781 = vset.pattern.permute.xlu1 %v831_v59  ;;  %779 = vset.pattern.permute.xlu2 %v831_v59  ;;  %vm747_vm4 = vcmask 60416  }
   0xa   :  { %760 = vmatmul.msk.bf16.vlgmr.msra.gmra.mxu0 %vm36_vm0, %v45_v14  ;;  %762 = vmatmul.msk.bf16.vlgmr.msra.gmra.mxu2 %vm36_vm0, %v47_v15  ;;  %23 = vst.msk [vmem:[#allocation2 + $0x18] sm:$0xff] %vm19_vm2, %v830_v29  ;;  %v230_v61 = vld [vmem:[#allocation2] sm:$0xff] }
   0xb   :  { %189 = vmatpush.bf16.xpose.msrb.mxu2 %v180_v7  ;;  %151 = vmatpush.bf16.xpose.msrb.mxu0 %v142_v17  ;;  %24 = vst.msk [vmem:[#allocation2 + $0x20] sm:$0xff] %vm19_vm2, %v830_v29 }
   0xc   :  { %208 = vmatpush.bf16.xpose.msrb.mxu3 %v199_v11  ;;  %761 = vmatmul.msk.bf16.vlgmr.msra.gmra.mxu1 %vm36_vm0, %v46_v19  ;;  %25 = vst.msk [vmem:[#allocation2 + $0x28] sm:$0xff] %vm19_vm2, %v830_v29 }
   0xd   :  { %170 = vmatpush.bf16.xpose.msrb.mxu1 %v161_v16  ;;  %763 = vmatmul.msk.bf16.vlgmr.msra.gmra.mxu3 %vm36_vm0, %v48_v18  ;;  %26 = vst.msk [vmem:[#allocation2 + $0x30] sm:$0xff] %vm19_vm2, %v830_v29 }
   0xe   :  { %27 = vst.msk [vmem:[#allocation2 + $0x38] sm:$0xff] %vm19_vm2, %v830_v29  ;;  %780 = vset.pattern.permute.xlu0 %v831_v59 }
   0xf   :  { %38 = vst.msk [vmem:[#allocation4 + $0x8] sm:$0xff] %vm36_vm0, %v832_v60  ;;  %v231_v2 = vld [vmem:[#allocation2 + $0x8] sm:$0xff] }
  0x10   :  { %28 = vst.msk [vmem:[#allocation3] sm:$0xff] %vm19_vm2, %v832_v60  ;;  %v232_v0 = vld [vmem:[#allocation2 + $0x10] sm:$0xff] }
  0x11   :  { %29 = vst.msk [vmem:[#allocation3 + $0x8] sm:$0xff] %vm19_vm2, %v832_v60  ;;  %v233_v7 = vld [vmem:[#allocation2 + $0x18] sm:$0xff] }
  0x12   :  { %30 = vst.msk [vmem:[#allocation3 + $0x10] sm:$0xff] %vm19_vm2, %v832_v60  ;;  %v234_v14 = vld [vmem:[#allocation2 + $0x20] sm:$0xff] }
  0x13   :  { %31 = vst.msk [vmem:[#allocation3 + $0x18] sm:$0xff] %vm19_vm2, %v832_v60  ;;  %v235_v11 = vld [vmem:[#allocation2 + $0x28] sm:$0xff] }
  0x14   :  { %32 = vst.msk [vmem:[#allocation3 + $0x20] sm:$0xff] %vm19_vm2, %v832_v60  ;;  %v236_v13 = vld [vmem:[#allocation2 + $0x30] sm:$0xff] }
  0x15   :  { %33 = vst.msk [vmem:[#allocation3 + $0x28] sm:$0xff] %vm19_vm2, %v832_v60  ;;  %v991_v24 = vld [vmem:[#allocation2 + $0x38] sm:$0xff] }
  0x16   :  { %34 = vst.msk [vmem:[#allocation3 + $0x30] sm:$0xff] %vm19_vm2, %v832_v60 }
  0x17   :  { %35 = vst.msk [vmem:[#allocation3 + $0x38] sm:$0xff] %vm19_vm2, %v832_v60 }
  0x18   :  { %37 = vst.msk [vmem:[#allocation4] sm:$0xff] %vm36_vm0, %v832_v60 }
  0x19   :  { %39 = vst.msk [vmem:[#allocation4 + $0x10] sm:$0xff] %vm36_vm0, %v832_v60 }
  0x1a   :  { %766 = vmatmul.msk.bf16.vlgmr.msrb.gmra.mxu2 %vm36_vm0, %v51_v20  ;;  %764 = vmatmul.msk.bf16.vlgmr.msrb.gmra.mxu0 %vm36_vm0, %v49_v21  ;;  %40 = vst.msk [vmem:[#allocation4 + $0x18] sm:$0xff] %vm36_vm0, %v832_v60 }
  0x1b   :  { %41 = vst.msk [vmem:[#allocation4 + $0x20] sm:$0xff] %vm36_vm0, %v832_v60 }
  0x1c   :  { %765 = vmatmul.msk.bf16.vlgmr.msrb.gmra.mxu1 %vm36_vm0, %v50_v23  ;;  %42 = vst.msk [vmem:[#allocation4 + $0x28] sm:$0xff] %vm36_vm0, %v832_v60 }
  0x1d   :  { %767 = vmatmul.msk.bf16.vlgmr.msrb.gmra.mxu3 %vm36_vm0, %v52_v22  ;;  %43 = vst.msk [vmem:[#allocation4 + $0x30] sm:$0xff] %vm36_vm0, %v832_v60 }
  0x1e   :  { %44 = vst.msk [vmem:[#allocation4 + $0x38] sm:$0xff] %vm36_vm0, %v832_v60 }
  0x87   :  { %v77_v26 = vpop.f32.mrf.mxu0 }
  0x88   :  { %v918_v27 = vsel %vm219_vm1, %v77_v26, -1e+30 }
  0x89   :  { %v238_v28 = vsel %vm36_vm0, %v918_v27, -inf  ;;  %v96_v30 = vpop.f32.mrf.mxu1 }
  0x8a   :  { %239 = vmax.xlane.f32.xlu1 %v238_v28  ;;  %v926_v31 = vsel %vm219_vm1, %v96_v30, -1e+30 }
  0x8b   :  { %v241_v36 = vsel %vm36_vm0, %v926_v31, -inf }
  0x8d   :  { %v115_v32 = vpop.f32.mrf.mxu2 }
  0x8e   :  { %v931_v33 = vsel %vm219_vm1, %v115_v32, -1e+30 }
  0x8f   :  { %v244_v35 = vsel %vm36_vm0, %v931_v33, -inf  ;;  %v79_v37 = vpop.f32.mrf.mxu0 }
  0x90   :  { %v134_v34 = vpop.f32.mrf.mxu3  ;;  %245 = vmax.xlane.f32.xlu0 %v244_v35 }
  0x91   :  { %v941_v38 = vsel %vm219_vm1, %v134_v34, -1e+30  ;;  %v98_v39 = vpop.f32.mrf.mxu1 }
  0x92   :  { %242 = vmax.xlane.f32.xlu1 %v241_v36  ;;  %v247_v41 = vsel %vm36_vm0, %v941_v38, -inf }
  0x95   :  { %v117_v40 = vpop.f32.mrf.mxu2 }
  0x97   :  { %v153_v43 = vpop.f32.mrf.mxu0 }
  0x98   :  { %v136_v42 = vpop.f32.mrf.mxu3  ;;  %248 = vmax.xlane.f32.xlu0 %v247_v41  ;;  %v946_v44 = vsel %vm219_vm1, %v153_v43, -1e+30 }
  0x99   :  { %v172_v45 = vpop.f32.mrf.mxu1  ;;  %v250_v49 = vsel %vm36_vm0, %v946_v44, -inf }
  0x9a   :  { %v949_v46 = vsel %vm219_vm1, %v172_v45, -1e+30 }
  0x9b   :  { %v253_v47 = vsel %vm36_vm0, %v949_v46, -inf }
  0x9c   :  { %254 = vmax.xlane.f32.xlu1 %v253_v47 }
  0x9d   :  { %v191_v48 = vpop.f32.mrf.mxu2 }
  0x9e   :  { %v956_v50 = vsel %vm219_vm1, %v191_v48, -1e+30 }
  0x9f   :  { %v256_v52 = vsel %vm36_vm0, %v956_v50, -inf  ;;  %v155_v53 = vpop.f32.mrf.mxu0 }
  0xa0   :  { %v210_v51 = vpop.f32.mrf.mxu3  ;;  %257 = vmax.xlane.f32.xlu2 %v256_v52  ;;  %251 = vmax.xlane.f32.xlu0 %v250_v49  ;;  %v481_v49 = vld [vmem:[%s1148_s2 + $0x8] sm:$0xf]  ;;  %v480_v52 = vld [vmem:[%s1148_s2 + $0x4] sm:$0xf] }
  0xa1   :  { %v961_v54 = vsel %vm219_vm1, %v210_v51, -1e+30  ;;  %v174_v55 = vpop.f32.mrf.mxu1  ;;  %v530_v51 = vsel %vm490_vm3, %v481_v49, 0  ;;  %v511_v53 = vsel %vm490_vm3, %v480_v52, 0 }
  0xa2   :  { %v259_v57 = vsel %vm36_vm0, %v961_v54, -inf  ;;  %539 = vmatpush.bf16.msra.mxu2 %v530_v51  ;;  %520 = vmatpush.bf16.msra.mxu1 %v511_v53  ;;  %v485_v55 = vld [vmem:[%s1148_s2 + $0x18] sm:$0xf] }
  0xa5   :  { %v193_v56 = vpop.f32.mrf.mxu2 }
  0xa6   :  { %v606_v56 = vsel %vm490_vm3, %v485_v55, 0 }
  0xa7   :  { %615 = vmatpush.bf16.msrb.mxu2 %v606_v56 }
  0xa8   :  { %v212_v58 = vpop.f32.mrf.mxu3  ;;  %260 = vmax.xlane.f32.xlu2 %v259_v57  ;;  %v479_v57 = vld [vmem:[%s1148_s2] sm:$0xf] }
  0xa9   :  { %v492_v58 = vsel %vm490_vm3, %v479_v57, 0 }
  0xaa   :  { %501 = vmatpush.bf16.msra.mxu0 %v492_v58 }
  0xfd   :  { %v240_v62 = vpop.xlane.xlu1 %239 }
  0xfe   :  { %v262_v63 = vmax.f32 %v230_v61, %v240_v62 }
 0x100   :  { %656 = vst.msk [vmem:[#allocation2] sm:$0xff] %vm19_vm2, %v262_v63  ;;  %296 = vperm.xlu1 %781, %v262_v63   ;;  %v270_v32 = vsub.f32 %v230_v61, %v262_v63 }
 0x102   :  { %v278_v36 = vmul.f32 1.442695, %v270_v32 }
 0x103   :  { %v246_v1 = vpop.xlane.xlu0 %245 }
 0x104   :  { %v264_v3 = vmax.f32 %v232_v0, %v246_v1 }
 0x105   :  { %v243_v4 = vpop.xlane.xlu1 %242 }
 0x106   :  { %658 = vst.msk [vmem:[#allocation2 + $0x10] sm:$0xff] %vm19_vm2, %v264_v3  ;;  %306 = vperm.xlu2 %779, %v264_v3   ;;  %v263_v5 = vmax.f32 %v231_v2, %v243_v4  ;;  %v272_v6 = vsub.f32 %v232_v0, %v264_v3  ;;  %v482_v0 = vld [vmem:[%s1148_s2 + $0xc] sm:$0xf] }
 0x107   :  { %v549_v3 = vsel %vm490_vm3, %v482_v0, 0 }
 0x108   :  { %657 = vst.msk [vmem:[#allocation2 + $0x8] sm:$0xff] %vm19_vm2, %v263_v5  ;;  %v282_v8 = vmul.f32 1.442695, %v272_v6  ;;  %v271_v22 = vsub.f32 %v231_v2, %v263_v5  ;;  %558 = vmatpush.bf16.msra.mxu3 %v549_v3  ;;  %v360_v3 = vld [vmem:[#allocation3 + $0x10] sm:$0xff] }
 0x10a   :  { %782 = vpow2.f32 %v282_v8  ;;  %v280_v25 = vmul.f32 1.442695, %v271_v22 }
 0x10b   :  { %v249_v9 = vpop.xlane.xlu0 %248 }
 0x10c   :  { %v265_v10 = vmax.f32 %v233_v7, %v249_v9 }
 0x10e   :  { %659 = vst.msk [vmem:[#allocation2 + $0x18] sm:$0xff] %vm19_vm2, %v265_v10  ;;  %301 = vperm.xlu2 %779, %v263_v5   ;;  %311 = vperm.xlu0 %780, %v265_v10   ;;  %v273_v39 = vsub.f32 %v233_v7, %v265_v10 }
 0x10f   :  { %v255_v12 = vpop.xlane.xlu1 %254 }
 0x110   :  { %v267_v15 = vmax.f32 %v235_v11, %v255_v12  ;;  %v986_v20 = vpop.eup %782  ;;  %v284_v41 = vmul.f32 1.442695, %v273_v39 }
 0x112   :  { %661 = vst.msk [vmem:[#allocation2 + $0x28] sm:$0xff] %vm19_vm2, %v267_v15  ;;  %v275_v29 = vsub.f32 %v235_v11, %v267_v15 }
 0x113   :  { %v258_v16 = vpop.xlane.xlu2 %257  ;;  %v252_v17 = vpop.xlane.xlu0 %251 }
 0x114   :  { %v268_v18 = vmax.f32 %v236_v13, %v258_v16  ;;  %v266_v19 = vmax.f32 %v234_v14, %v252_v17  ;;  %v288_v35 = vmul.f32 1.442695, %v275_v29 }
 0x116   :  { %662 = vst.msk [vmem:[#allocation2 + $0x30] sm:$0xff] %vm19_vm2, %v268_v18  ;;  %326 = vperm.xlu2 %779, %v268_v18   ;;  %435 = vperm.xlu0 %780, %v986_v20   ;;  %v274_v21 = vsub.f32 %v234_v14, %v266_v19  ;;  %v276_v43 = vsub.f32 %v236_v13, %v268_v18 }
 0x117   :  { %660 = vst.msk [vmem:[#allocation2 + $0x20] sm:$0xff] %vm19_vm2, %v266_v19 }
 0x118   :  { %v286_v23 = vmul.f32 1.442695, %v274_v21  ;;  %v290_v45 = vmul.f32 1.442695, %v276_v43 }
 0x11a   :  { %784 = vpow2.f32 %v286_v23 }
 0x11b   :  { %v261_v26 = vpop.xlane.xlu2 %260  ;;  %786 = vpow2.f32 %v280_v25 }
 0x11c   :  { %v994_v28 = vmax.f32 %v991_v24, %v261_v26  ;;  %788 = vpow2.f32 %v288_v35  ;;  %v484_v26 = vld [vmem:[%s1148_s2 + $0x14] sm:$0xf] }
 0x11d   :  { %790 = vpow2.f32 %v278_v36  ;;  %v587_v35 = vsel %vm490_vm3, %v484_v26, 0 }
 0x11e   :  { %v277_v30 = vsub.f32 %v991_v24, %v994_v28  ;;  %663 = vst.msk [vmem:[#allocation2 + $0x38] sm:$0xff] %vm19_vm2, %v994_v28  ;;  %331 = vperm.xlu1 %781, %v994_v28   ;;  %316 = vperm.xlu2 %779, %v266_v19   ;;  %792 = vpow2.f32 %v284_v41 }
 0x11f   :  { %794 = vpow2.f32 %v290_v45  ;;  %596 = vmatpush.bf16.msrb.mxu1 %v587_v35  ;;  %v361_v35 = vld [vmem:[#allocation3 + $0x18] sm:$0xff] }
 0x120   :  { %v1001_v34 = vpop.eup %784 }
 0x121   :  { %445 = vperm.xlu0 %780, %v1001_v34   ;;  %v1004_v37 = vpop.eup %786 }
 0x122   :  { %v1007_v40 = vpop.eup %788 }
 0x123   :  { %v1009_v42 = vpop.eup %790 }
 0x124   :  { %v1013_v47 = vpop.eup %792 }
 0x125   :  { %v1016_v48 = vpop.eup %794 }
 0x126   :  { %321 = vperm.xlu1 %781, %v267_v15   ;;  %430 = vperm.xlu2 %779, %v1004_v37  }
 0x12e   :  { %425 = vperm.xlu1 %781, %v1009_v42   ;;  %450 = vperm.xlu2 %779, %v1007_v40  }
 0x136   :  { %440 = vperm.xlu1 %781, %v1013_v47  }
 0x13e   :  { %455 = vperm.xlu1 %781, %v1016_v48  }
 0x160   :  { %v307_v59 = vpop.permute.xlu2 %306 }
 0x161   :  { %v336_v60 = vsub.f32 %v931_v33, %v307_v59  ;;  %v483_v33 = vld [vmem:[%s1148_s2 + $0x10] sm:$0xf] }
 0x163   :  { %v346_v61 = vmul.f32 1.442695, %v336_v60 }
 0x165   :  { %796 = vpow2.f32 %v346_v61 }
 0x168   :  { %v302_v62 = vpop.permute.xlu2 %301 }
 0x169   :  { %v335_v63 = vsub.f32 %v926_v31, %v302_v62  ;;  %v568_v31 = vsel %vm490_vm3, %v483_v33, 0  ;;  %v292_v62 = vmul.f32 1.442695, %v277_v30  ;;  %v359_v30 = vld [vmem:[#allocation3 + $0x8] sm:$0xff] }
 0x16a   :  { %577 = vmatpush.bf16.msrb.mxu0 %v568_v31  ;;  %v367_v31 = vmul.f32 %v1004_v37, %v359_v30 }
 0x16b   :  { %v797_v1 = vpop.eup %796  ;;  %v344_v2 = vmul.f32 1.442695, %v335_v63 }
 0x16c   :  { %v473_v4 = vpack.c.bf16 %v797_v1, %v797_v1  ;;  %v380_v5 = vsel %vm36_vm0, %v797_v1, 0.0 }
 0x16d   :  { %798 = vpow2.f32 %v344_v2  ;;  %381 = vadd.xlane.f32.xlu1 %v380_v5 }
 0x16e   :  { %770 = vmatmul.msk.bf16.vlgmr.msra.gmra.mxu2 %vm36_vm0, %v473_v4  ;;  %v368_v4 = vmul.f32 %v986_v20, %v360_v3  ;;  %v358_v20 = vld [vmem:[#allocation3] sm:$0xff] }
 0x170   :  { %v327_v6 = vpop.permute.xlu2 %326 }
 0x171   :  { %v340_v7 = vsub.f32 %v956_v50, %v327_v6  ;;  %v486_v50 = vld [vmem:[%s1148_s2 + $0x1c] sm:$0xf] }
 0x172   :  { %v297_v8 = vpop.permute.xlu1 %296 }
 0x173   :  { %v799_v9 = vpop.eup %798  ;;  %v354_v10 = vmul.f32 1.442695, %v340_v7  ;;  %v334_v11 = vsub.f32 %v918_v27, %v297_v8  ;;  %v625_v27 = vsel %vm490_vm3, %v486_v50, 0 }
 0x174   :  { %v472_v12 = vpack.c.bf16 %v799_v9, %v799_v9  ;;  %v377_v13 = vsel %vm36_vm0, %v799_v9, 0.0  ;;  %634 = vmatpush.bf16.msrb.mxu3 %v625_v27 }
 0x175   :  { %800 = vpow2.f32 %v354_v10  ;;  %v342_v14 = vmul.f32 1.442695, %v334_v11  ;;  %378 = vadd.xlane.f32.xlu2 %v377_v13  ;;  %v417_v10 = vld [vmem:[#allocation4 + $0x10] sm:$0xff]  ;;  %v416_v11 = vld [vmem:[#allocation4 + $0x8] sm:$0xff] }
 0x176   :  { %769 = vmatmul.msk.bf16.vlgmr.msra.gmra.mxu1 %vm36_vm0, %v472_v12 }
 0x177   :  { %802 = vpow2.f32 %v342_v14 }
 0x178   :  { %v317_v15 = vpop.permute.xlu2 %316 }
 0x179   :  { %v338_v16 = vsub.f32 %v946_v44, %v317_v15  ;;  %v366_v15 = vmul.f32 %v1009_v42, %v358_v20 }
 0x17b   :  { %v801_v17 = vpop.eup %800  ;;  %v350_v18 = vmul.f32 1.442695, %v338_v16 }
 0x17c   :  { %v477_v19 = vpack.c.bf16 %v801_v17, %v801_v17  ;;  %v392_v52 = vsel %vm36_vm0, %v801_v17, 0.0 }
 0x17d   :  { %v803_v21 = vpop.eup %802  ;;  %804 = vpow2.f32 %v350_v18 }
 0x17e   :  { %v471_v22 = vpack.c.bf16 %v803_v21, %v803_v21  ;;  %774 = vmatmul.msk.bf16.vlgmr.msrb.gmra.mxu2 %vm36_vm0, %v477_v19  ;;  %v374_v23 = vsel %vm36_vm0, %v803_v21, 0.0  ;;  %v362_v21 = vld [vmem:[#allocation3 + $0x20] sm:$0xff] }
 0x17f   :  { %375 = vadd.xlane.f32.xlu0 %v374_v23  ;;  %v415_v23 = vld [vmem:[#allocation4] sm:$0xff]  ;;  %v370_v42 = vmul.f32 %v1001_v34, %v362_v21 }
 0x180   :  { %768 = vmatmul.msk.bf16.vlgmr.msra.gmra.mxu0 %vm36_vm0, %v471_v22  ;;  %v312_v44 = vpop.permute.xlu0 %311  ;;  %v431_v1 = vpop.permute.xlu2 %430 }
 0x181   :  { %v337_v25 = vsub.f32 %v941_v38, %v312_v44  ;;  %v464_v16 = vmul.f32 %v431_v1, %v416_v11  ;;  %v365_v1 = vld [vmem:[#allocation3 + $0x38] sm:$0xff] }
 0x183   :  { %v805_v29 = vpop.eup %804  ;;  %v348_v32 = vmul.f32 1.442695, %v337_v25 }
 0x184   :  { %v386_v36 = vsel %vm36_vm0, %v805_v29, 0.0  ;;  %v475_v45 = vpack.c.bf16 %v805_v29, %v805_v29 }
 0x185   :  { %806 = vpow2.f32 %v348_v32 }
 0x187   :  { %387 = vadd.xlane.f32.xlu0 %v386_v36 }
 0x188   :  { %v1084_v5 = vpop.permute.xlu2 %450  ;;  %v436_v28 = vpop.permute.xlu0 %435 }
 0x189   :  { %v465_v12 = vmul.f32 %v436_v28, %v417_v10 }
 0x18b   :  { %v807_v39 = vpop.eup %806 }
 0x18c   :  { %v474_v41 = vpack.c.bf16 %v807_v39, %v807_v39  ;;  %v383_v43 = vsel %vm36_vm0, %v807_v39, 0.0  ;;  %v421_v39 = vld [vmem:[#allocation4 + $0x30] sm:$0xff] }
 0x18d   :  { %384 = vadd.xlane.f32.xlu2 %v383_v43 }
 0x18e   :  { %771 = vmatmul.msk.bf16.vlgmr.msra.gmra.mxu3 %vm36_vm0, %v474_v41 }
 0x190   :  { %v332_v38 = vpop.permute.xlu1 %331  ;;  %772 = vmatmul.msk.bf16.vlgmr.msrb.gmra.mxu0 %vm36_vm0, %v475_v45  ;;  %v369_v45 = vmul.f32 %v1013_v47, %v361_v35 }
 0x191   :  { %v341_v49 = vsub.f32 %v961_v54, %v332_v38 }
 0x193   :  { %v356_v51 = vmul.f32 1.442695, %v341_v49  ;;  %v1088_v8 = vpop.permute.xlu0 %445 }
 0x195   :  { %808 = vpow2.f32 %v356_v51  ;;  %393 = vadd.xlane.f32.xlu2 %v392_v52 }
 0x198   :  { %v322_v53 = vpop.permute.xlu1 %321 }
 0x199   :  { %v339_v55 = vsub.f32 %v949_v46, %v322_v53 }
 0x19b   :  { %v809_v56 = vpop.eup %808  ;;  %v352_v57 = vmul.f32 1.442695, %v339_v55  ;;  %v364_v55 = vld [vmem:[#allocation3 + $0x30] sm:$0xff] }
 0x19c   :  { %v478_v58 = vpack.c.bf16 %v809_v56, %v809_v56  ;;  %v395_v59 = vsel %vm36_vm0, %v809_v56, 0.0 }
 0x19d   :  { %810 = vpow2.f32 %v352_v57  ;;  %396 = vadd.xlane.f32.xlu0 %v395_v59  ;;  %v419_v59 = vld [vmem:[#allocation4 + $0x20] sm:$0xff] }
 0x19e   :  { %775 = vmatmul.msk.bf16.vlgmr.msrb.gmra.mxu3 %vm36_vm0, %v478_v58  ;;  %812 = vpow2.f32 %v292_v62  ;;  %v372_v58 = vmul.f32 %v1016_v48, %v364_v55 }
 0x1a0   :  { %v426_v63 = vpop.permute.xlu1 %425 }
 0x1a1   :  { %v463_v32 = vmul.f32 %v426_v63, %v415_v23  ;;  %v467_v63 = vmul.f32 %v1088_v8, %v419_v59  ;;  %v363_v8 = vld [vmem:[#allocation3 + $0x28] sm:$0xff] }
 0x1a3   :  { %v811_v60 = vpop.eup %810 }
 0x1a4   :  { %v476_v61 = vpack.c.bf16 %v811_v60, %v811_v60  ;;  %v389_v54 = vsel %vm36_vm0, %v811_v60, 0.0  ;;  %v1078_v46 = vpop.eup %812 }
 0x1a5   :  { %390 = vadd.xlane.f32.xlu1 %v389_v54 }
 0x1a6   :  { %773 = vmatmul.msk.bf16.vlgmr.msrb.gmra.mxu1 %vm36_vm0, %v476_v61 }
 0x1a8   :  { %v1081_v0 = vpop.permute.xlu1 %440 }
 0x1b0   :  { %v456_v2 = vpop.permute.xlu1 %455 }
 0x1b1   :  { %460 = vperm.xlu0 %780, %v1078_v46   ;;  %v469_v38 = vmul.f32 %v456_v2, %v421_v39  ;;  %v418_v2 = vld [vmem:[#allocation4 + $0x18] sm:$0xff] }
 0x1b2   :  { %v466_v48 = vmul.f32 %v1081_v0, %v418_v2 }
 0x1e0   :  { %v382_v33 = vpop.xlane.xlu1 %381 }
 0x1e1   :  { %v400_v24 = vadd.f32 %v382_v33, %v368_v4  ;;  %v373_v33 = vmul.f32 %v1078_v46, %v365_v1  ;;  %v371_v46 = vmul.f32 %v1007_v40, %v363_v8 }
 0x1e3   :  { %409 = vst.msk [vmem:[#allocation3 + $0x10] sm:$0xff] %vm19_vm2, %v400_v24 }
 0x1e8   :  { %v379_v6 = vpop.xlane.xlu2 %378 }
 0x1e9   :  { %v399_v7 = vadd.f32 %v379_v6, %v367_v31 }
 0x1ea   :  { %v677_v9 = vld [vmem:[#allocation3 + $0x10] sm:$0xff] }
 0x1eb   :  { %408 = vst.msk [vmem:[#allocation3 + $0x8] sm:$0xff] %vm19_vm2, %v399_v7  ;;  %814 = vrcp.f32 %v677_v9 }
 0x1f1   :  { %v815_v13 = vpop.eup %814  ;;  %v541_v14 = vpop.f32.mrf.mxu2 }
 0x1f2   :  { %v642_v50 = vadd.f32 %v541_v14, %v465_v12  ;;  %703 = vperm.xlu0 %780, %v815_v13   ;;  %v376_v37 = vpop.xlane.xlu0 %375  ;;  %v676_v17 = vld [vmem:[#allocation3 + $0x8] sm:$0xff] }
 0x1f3   :  { %v398_v18 = vadd.f32 %v376_v37, %v366_v15  ;;  %v522_v27 = vpop.f32.mrf.mxu1  ;;  %816 = vrcp.f32 %v676_v17  ;;  %v420_v13 = vld [vmem:[#allocation4 + $0x28] sm:$0xff] }
 0x1f4   :  { %650 = vst.msk [vmem:[#allocation4 + $0x10] sm:$0xff] %vm36_vm0, %v642_v50  ;;  %v641_v19 = vadd.f32 %v522_v27, %v464_v16  ;;  %v422_v16 = vld [vmem:[#allocation4 + $0x38] sm:$0xff]  ;;  %v468_v50 = vmul.f32 %v1084_v5, %v420_v13 }
 0x1f5   :  { %407 = vst.msk [vmem:[#allocation3] sm:$0xff] %vm19_vm2, %v398_v18 }
 0x1f6   :  { %649 = vst.msk [vmem:[#allocation4 + $0x8] sm:$0xff] %vm36_vm0, %v641_v19 }
 0x1f9   :  { %v817_v22 = vpop.eup %816  ;;  %v543_v44 = vpop.f32.mrf.mxu2 }
 0x1fa   :  { %698 = vperm.xlu1 %781, %v817_v22   ;;  %v388_v25 = vpop.xlane.xlu0 %387 }
 0x1fb   :  { %v402_v26 = vadd.f32 %v388_v25, %v370_v42  ;;  %v524_v29 = vpop.f32.mrf.mxu1 }
 0x1fc   :  { %v675_v36 = vld [vmem:[#allocation3] sm:$0xff] }
 0x1fd   :  { %411 = vst.msk [vmem:[#allocation3 + $0x20] sm:$0xff] %vm19_vm2, %v402_v26  ;;  %v503_v41 = vpop.f32.mrf.mxu0  ;;  %818 = vrcp.f32 %v675_v36  ;;  %v669_v26 = vld [vmem:[#allocation4 + $0x10] sm:$0xff]  ;;  %v668_v36 = vld [vmem:[#allocation4 + $0x8] sm:$0xff] }
 0x1fe   :  { %v640_v43 = vadd.f32 %v503_v41, %v463_v32 }
 0x200   :  { %648 = vst.msk [vmem:[#allocation4] sm:$0xff] %vm36_vm0, %v640_v43  ;;  %v385_v49 = vpop.xlane.xlu2 %384 }
 0x201   :  { %v401_v34 = vadd.f32 %v385_v49, %v369_v45  ;;  %v617_v51 = vpop.f32.mrf.mxu2 }
 0x202   :  { %v646_v52 = vadd.f32 %v617_v51, %v469_v38 }
 0x203   :  { %v819_v53 = vpop.eup %818  ;;  %410 = vst.msk [vmem:[#allocation3 + $0x18] sm:$0xff] %vm19_vm2, %v401_v34 }
 0x204   :  { %654 = vst.msk [vmem:[#allocation4 + $0x30] sm:$0xff] %vm36_vm0, %v646_v52  ;;  %693 = vperm.xlu2 %779, %v819_v53   ;;  %v679_v56 = vld [vmem:[#allocation3 + $0x20] sm:$0xff] }
 0x205   :  { %v505_v57 = vpop.f32.mrf.mxu0  ;;  %820 = vrcp.f32 %v679_v56 }
 0x207   :  { %v667_v42 = vld [vmem:[#allocation4] sm:$0xff] }
 0x208   :  { %v394_v47 = vpop.xlane.xlu2 %393 }
 0x209   :  { %v404_v60 = vadd.f32 %v394_v47, %v372_v58  ;;  %v619_v61 = vpop.f32.mrf.mxu2 }
 0x20a   :  { %v678_v54 = vld [vmem:[#allocation3 + $0x18] sm:$0xff] }
 0x20b   :  { %v821_v62 = vpop.eup %820  ;;  %413 = vst.msk [vmem:[#allocation3 + $0x30] sm:$0xff] %vm19_vm2, %v404_v60  ;;  %822 = vrcp.f32 %v678_v54  ;;  %v673_v51 = vld [vmem:[#allocation4 + $0x30] sm:$0xff] }
 0x20c   :  { %713 = vperm.xlu1 %781, %v821_v62  }
 0x20d   :  { %v579_v3 = vpop.f32.mrf.mxu0 }
 0x20e   :  { %v644_v4 = vadd.f32 %v579_v3, %v467_v63 }
 0x210   :  { %652 = vst.msk [vmem:[#allocation4 + $0x20] sm:$0xff] %vm36_vm0, %v644_v4  ;;  %v397_v24 = vpop.xlane.xlu0 %396 }
 0x211   :  { %v823_v28 = vpop.eup %822  ;;  %v405_v30 = vadd.f32 %v397_v24, %v373_v33  ;;  %v560_v31 = vpop.f32.mrf.mxu3 }
 0x212   :  { %v643_v6 = vadd.f32 %v560_v31, %v466_v48  ;;  %708 = vperm.xlu2 %779, %v823_v28   ;;  %v681_v7 = vld [vmem:[#allocation3 + $0x30] sm:$0xff] }
 0x213   :  { %414 = vst.msk [vmem:[#allocation3 + $0x38] sm:$0xff] %vm19_vm2, %v405_v30  ;;  %824 = vrcp.f32 %v681_v7 }
 0x214   :  { %651 = vst.msk [vmem:[#allocation4 + $0x18] sm:$0xff] %vm36_vm0, %v643_v6 }
 0x215   :  { %v581_v9 = vpop.f32.mrf.mxu0 }
 0x217   :  { %v671_v57 = vld [vmem:[#allocation4 + $0x20] sm:$0xff] }
 0x218   :  { %v391_v10 = vpop.xlane.xlu1 %390 }
 0x219   :  { %v825_v0 = vpop.eup %824  ;;  %v403_v20 = vadd.f32 %v391_v10, %v371_v46  ;;  %v562_v11 = vpop.f32.mrf.mxu3 }
 0x21a   :  { %723 = vperm.xlu2 %779, %v825_v0   ;;  %v682_v12 = vld [vmem:[#allocation3 + $0x38] sm:$0xff] }
 0x21b   :  { %412 = vst.msk [vmem:[#allocation3 + $0x28] sm:$0xff] %vm19_vm2, %v403_v20  ;;  %826 = vrcp.f32 %v682_v12  ;;  %v670_v41 = vld [vmem:[#allocation4 + $0x18] sm:$0xff] }
 0x221   :  { %v827_v14 = vpop.eup %826  ;;  %v636_v15 = vpop.f32.mrf.mxu3 }
 0x222   :  { %728 = vperm.xlu1 %781, %v827_v14   ;;  %v680_v37 = vld [vmem:[#allocation3 + $0x28] sm:$0xff] }
 0x223   :  { %v598_v17 = vpop.f32.mrf.mxu1  ;;  %v461_v18 = vpop.permute.xlu0 %460  ;;  %828 = vrcp.f32 %v680_v37 }
 0x224   :  { %v645_v40 = vadd.f32 %v598_v17, %v468_v50  ;;  %v470_v27 = vmul.f32 %v461_v18, %v422_v16 }
 0x226   :  { %653 = vst.msk [vmem:[#allocation4 + $0x28] sm:$0xff] %vm36_vm0, %v645_v40  ;;  %v647_v19 = vadd.f32 %v636_v15, %v470_v27 }
 0x228   :  { %655 = vst.msk [vmem:[#allocation4 + $0x38] sm:$0xff] %vm36_vm0, %v647_v19 }
 0x229   :  { %v829_v21 = vpop.eup %828  ;;  %v638_v22 = vpop.f32.mrf.mxu3 }
 0x22a   :  { %718 = vperm.xlu0 %780, %v829_v21  }
 0x22b   :  { %v600_v23 = vpop.f32.mrf.mxu1 }
 0x22d   :  { %v672_v62 = vld [vmem:[#allocation4 + $0x28] sm:$0xff] }
 0x22f   :  { %v674_v60 = vld [vmem:[#allocation4 + $0x38] sm:$0xff] }
 0x25e   :  { %v694_v44 = vpop.permute.xlu2 %693 }
 0x25f   :  { %v731_v25 = vmul.f32 %v694_v44, %v667_v42 }
 0x261   :  { %v739_v5 = vpack.c.bf16 %v731_v25, %v731_v25 }
 0x263   :  { %748 = vst.msk [vmem:[%s1149_s3] sm:$0xf] %vm747_vm4, %v739_v5 }
 0x264   :  { %v704_v29 = vpop.permute.xlu0 %703 }
 0x265   :  { %v733_v32 = vmul.f32 %v704_v29, %v669_v26 }
 0x267   :  { %v741_v35 = vpack.c.bf16 %v733_v32, %v733_v32 }
 0x269   :  { %750 = vst.msk [vmem:[%s1149_s3 + $0x8] sm:$0xf] %vm747_vm4, %v741_v35 }
 0x26c   :  { %v699_v39 = vpop.permute.xlu1 %698  ;;  %v709_v43 = vpop.permute.xlu2 %708 }
 0x26d   :  { %v732_v45 = vmul.f32 %v699_v39, %v668_v36  ;;  %v734_v38 = vmul.f32 %v709_v43, %v670_v41 }
 0x26f   :  { %v740_v49 = vpack.c.bf16 %v732_v45, %v732_v45  ;;  %v742_v34 = vpack.c.bf16 %v734_v38, %v734_v38 }
 0x271   :  { %749 = vst.msk [vmem:[%s1149_s3 + $0x4] sm:$0xf] %vm747_vm4, %v740_v49 }
 0x272   :  { %751 = vst.msk [vmem:[%s1149_s3 + $0xc] sm:$0xf] %vm747_vm4, %v742_v34 }
 0x274   :  { %v724_v52 = vpop.permute.xlu2 %723 }
 0x275   :  { %v737_v53 = vmul.f32 %v724_v52, %v673_v51 }
 0x277   :  { %v745_v55 = vpack.c.bf16 %v737_v53, %v737_v53 }
 0x279   :  { %754 = vst.msk [vmem:[%s1149_s3 + $0x18] sm:$0xf] %vm747_vm4, %v745_v55 }
 0x27e   :  { %v714_v56 = vpop.permute.xlu1 %713 }
 0x27f   :  { %v735_v58 = vmul.f32 %v714_v56, %v671_v57 }
 0x281   :  { %v743_v47 = vpack.c.bf16 %v735_v58, %v735_v58 }
 0x283   :  { %752 = vst.msk [vmem:[%s1149_s3 + $0x10] sm:$0xf] %vm747_vm4, %v743_v47 }
 0x294   :  { %v729_v59 = vpop.permute.xlu1 %728 }
 0x295   :  { %v738_v61 = vmul.f32 %v729_v59, %v674_v60 }
 0x297   :  { %v746_v54 = vpack.c.bf16 %v738_v61, %v738_v61 }
 0x299   :  { %755 = vst.msk [vmem:[%s1149_s3 + $0x1c] sm:$0xf] %vm747_vm4, %v746_v54 }
 0x29c   :  { %v719_v63 = vpop.permute.xlu0 %718 }
 0x29d   :  { %v736_v1 = vmul.f32 %v719_v63, %v672_v62 }
 0x29f   :  { %v744_v2 = vpack.c.bf16 %v736_v1, %v736_v1 }
 0x2a1   :  { %753 = vst.msk [vmem:[%s1149_s3 + $0x14] sm:$0xf] %vm747_vm4, %v744_v2 }

// kernel: _lambda_.50
= control target key start
LH: loop header
LB: loop body
LE: loop exit
PB: predicated region body
PF: predicated region fallthrough
CT: control target
= control target key end

     0   :  { %vm21_vm0 = vcmask 523264   ;;  %v108_v1 = vmov 0.0   ;;  %vm47_vm1 = vcmask 261120   ;;  %vm83_vm2 = vcmask 519168   ;;  %s151_s1 = inlined_call_operand.vmem [shape: bf16[32,64], index: 1, kind: input, shape index: {}]   ;;  %s152_s2 = inlined_call_operand.vmem [shape: f32[1,64], index: 2, kind: input, shape index: {}]   ;;  %s153_s0 = inlined_call_operand.vmem [shape: bf16[16,32], index: 0, kind: input, shape index: {}]   ;;  %s154_s3 = inlined_call_operand.vmem [shape: bf16[16,64], index: 3, kind: output, shape index: {}]  }
   0x1   :  { %v105_v0 = vld [vmem:[%s151_s1 + $0x8] sm:$0xff]  ;;  %22 = vst.msk [vmem:[#allocation2] sm:$0xff] %vm21_vm0, %v108_v1  ;;  %v104_v2 = vld [vmem:[%s151_s1] sm:$0xff] }
   0x2   :  { %23 = vst.msk [vmem:[#allocation2 + $0x8] sm:$0xff] %vm21_vm0, %v108_v1  ;;  %57 = vmatpush.bf16.msra.mxu0 %v105_v0  ;;  %v103_v3 = vld [vmem:[%s153_s0] sm:$0xff] }
   0x3   :  { %v107_v8 = vld [vmem:[%s152_s2] ss:$0 sm:$0xff] }
   0x6   :  { %58 = vmatpush.bf16.msra.mxu0 %v104_v2 }
   0x8   :  { %v24_v4 = vld [vmem:[#allocation2] sm:$0xff] }
   0x9   :  { %102 = vmatmul.msk.bf16.vlgmr.msra.gmra.mxu0 %vm47_vm1, %v103_v3  ;;  %v25_v7 = vld [vmem:[#allocation2 + $0x8] sm:$0xff] }
  0x86   :  { %v60_v5 = vpop.f32.mrf.mxu0 }
  0x87   :  { %v65_v6 = vadd.f32 %v60_v5, %v24_v4 }
  0x89   :  { %68 = vst.msk [vmem:[#allocation2] sm:$0xff] %vm21_vm0, %v65_v6 }
  0x8e   :  { %v62_v9 = vpop.f32.mrf.mxu0 }
  0x8f   :  { %v66_v10 = vadd.f32 %v62_v9, %v25_v7 }
  0x90   :  { %v73_v11 = vld [vmem:[#allocation2] sm:$0xff] }
  0x91   :  { %v79_v12 = vadd.f32 %v107_v8, %v73_v11  ;;  %69 = vst.msk [vmem:[#allocation2 + $0x8] sm:$0xff] %vm21_vm0, %v66_v10 }
  0x93   :  { %v81_v13 = vpack.c.bf16 %v79_v12, %v79_v12 }
  0x95   :  { %84 = vst.msk [vmem:[%s154_s3] sm:$0xf] %vm83_vm2, %v81_v13 }
  0x98   :  { %v74_v14 = vld [vmem:[#allocation2 + $0x8] sm:$0xff] }
  0x99   :  { %v80_v15 = vadd.f32 %v107_v8, %v74_v14 }
  0x9b   :  { %v82_v16 = vpack.c.bf16 %v80_v15, %v80_v15 }
  0x9d   :  { %85 = vst.msk [vmem:[%s154_s3 + $0x4] sm:$0xf] %vm83_vm2, %v82_v16 }

// kernel: _lambda_.65
= control target key start
LH: loop header
LB: loop body
LE: loop exit
PB: predicated region body
PF: predicated region fallthrough
CT: control target
= control target key end

     0   :  { %vm43_vm0 = vcmask 261120   ;;  %s122_s1 = inlined_call_operand.vmem [shape: bf16[32,128], index: 1, kind: input, shape index: {}]   ;;  %s123_s0 = inlined_call_operand.vmem [shape: bf16[16,32], index: 0, kind: input, shape index: {}]   ;;  %s124_s2 = inlined_call_operand.vmem [shape: f32[16,128], index: 2, kind: output, shape index: {}]  }
   0x1   :  { %v91_v0 = vld [vmem:[%s122_s1 + $0x8] sm:$0xff]  ;;  %v90_v1 = vld [vmem:[%s122_s1] sm:$0xff] }
   0x2   :  { %53 = vmatpush.bf16.msra.mxu0 %v91_v0  ;;  %v89_v2 = vld [vmem:[%s123_s0] sm:$0xff] }
   0x6   :  { %54 = vmatpush.bf16.msra.mxu0 %v90_v1 }
   0x9   :  { %88 = vmatmul.msk.bf16.vlgmr.msra.gmra.mxu0 %vm43_vm0, %v89_v2 }
  0x86   :  { %v56_v3 = vpop.f32.mrf.mxu0 }
  0x87   :  { %70 = vst [vmem:[%s124_s2] sm:$0xff] %v56_v3 }
  0x8e   :  { %v58_v4 = vpop.f32.mrf.mxu0 }
  0x8f   :  { %71 = vst [vmem:[%s124_s2 + $0x8] sm:$0xff] %v58_v4 }

</bundles_post_ra>
